<compile_context>
chip_gen: v6e
topology: v6e:2x2x1
jax: 0.10.0
libtpu: 0.0.40
codegen_flags: <defaults>
</compile_context>

<pallas_src>
import math

import jax
import jax.numpy as jnp
from jax import lax
from jax.experimental import pallas as pl
from jax.experimental.pallas import tpu as pltpu

# Problem size consistent with the module's __init__ (params: (k+1) vectors of 3*n_qubit).
N_QUBIT = 7            # -> D = 128 amplitudes = one full lane width
K = 3                  # entangling layers
D = 2 ** N_QUBIT
S = K + 1              # rotation layers (K entangling + 1 final)
SUBLANES = 8           # state replicated across sublanes -> native (8,128) vregs


# ----------------------------------------------------------------------------
# Plain-JAX glue: per-(layer, qubit) combined 2x2 gate  G = RX(t2) @ RY(t1) @ RX(t0).
# TODO(synk): qml.device / qml.qnode themselves have no Pallas equivalent; the
# circuit structure is compiled here into 28 tiny 2x2 gates (no dense unitaries)
# and simulated gate-by-gate inside the kernel.
# ----------------------------------------------------------------------------
def _rx_mat(t):
    c = jnp.cos(t / 2).astype(jnp.complex64)
    s = jnp.sin(t / 2).astype(jnp.complex64)
    row0 = jnp.stack([c, -1j * s], axis=-1)
    row1 = jnp.stack([-1j * s, c], axis=-1)
    return jnp.stack([row0, row1], axis=-2)


def _ry_mat(t):
    c = jnp.cos(t / 2).astype(jnp.complex64)
    s = jnp.sin(t / 2).astype(jnp.complex64)
    row0 = jnp.stack([c, -s], axis=-1)
    row1 = jnp.stack([s, c], axis=-1)
    return jnp.stack([row0, row1], axis=-2)


def _mm2x2(a, b):
    """Explicit (batched) 2x2 complex product via elementwise ops only, so the
    kernel path and the reference build bit-identical gate values."""
    r0 = jnp.stack([a[..., 0, 0] * b[..., 0, 0] + a[..., 0, 1] * b[..., 1, 0],
                    a[..., 0, 0] * b[..., 0, 1] + a[..., 0, 1] * b[..., 1, 1]], axis=-1)
    r1 = jnp.stack([a[..., 1, 0] * b[..., 0, 0] + a[..., 1, 1] * b[..., 1, 0],
                    a[..., 1, 0] * b[..., 0, 1] + a[..., 1, 1] * b[..., 1, 1]], axis=-1)
    return jnp.stack([r0, r1], axis=-2)


def build_gate_coeffs(params):
    """params (K+1, 3*N_QUBIT) f32 -> flat (S*N_QUBIT*8,) f32 table of the
    combined per-(layer, qubit) gate entries [ar, ai, br, bi, cr, ci, dr, di]."""
    th = jnp.asarray(params, jnp.float32).reshape(S, N_QUBIT, 3)
    g = _mm2x2(_rx_mat(th[..., 2]), _mm2x2(_ry_mat(th[..., 1]), _rx_mat(th[..., 0])))
    coeffs = jnp.stack([jnp.real(g), jnp.imag(g)], axis=-1)    # (S, NQ, 2, 2, 2)
    return coeffs.astype(jnp.float32).reshape(-1)              # (S*NQ*8,) = (224,)


# ----------------------------------------------------------------------------
# Pallas kernel: gate-by-gate statevector evolution fully in VMEM/vregs.
# ----------------------------------------------------------------------------
def _xor_partner(v, stride, bit_f):
    """partner[i] = v[i XOR stride] for stride a power of two, via lane rotations."""
    fwd = pltpu.roll(v, stride, axis=1)        # v[i - stride]  (correct where bit == 1)
    bwd = pltpu.roll(v, D - stride, axis=1)    # v[i + stride]  (correct where bit == 0)
    return bit_f * fwd + (1.0 - bit_f) * bwd


def _circuit_kernel(g_ref, probs_ref):
    lane = lax.broadcasted_iota(jnp.int32, (SUBLANES, D), 1)

    # Per-qubit bit masks (float 0/1), reused across all S layers.
    bitf = [((lane >> (N_QUBIT - 1 - q)) & 1).astype(jnp.float32)
            for q in range(N_QUBIT)]

    # CZ ring diagonal (+-1), identical for every entangling layer.
    cz = jnp.ones((SUBLANES, D), jnp.float32)
    for q in range(N_QUBIT):
        cz = cz * (1.0 - 2.0 * bitf[q] * bitf[(q + 1) % N_QUBIT])

    # |0...0> initial state (amplitude 1 at basis index 0), replicated over sublanes.
    pr = (lane == 0).astype(jnp.float32)
    pim = jnp.zeros((SUBLANES, D), jnp.float32)

    for s in range(S):
        for q in range(N_QUBIT):
            p = N_QUBIT - 1 - q            # wire 0 = MSB
            stride = 1 << p
            b = bitf[q]
            base = (s * N_QUBIT + q) * 8
            ar, ai = g_ref[base + 0], g_ref[base + 1]
            br, bi = g_ref[base + 2], g_ref[base + 3]
            cr, ci = g_ref[base + 4], g_ref[base + 5]
            dr, di = g_ref[base + 6], g_ref[base + 7]

            pr_p = _xor_partner(pr, stride, b)
            pim_p = _xor_partner(pim, stride, b)

            # self coeff: a where bit==0 else d ; partner coeff: b where bit==0 else c
            sr = ar + (dr - ar) * b
            si = ai + (di - ai) * b
            tr = br + (cr - br) * b
            ti = bi + (ci - bi) * b

            nr = sr * pr - si * pim + tr * pr_p - ti * pim_p
            ni = sr * pim + si * pr + tr * pim_p + ti * pr_p
            pr, pim = nr, ni

        if s < K:                          # CZ ring after each of the first K layers
            pr = pr * cz
            pim = pim * cz

    probs_ref[...] = pr * pr + pim * pim


@jax.jit
def generator1_forward(params):
    """Equivalent of Generator1.forward(): returns probs of shape (2**n_qubit,)."""
    gates = build_gate_coeffs(params)      # (224,) f32 -> SMEM scalar table

    probs = pl.pallas_call(
        _circuit_kernel,
        out_shape=jax.ShapeDtypeStruct((SUBLANES, D), jnp.float32),
        grid=(1,),
        in_specs=[pl.BlockSpec(memory_space=pltpu.MemorySpace.SMEM)],
        out_specs=pl.BlockSpec((SUBLANES, D), lambda i: (0, 0)),
        compiler_params=pltpu.CompilerParams(
            dimension_semantics=("arbitrary",),
        ),
    )(gates)
    return probs[0]                        # all sublane rows are identical


# ----------------------------------------------------------------------------
# Pure-JAX reference (dense kron unitaries; independent evolution path).
# ----------------------------------------------------------------------------
def _rot_layer_kron(layer_params):
    u = jnp.array([[1.0 + 0.0j]], dtype=jnp.complex64)
    for q in range(N_QUBIT):
        g = _mm2x2(_rx_mat(layer_params[3 * q + 2]),
                   _mm2x2(_ry_mat(layer_params[3 * q + 1]), _rx_mat(layer_params[3 * q])))
        u = jnp.kron(u, g)
    return u


def _cz_ring_diag():
    idx = jnp.arange(D)
    d = jnp.ones((D,), jnp.float32)
    for q in range(N_QUBIT):
        q2 = (q + 1) % N_QUBIT
        bq = (idx >> (N_QUBIT - 1 - q)) & 1
        bq2 = (idx >> (N_QUBIT - 1 - q2)) & 1
        d = d * (1.0 - 2.0 * (bq * bq2).astype(jnp.float32))
    return d.astype(jnp.complex64)


def reference_probs(params):
    with jax.default_matmul_precision("float32"):
        cz_d = _cz_ring_diag()
        psi = jnp.zeros((D,), jnp.complex64).at[0].set(1.0 + 0.0j)
        for l in range(K):
            psi = (cz_d[:, None] * _rot_layer_kron(params[l])) @ psi
        psi = _rot_layer_kron(params[K]) @ psi
        return (jnp.abs(psi) ** 2).astype(jnp.float32)


if __name__ == "__main__":
    # Deterministic parameter init mirroring the module:
    #   (k+1) parameter vectors of shape (3*n_qubit,) ~ Normal(0, pi/8)
    key = jax.random.PRNGKey(0)
    params = jax.random.normal(key, (K + 1, 3 * N_QUBIT), dtype=jnp.float32) * (math.pi / 8)

    probs = jax.block_until_ready(generator1_forward(params))
    ref = jax.block_until_ready(reference_probs(params))

    assert probs.shape == (D,)
    assert bool(jnp.allclose(jnp.sum(probs), 1.0, atol=1e-4))
    assert bool(jnp.allclose(probs, ref, atol=1e-5))
    print("KERNEL_OK")
</pallas_src>

<mosaic_0001>
module attributes {stable_mosaic.version = 11 : i64} {
  func.func @_circuit_kernel(%arg0: i32, %arg1: memref<224xf32, #tpu.memory_space<smem>>, %arg2: memref<8x128xf32, #tpu.memory_space<vmem>>) attributes {dimension_semantics = [#tpu.dimension_semantics<arbitrary>], iteration_bounds = array<i64: 1>, scalar_prefetch = 0 : i64, scratch_operands = 0 : i64, tpu.core_type = #tpu.core_type<tc>, window_params = [{transform_indices = @transform_0, window_bounds = array<i64: 224>}, {pipeline_mode = #tpu.pipeline_mode<synchronous>, transform_indices = @transform_1, window_bounds = array<i64: 8, 128>}]} {
    %0 = tpu.iota {dimensions = array<i32: 1>} : vector<8x128xi32>
    %c6_i32 = arith.constant 6 : i32
    %1 = vector.broadcast %c6_i32 : i32 to vector<8x128xi32>
    %2 = arith.shrsi %0, %1 : vector<8x128xi32>
    %c1_i32 = arith.constant 1 : i32
    %3 = vector.broadcast %c1_i32 : i32 to vector<8x128xi32>
    %4 = arith.andi %2, %3 : vector<8x128xi32>
    %5 = arith.sitofp %4 : vector<8x128xi32> to vector<8x128xf32>
    %c5_i32 = arith.constant 5 : i32
    %6 = vector.broadcast %c5_i32 : i32 to vector<8x128xi32>
    %7 = arith.shrsi %0, %6 : vector<8x128xi32>
    %c1_i32_0 = arith.constant 1 : i32
    %8 = vector.broadcast %c1_i32_0 : i32 to vector<8x128xi32>
    %9 = arith.andi %7, %8 : vector<8x128xi32>
    %10 = arith.sitofp %9 : vector<8x128xi32> to vector<8x128xf32>
    %c4_i32 = arith.constant 4 : i32
    %11 = vector.broadcast %c4_i32 : i32 to vector<8x128xi32>
    %12 = arith.shrsi %0, %11 : vector<8x128xi32>
    %c1_i32_1 = arith.constant 1 : i32
    %13 = vector.broadcast %c1_i32_1 : i32 to vector<8x128xi32>
    %14 = arith.andi %12, %13 : vector<8x128xi32>
    %15 = arith.sitofp %14 : vector<8x128xi32> to vector<8x128xf32>
    %c3_i32 = arith.constant 3 : i32
    %16 = vector.broadcast %c3_i32 : i32 to vector<8x128xi32>
    %17 = arith.shrsi %0, %16 : vector<8x128xi32>
    %c1_i32_2 = arith.constant 1 : i32
    %18 = vector.broadcast %c1_i32_2 : i32 to vector<8x128xi32>
    %19 = arith.andi %17, %18 : vector<8x128xi32>
    %20 = arith.sitofp %19 : vector<8x128xi32> to vector<8x128xf32>
    %c2_i32 = arith.constant 2 : i32
    %21 = vector.broadcast %c2_i32 : i32 to vector<8x128xi32>
    %22 = arith.shrsi %0, %21 : vector<8x128xi32>
    %c1_i32_3 = arith.constant 1 : i32
    %23 = vector.broadcast %c1_i32_3 : i32 to vector<8x128xi32>
    %24 = arith.andi %22, %23 : vector<8x128xi32>
    %25 = arith.sitofp %24 : vector<8x128xi32> to vector<8x128xf32>
    %c1_i32_4 = arith.constant 1 : i32
    %26 = vector.broadcast %c1_i32_4 : i32 to vector<8x128xi32>
    %27 = arith.shrsi %0, %26 : vector<8x128xi32>
    %c1_i32_5 = arith.constant 1 : i32
    %28 = vector.broadcast %c1_i32_5 : i32 to vector<8x128xi32>
    %29 = arith.andi %27, %28 : vector<8x128xi32>
    %30 = arith.sitofp %29 : vector<8x128xi32> to vector<8x128xf32>
    %c0_i32 = arith.constant 0 : i32
    %31 = vector.broadcast %c0_i32 : i32 to vector<8x128xi32>
    %32 = arith.shrsi %0, %31 : vector<8x128xi32>
    %c1_i32_6 = arith.constant 1 : i32
    %33 = vector.broadcast %c1_i32_6 : i32 to vector<8x128xi32>
    %34 = arith.andi %32, %33 : vector<8x128xi32>
    %35 = arith.sitofp %34 : vector<8x128xi32> to vector<8x128xf32>
    %cst = arith.constant 1.000000e+00 : f32
    %36 = vector.broadcast %cst : f32 to vector<8x128xf32>
    %cst_7 = arith.constant 2.000000e+00 : f32
    %37 = vector.broadcast %cst_7 : f32 to vector<8x128xf32>
    %38 = arith.mulf %37, %5 : vector<8x128xf32>
    %39 = arith.mulf %38, %10 : vector<8x128xf32>
    %cst_8 = arith.constant 1.000000e+00 : f32
    %40 = vector.broadcast %cst_8 : f32 to vector<8x128xf32>
    %41 = arith.subf %40, %39 : vector<8x128xf32>
    %42 = arith.mulf %36, %41 : vector<8x128xf32>
    %cst_9 = arith.constant 2.000000e+00 : f32
    %43 = vector.broadcast %cst_9 : f32 to vector<8x128xf32>
    %44 = arith.mulf %43, %10 : vector<8x128xf32>
    %45 = arith.mulf %44, %15 : vector<8x128xf32>
    %cst_10 = arith.constant 1.000000e+00 : f32
    %46 = vector.broadcast %cst_10 : f32 to vector<8x128xf32>
    %47 = arith.subf %46, %45 : vector<8x128xf32>
    %48 = arith.mulf %42, %47 : vector<8x128xf32>
    %cst_11 = arith.constant 2.000000e+00 : f32
    %49 = vector.broadcast %cst_11 : f32 to vector<8x128xf32>
    %50 = arith.mulf %49, %15 : vector<8x128xf32>
    %51 = arith.mulf %50, %20 : vector<8x128xf32>
    %cst_12 = arith.constant 1.000000e+00 : f32
    %52 = vector.broadcast %cst_12 : f32 to vector<8x128xf32>
    %53 = arith.subf %52, %51 : vector<8x128xf32>
    %54 = arith.mulf %48, %53 : vector<8x128xf32>
    %cst_13 = arith.constant 2.000000e+00 : f32
    %55 = vector.broadcast %cst_13 : f32 to vector<8x128xf32>
    %56 = arith.mulf %55, %20 : vector<8x128xf32>
    %57 = arith.mulf %56, %25 : vector<8x128xf32>
    %cst_14 = arith.constant 1.000000e+00 : f32
    %58 = vector.broadcast %cst_14 : f32 to vector<8x128xf32>
    %59 = arith.subf %58, %57 : vector<8x128xf32>
    %60 = arith.mulf %54, %59 : vector<8x128xf32>
    %cst_15 = arith.constant 2.000000e+00 : f32
    %61 = vector.broadcast %cst_15 : f32 to vector<8x128xf32>
    %62 = arith.mulf %61, %25 : vector<8x128xf32>
    %63 = arith.mulf %62, %30 : vector<8x128xf32>
    %cst_16 = arith.constant 1.000000e+00 : f32
    %64 = vector.broadcast %cst_16 : f32 to vector<8x128xf32>
    %65 = arith.subf %64, %63 : vector<8x128xf32>
    %66 = arith.mulf %60, %65 : vector<8x128xf32>
    %cst_17 = arith.constant 2.000000e+00 : f32
    %67 = vector.broadcast %cst_17 : f32 to vector<8x128xf32>
    %68 = arith.mulf %67, %30 : vector<8x128xf32>
    %69 = arith.mulf %68, %35 : vector<8x128xf32>
    %cst_18 = arith.constant 1.000000e+00 : f32
    %70 = vector.broadcast %cst_18 : f32 to vector<8x128xf32>
    %71 = arith.subf %70, %69 : vector<8x128xf32>
    %72 = arith.mulf %66, %71 : vector<8x128xf32>
    %cst_19 = arith.constant 2.000000e+00 : f32
    %73 = vector.broadcast %cst_19 : f32 to vector<8x128xf32>
    %74 = arith.mulf %73, %35 : vector<8x128xf32>
    %75 = arith.mulf %74, %5 : vector<8x128xf32>
    %cst_20 = arith.constant 1.000000e+00 : f32
    %76 = vector.broadcast %cst_20 : f32 to vector<8x128xf32>
    %77 = arith.subf %76, %75 : vector<8x128xf32>
    %78 = arith.mulf %72, %77 : vector<8x128xf32>
    %c0_i32_21 = arith.constant 0 : i32
    %79 = vector.broadcast %c0_i32_21 : i32 to vector<8x128xi32>
    %80 = arith.cmpi eq, %0, %79 : vector<8x128xi32>
    %81 = arith.extui %80 : vector<8x128xi1> to vector<8x128xi32>
    %82 = arith.sitofp %81 : vector<8x128xi32> to vector<8x128xf32>
    %cst_22 = arith.constant 0.000000e+00 : f32
    %83 = vector.broadcast %cst_22 : f32 to vector<8x128xf32>
    %c0 = arith.constant 0 : index
    %84 = memref.load %arg1[%c0] : memref<224xf32, #tpu.memory_space<smem>>
    %c1 = arith.constant 1 : index
    %85 = memref.load %arg1[%c1] : memref<224xf32, #tpu.memory_space<smem>>
    %c2 = arith.constant 2 : index
    %86 = memref.load %arg1[%c2] : memref<224xf32, #tpu.memory_space<smem>>
    %c3 = arith.constant 3 : index
    %87 = memref.load %arg1[%c3] : memref<224xf32, #tpu.memory_space<smem>>
    %c4 = arith.constant 4 : index
    %88 = memref.load %arg1[%c4] : memref<224xf32, #tpu.memory_space<smem>>
    %c5 = arith.constant 5 : index
    %89 = memref.load %arg1[%c5] : memref<224xf32, #tpu.memory_space<smem>>
    %c6 = arith.constant 6 : index
    %90 = memref.load %arg1[%c6] : memref<224xf32, #tpu.memory_space<smem>>
    %c7 = arith.constant 7 : index
    %91 = memref.load %arg1[%c7] : memref<224xf32, #tpu.memory_space<smem>>
    %c64_i32 = arith.constant 64 : i32
    %92 = tpu.dynamic_rotate %82 by %c64_i32 dim 1 : vector<8x128xf32>, i32 -> vector<8x128xf32>
    %c64_i32_23 = arith.constant 64 : i32
    %93 = tpu.dynamic_rotate %82 by %c64_i32_23 dim 1 : vector<8x128xf32>, i32 -> vector<8x128xf32>
    %94 = arith.mulf %5, %92 : vector<8x128xf32>
    %cst_24 = arith.constant 1.000000e+00 : f32
    %95 = vector.broadcast %cst_24 : f32 to vector<8x128xf32>
    %96 = arith.subf %95, %5 : vector<8x128xf32>
    %97 = arith.mulf %96, %93 : vector<8x128xf32>
    %98 = arith.addf %94, %97 : vector<8x128xf32>
    %c64_i32_25 = arith.constant 64 : i32
    %99 = tpu.dynamic_rotate %83 by %c64_i32_25 dim 1 : vector<8x128xf32>, i32 -> vector<8x128xf32>
    %c64_i32_26 = arith.constant 64 : i32
    %100 = tpu.dynamic_rotate %83 by %c64_i32_26 dim 1 : vector<8x128xf32>, i32 -> vector<8x128xf32>
    %101 = arith.mulf %5, %99 : vector<8x128xf32>
    %cst_27 = arith.constant 1.000000e+00 : f32
    %102 = vector.broadcast %cst_27 : f32 to vector<8x128xf32>
    %103 = arith.subf %102, %5 : vector<8x128xf32>
    %104 = arith.mulf %103, %100 : vector<8x128xf32>
    %105 = arith.addf %101, %104 : vector<8x128xf32>
    %106 = arith.subf %90, %84 : f32
    %107 = vector.broadcast %106 : f32 to vector<8x128xf32>
    %108 = arith.mulf %107, %5 : vector<8x128xf32>
    %109 = vector.broadcast %84 : f32 to vector<8x128xf32>
    %110 = arith.addf %109, %108 : vector<8x128xf32>
    %111 = arith.subf %91, %85 : f32
    %112 = vector.broadcast %111 : f32 to vector<8x128xf32>
    %113 = arith.mulf %112, %5 : vector<8x128xf32>
    %114 = vector.broadcast %85 : f32 to vector<8x128xf32>
    %115 = arith.addf %114, %113 : vector<8x128xf32>
    %116 = arith.subf %88, %86 : f32
    %117 = vector.broadcast %116 : f32 to vector<8x128xf32>
    %118 = arith.mulf %117, %5 : vector<8x128xf32>
    %119 = vector.broadcast %86 : f32 to vector<8x128xf32>
    %120 = arith.addf %119, %118 : vector<8x128xf32>
    %121 = arith.subf %89, %87 : f32
    %122 = vector.broadcast %121 : f32 to vector<8x128xf32>
    %123 = arith.mulf %122, %5 : vector<8x128xf32>
    %124 = vector.broadcast %87 : f32 to vector<8x128xf32>
    %125 = arith.addf %124, %123 : vector<8x128xf32>
    %126 = arith.mulf %110, %82 : vector<8x128xf32>
    %127 = arith.mulf %115, %83 : vector<8x128xf32>
    %128 = arith.subf %126, %127 : vector<8x128xf32>
    %129 = arith.mulf %120, %98 : vector<8x128xf32>
    %130 = arith.addf %128, %129 : vector<8x128xf32>
    %131 = arith.mulf %125, %105 : vector<8x128xf32>
    %132 = arith.subf %130, %131 : vector<8x128xf32>
    %133 = arith.mulf %110, %83 : vector<8x128xf32>
    %134 = arith.mulf %115, %82 : vector<8x128xf32>
    %135 = arith.addf %133, %134 : vector<8x128xf32>
    %136 = arith.mulf %120, %105 : vector<8x128xf32>
    %137 = arith.addf %135, %136 : vector<8x128xf32>
    %138 = arith.mulf %125, %98 : vector<8x128xf32>
    %139 = arith.addf %137, %138 : vector<8x128xf32>
    %c8 = arith.constant 8 : index
    %140 = memref.load %arg1[%c8] : memref<224xf32, #tpu.memory_space<smem>>
    %c9 = arith.constant 9 : index
    %141 = memref.load %arg1[%c9] : memref<224xf32, #tpu.memory_space<smem>>
    %c10 = arith.constant 10 : index
    %142 = memref.load %arg1[%c10] : memref<224xf32, #tpu.memory_space<smem>>
    %c11 = arith.constant 11 : index
    %143 = memref.load %arg1[%c11] : memref<224xf32, #tpu.memory_space<smem>>
    %c12 = arith.constant 12 : index
    %144 = memref.load %arg1[%c12] : memref<224xf32, #tpu.memory_space<smem>>
    %c13 = arith.constant 13 : index
    %145 = memref.load %arg1[%c13] : memref<224xf32, #tpu.memory_space<smem>>
    %c14 = arith.constant 14 : index
    %146 = memref.load %arg1[%c14] : memref<224xf32, #tpu.memory_space<smem>>
    %c15 = arith.constant 15 : index
    %147 = memref.load %arg1[%c15] : memref<224xf32, #tpu.memory_space<smem>>
    %c32_i32 = arith.constant 32 : i32
    %148 = tpu.dynamic_rotate %132 by %c32_i32 dim 1 : vector<8x128xf32>, i32 -> vector<8x128xf32>
    %c96_i32 = arith.constant 96 : i32
    %149 = tpu.dynamic_rotate %132 by %c96_i32 dim 1 : vector<8x128xf32>, i32 -> vector<8x128xf32>
    %150 = arith.mulf %10, %148 : vector<8x128xf32>
    %cst_28 = arith.constant 1.000000e+00 : f32
    %151 = vector.broadcast %cst_28 : f32 to vector<8x128xf32>
    %152 = arith.subf %151, %10 : vector<8x128xf32>
    %153 = arith.mulf %152, %149 : vector<8x128xf32>
    %154 = arith.addf %150, %153 : vector<8x128xf32>
    %c32_i32_29 = arith.constant 32 : i32
    %155 = tpu.dynamic_rotate %139 by %c32_i32_29 dim 1 : vector<8x128xf32>, i32 -> vector<8x128xf32>
    %c96_i32_30 = arith.constant 96 : i32
    %156 = tpu.dynamic_rotate %139 by %c96_i32_30 dim 1 : vector<8x128xf32>, i32 -> vector<8x128xf32>
    %157 = arith.mulf %10, %155 : vector<8x128xf32>
    %cst_31 = arith.constant 1.000000e+00 : f32
    %158 = vector.broadcast %cst_31 : f32 to vector<8x128xf32>
    %159 = arith.subf %158, %10 : vector<8x128xf32>
    %160 = arith.mulf %159, %156 : vector<8x128xf32>
    %161 = arith.addf %157, %160 : vector<8x128xf32>
    %162 = arith.subf %146, %140 : f32
    %163 = vector.broadcast %162 : f32 to vector<8x128xf32>
    %164 = arith.mulf %163, %10 : vector<8x128xf32>
    %165 = vector.broadcast %140 : f32 to vector<8x128xf32>
    %166 = arith.addf %165, %164 : vector<8x128xf32>
    %167 = arith.subf %147, %141 : f32
    %168 = vector.broadcast %167 : f32 to vector<8x128xf32>
    %169 = arith.mulf %168, %10 : vector<8x128xf32>
    %170 = vector.broadcast %141 : f32 to vector<8x128xf32>
    %171 = arith.addf %170, %169 : vector<8x128xf32>
    %172 = arith.subf %144, %142 : f32
    %173 = vector.broadcast %172 : f32 to vector<8x128xf32>
    %174 = arith.mulf %173, %10 : vector<8x128xf32>
    %175 = vector.broadcast %142 : f32 to vector<8x128xf32>
    %176 = arith.addf %175, %174 : vector<8x128xf32>
    %177 = arith.subf %145, %143 : f32
    %178 = vector.broadcast %177 : f32 to vector<8x128xf32>
    %179 = arith.mulf %178, %10 : vector<8x128xf32>
    %180 = vector.broadcast %143 : f32 to vector<8x128xf32>
    %181 = arith.addf %180, %179 : vector<8x128xf32>
    %182 = arith.mulf %166, %132 : vector<8x128xf32>
    %183 = arith.mulf %171, %139 : vector<8x128xf32>
    %184 = arith.subf %182, %183 : vector<8x128xf32>
    %185 = arith.mulf %176, %154 : vector<8x128xf32>
    %186 = arith.addf %184, %185 : vector<8x128xf32>
    %187 = arith.mulf %181, %161 : vector<8x128xf32>
    %188 = arith.subf %186, %187 : vector<8x128xf32>
    %189 = arith.mulf %166, %139 : vector<8x128xf32>
    %190 = arith.mulf %171, %132 : vector<8x128xf32>
    %191 = arith.addf %189, %190 : vector<8x128xf32>
    %192 = arith.mulf %176, %161 : vector<8x128xf32>
    %193 = arith.addf %191, %192 : vector<8x128xf32>
    %194 = arith.mulf %181, %154 : vector<8x128xf32>
    %195 = arith.addf %193, %194 : vector<8x128xf32>
    %c16 = arith.constant 16 : index
    %196 = memref.load %arg1[%c16] : memref<224xf32, #tpu.memory_space<smem>>
    %c17 = arith.constant 17 : index
    %197 = memref.load %arg1[%c17] : memref<224xf32, #tpu.memory_space<smem>>
    %c18 = arith.constant 18 : index
    %198 = memref.load %arg1[%c18] : memref<224xf32, #tpu.memory_space<smem>>
    %c19 = arith.constant 19 : index
    %199 = memref.load %arg1[%c19] : memref<224xf32, #tpu.memory_space<smem>>
    %c20 = arith.constant 20 : index
    %200 = memref.load %arg1[%c20] : memref<224xf32, #tpu.memory_space<smem>>
    %c21 = arith.constant 21 : index
    %201 = memref.load %arg1[%c21] : memref<224xf32, #tpu.memory_space<smem>>
    %c22 = arith.constant 22 : index
    %202 = memref.load %arg1[%c22] : memref<224xf32, #tpu.memory_space<smem>>
    %c23 = arith.constant 23 : index
    %203 = memref.load %arg1[%c23] : memref<224xf32, #tpu.memory_space<smem>>
    %c16_i32 = arith.constant 16 : i32
    %204 = tpu.dynamic_rotate %188 by %c16_i32 dim 1 : vector<8x128xf32>, i32 -> vector<8x128xf32>
    %c112_i32 = arith.constant 112 : i32
    %205 = tpu.dynamic_rotate %188 by %c112_i32 dim 1 : vector<8x128xf32>, i32 -> vector<8x128xf32>
    %206 = arith.mulf %15, %204 : vector<8x128xf32>
    %cst_32 = arith.constant 1.000000e+00 : f32
    %207 = vector.broadcast %cst_32 : f32 to vector<8x128xf32>
    %208 = arith.subf %207, %15 : vector<8x128xf32>
    %209 = arith.mulf %208, %205 : vector<8x128xf32>
    %210 = arith.addf %206, %209 : vector<8x128xf32>
    %c16_i32_33 = arith.constant 16 : i32
    %211 = tpu.dynamic_rotate %195 by %c16_i32_33 dim 1 : vector<8x128xf32>, i32 -> vector<8x128xf32>
    %c112_i32_34 = arith.constant 112 : i32
    %212 = tpu.dynamic_rotate %195 by %c112_i32_34 dim 1 : vector<8x128xf32>, i32 -> vector<8x128xf32>
    %213 = arith.mulf %15, %211 : vector<8x128xf32>
    %cst_35 = arith.constant 1.000000e+00 : f32
    %214 = vector.broadcast %cst_35 : f32 to vector<8x128xf32>
    %215 = arith.subf %214, %15 : vector<8x128xf32>
    %216 = arith.mulf %215, %212 : vector<8x128xf32>
    %217 = arith.addf %213, %216 : vector<8x128xf32>
    %218 = arith.subf %202, %196 : f32
    %219 = vector.broadcast %218 : f32 to vector<8x128xf32>
    %220 = arith.mulf %219, %15 : vector<8x128xf32>
    %221 = vector.broadcast %196 : f32 to vector<8x128xf32>
    %222 = arith.addf %221, %220 : vector<8x128xf32>
    %223 = arith.subf %203, %197 : f32
    %224 = vector.broadcast %223 : f32 to vector<8x128xf32>
    %225 = arith.mulf %224, %15 : vector<8x128xf32>
    %226 = vector.broadcast %197 : f32 to vector<8x128xf32>
    %227 = arith.addf %226, %225 : vector<8x128xf32>
    %228 = arith.subf %200, %198 : f32
    %229 = vector.broadcast %228 : f32 to vector<8x128xf32>
    %230 = arith.mulf %229, %15 : vector<8x128xf32>
    %231 = vector.broadcast %198 : f32 to vector<8x128xf32>
    %232 = arith.addf %231, %230 : vector<8x128xf32>
    %233 = arith.subf %201, %199 : f32
    %234 = vector.broadcast %233 : f32 to vector<8x128xf32>
    %235 = arith.mulf %234, %15 : vector<8x128xf32>
    %236 = vector.broadcast %199 : f32 to vector<8x128xf32>
    %237 = arith.addf %236, %235 : vector<8x128xf32>
    %238 = arith.mulf %222, %188 : vector<8x128xf32>
    %239 = arith.mulf %227, %195 : vector<8x128xf32>
    %240 = arith.subf %238, %239 : vector<8x128xf32>
    %241 = arith.mulf %232, %210 : vector<8x128xf32>
    %242 = arith.addf %240, %241 : vector<8x128xf32>
    %243 = arith.mulf %237, %217 : vector<8x128xf32>
    %244 = arith.subf %242, %243 : vector<8x128xf32>
    %245 = arith.mulf %222, %195 : vector<8x128xf32>
    %246 = arith.mulf %227, %188 : vector<8x128xf32>
    %247 = arith.addf %245, %246 : vector<8x128xf32>
    %248 = arith.mulf %232, %217 : vector<8x128xf32>
    %249 = arith.addf %247, %248 : vector<8x128xf32>
    %250 = arith.mulf %237, %210 : vector<8x128xf32>
    %251 = arith.addf %249, %250 : vector<8x128xf32>
    %c24 = arith.constant 24 : index
    %252 = memref.load %arg1[%c24] : memref<224xf32, #tpu.memory_space<smem>>
    %c25 = arith.constant 25 : index
    %253 = memref.load %arg1[%c25] : memref<224xf32, #tpu.memory_space<smem>>
    %c26 = arith.constant 26 : index
    %254 = memref.load %arg1[%c26] : memref<224xf32, #tpu.memory_space<smem>>
    %c27 = arith.constant 27 : index
    %255 = memref.load %arg1[%c27] : memref<224xf32, #tpu.memory_space<smem>>
    %c28 = arith.constant 28 : index
    %256 = memref.load %arg1[%c28] : memref<224xf32, #tpu.memory_space<smem>>
    %c29 = arith.constant 29 : index
    %257 = memref.load %arg1[%c29] : memref<224xf32, #tpu.memory_space<smem>>
    %c30 = arith.constant 30 : index
    %258 = memref.load %arg1[%c30] : memref<224xf32, #tpu.memory_space<smem>>
    %c31 = arith.constant 31 : index
    %259 = memref.load %arg1[%c31] : memref<224xf32, #tpu.memory_space<smem>>
    %c8_i32 = arith.constant 8 : i32
    %260 = tpu.dynamic_rotate %244 by %c8_i32 dim 1 : vector<8x128xf32>, i32 -> vector<8x128xf32>
    %c120_i32 = arith.constant 120 : i32
    %261 = tpu.dynamic_rotate %244 by %c120_i32 dim 1 : vector<8x128xf32>, i32 -> vector<8x128xf32>
    %262 = arith.mulf %20, %260 : vector<8x128xf32>
    %cst_36 = arith.constant 1.000000e+00 : f32
    %263 = vector.broadcast %cst_36 : f32 to vector<8x128xf32>
    %264 = arith.subf %263, %20 : vector<8x128xf32>
    %265 = arith.mulf %264, %261 : vector<8x128xf32>
    %266 = arith.addf %262, %265 : vector<8x128xf32>
    %c8_i32_37 = arith.constant 8 : i32
    %267 = tpu.dynamic_rotate %251 by %c8_i32_37 dim 1 : vector<8x128xf32>, i32 -> vector<8x128xf32>
    %c120_i32_38 = arith.constant 120 : i32
    %268 = tpu.dynamic_rotate %251 by %c120_i32_38 dim 1 : vector<8x128xf32>, i32 -> vector<8x128xf32>
    %269 = arith.mulf %20, %267 : vector<8x128xf32>
    %cst_39 = arith.constant 1.000000e+00 : f32
    %270 = vector.broadcast %cst_39 : f32 to vector<8x128xf32>
    %271 = arith.subf %270, %20 : vector<8x128xf32>
    %272 = arith.mulf %271, %268 : vector<8x128xf32>
    %273 = arith.addf %269, %272 : vector<8x128xf32>
    %274 = arith.subf %258, %252 : f32
    %275 = vector.broadcast %274 : f32 to vector<8x128xf32>
    %276 = arith.mulf %275, %20 : vector<8x128xf32>
    %277 = vector.broadcast %252 : f32 to vector<8x128xf32>
    %278 = arith.addf %277, %276 : vector<8x128xf32>
    %279 = arith.subf %259, %253 : f32
    %280 = vector.broadcast %279 : f32 to vector<8x128xf32>
    %281 = arith.mulf %280, %20 : vector<8x128xf32>
    %282 = vector.broadcast %253 : f32 to vector<8x128xf32>
    %283 = arith.addf %282, %281 : vector<8x128xf32>
    %284 = arith.subf %256, %254 : f32
    %285 = vector.broadcast %284 : f32 to vector<8x128xf32>
    %286 = arith.mulf %285, %20 : vector<8x128xf32>
    %287 = vector.broadcast %254 : f32 to vector<8x128xf32>
    %288 = arith.addf %287, %286 : vector<8x128xf32>
    %289 = arith.subf %257, %255 : f32
    %290 = vector.broadcast %289 : f32 to vector<8x128xf32>
    %291 = arith.mulf %290, %20 : vector<8x128xf32>
    %292 = vector.broadcast %255 : f32 to vector<8x128xf32>
    %293 = arith.addf %292, %291 : vector<8x128xf32>
    %294 = arith.mulf %278, %244 : vector<8x128xf32>
    %295 = arith.mulf %283, %251 : vector<8x128xf32>
    %296 = arith.subf %294, %295 : vector<8x128xf32>
    %297 = arith.mulf %288, %266 : vector<8x128xf32>
    %298 = arith.addf %296, %297 : vector<8x128xf32>
    %299 = arith.mulf %293, %273 : vector<8x128xf32>
    %300 = arith.subf %298, %299 : vector<8x128xf32>
    %301 = arith.mulf %278, %251 : vector<8x128xf32>
    %302 = arith.mulf %283, %244 : vector<8x128xf32>
    %303 = arith.addf %301, %302 : vector<8x128xf32>
    %304 = arith.mulf %288, %273 : vector<8x128xf32>
    %305 = arith.addf %303, %304 : vector<8x128xf32>
    %306 = arith.mulf %293, %266 : vector<8x128xf32>
    %307 = arith.addf %305, %306 : vector<8x128xf32>
    %c32 = arith.constant 32 : index
    %308 = memref.load %arg1[%c32] : memref<224xf32, #tpu.memory_space<smem>>
    %c33 = arith.constant 33 : index
    %309 = memref.load %arg1[%c33] : memref<224xf32, #tpu.memory_space<smem>>
    %c34 = arith.constant 34 : index
    %310 = memref.load %arg1[%c34] : memref<224xf32, #tpu.memory_space<smem>>
    %c35 = arith.constant 35 : index
    %311 = memref.load %arg1[%c35] : memref<224xf32, #tpu.memory_space<smem>>
    %c36 = arith.constant 36 : index
    %312 = memref.load %arg1[%c36] : memref<224xf32, #tpu.memory_space<smem>>
    %c37 = arith.constant 37 : index
    %313 = memref.load %arg1[%c37] : memref<224xf32, #tpu.memory_space<smem>>
    %c38 = arith.constant 38 : index
    %314 = memref.load %arg1[%c38] : memref<224xf32, #tpu.memory_space<smem>>
    %c39 = arith.constant 39 : index
    %315 = memref.load %arg1[%c39] : memref<224xf32, #tpu.memory_space<smem>>
    %c4_i32_40 = arith.constant 4 : i32
    %316 = tpu.dynamic_rotate %300 by %c4_i32_40 dim 1 : vector<8x128xf32>, i32 -> vector<8x128xf32>
    %c124_i32 = arith.constant 124 : i32
    %317 = tpu.dynamic_rotate %300 by %c124_i32 dim 1 : vector<8x128xf32>, i32 -> vector<8x128xf32>
    %318 = arith.mulf %25, %316 : vector<8x128xf32>
    %cst_41 = arith.constant 1.000000e+00 : f32
    %319 = vector.broadcast %cst_41 : f32 to vector<8x128xf32>
    %320 = arith.subf %319, %25 : vector<8x128xf32>
    %321 = arith.mulf %320, %317 : vector<8x128xf32>
    %322 = arith.addf %318, %321 : vector<8x128xf32>
    %c4_i32_42 = arith.constant 4 : i32
    %323 = tpu.dynamic_rotate %307 by %c4_i32_42 dim 1 : vector<8x128xf32>, i32 -> vector<8x128xf32>
    %c124_i32_43 = arith.constant 124 : i32
    %324 = tpu.dynamic_rotate %307 by %c124_i32_43 dim 1 : vector<8x128xf32>, i32 -> vector<8x128xf32>
    %325 = arith.mulf %25, %323 : vector<8x128xf32>
    %cst_44 = arith.constant 1.000000e+00 : f32
    %326 = vector.broadcast %cst_44 : f32 to vector<8x128xf32>
    %327 = arith.subf %326, %25 : vector<8x128xf32>
    %328 = arith.mulf %327, %324 : vector<8x128xf32>
    %329 = arith.addf %325, %328 : vector<8x128xf32>
    %330 = arith.subf %314, %308 : f32
    %331 = vector.broadcast %330 : f32 to vector<8x128xf32>
    %332 = arith.mulf %331, %25 : vector<8x128xf32>
    %333 = vector.broadcast %308 : f32 to vector<8x128xf32>
    %334 = arith.addf %333, %332 : vector<8x128xf32>
    %335 = arith.subf %315, %309 : f32
    %336 = vector.broadcast %335 : f32 to vector<8x128xf32>
    %337 = arith.mulf %336, %25 : vector<8x128xf32>
    %338 = vector.broadcast %309 : f32 to vector<8x128xf32>
    %339 = arith.addf %338, %337 : vector<8x128xf32>
    %340 = arith.subf %312, %310 : f32
    %341 = vector.broadcast %340 : f32 to vector<8x128xf32>
    %342 = arith.mulf %341, %25 : vector<8x128xf32>
    %343 = vector.broadcast %310 : f32 to vector<8x128xf32>
    %344 = arith.addf %343, %342 : vector<8x128xf32>
    %345 = arith.subf %313, %311 : f32
    %346 = vector.broadcast %345 : f32 to vector<8x128xf32>
    %347 = arith.mulf %346, %25 : vector<8x128xf32>
    %348 = vector.broadcast %311 : f32 to vector<8x128xf32>
    %349 = arith.addf %348, %347 : vector<8x128xf32>
    %350 = arith.mulf %334, %300 : vector<8x128xf32>
    %351 = arith.mulf %339, %307 : vector<8x128xf32>
    %352 = arith.subf %350, %351 : vector<8x128xf32>
    %353 = arith.mulf %344, %322 : vector<8x128xf32>
    %354 = arith.addf %352, %353 : vector<8x128xf32>
    %355 = arith.mulf %349, %329 : vector<8x128xf32>
    %356 = arith.subf %354, %355 : vector<8x128xf32>
    %357 = arith.mulf %334, %307 : vector<8x128xf32>
    %358 = arith.mulf %339, %300 : vector<8x128xf32>
    %359 = arith.addf %357, %358 : vector<8x128xf32>
    %360 = arith.mulf %344, %329 : vector<8x128xf32>
    %361 = arith.addf %359, %360 : vector<8x128xf32>
    %362 = arith.mulf %349, %322 : vector<8x128xf32>
    %363 = arith.addf %361, %362 : vector<8x128xf32>
    %c40 = arith.constant 40 : index
    %364 = memref.load %arg1[%c40] : memref<224xf32, #tpu.memory_space<smem>>
    %c41 = arith.constant 41 : index
    %365 = memref.load %arg1[%c41] : memref<224xf32, #tpu.memory_space<smem>>
    %c42 = arith.constant 42 : index
    %366 = memref.load %arg1[%c42] : memref<224xf32, #tpu.memory_space<smem>>
    %c43 = arith.constant 43 : index
    %367 = memref.load %arg1[%c43] : memref<224xf32, #tpu.memory_space<smem>>
    %c44 = arith.constant 44 : index
    %368 = memref.load %arg1[%c44] : memref<224xf32, #tpu.memory_space<smem>>
    %c45 = arith.constant 45 : index
    %369 = memref.load %arg1[%c45] : memref<224xf32, #tpu.memory_space<smem>>
    %c46 = arith.constant 46 : index
    %370 = memref.load %arg1[%c46] : memref<224xf32, #tpu.memory_space<smem>>
    %c47 = arith.constant 47 : index
    %371 = memref.load %arg1[%c47] : memref<224xf32, #tpu.memory_space<smem>>
    %c2_i32_45 = arith.constant 2 : i32
    %372 = tpu.dynamic_rotate %356 by %c2_i32_45 dim 1 : vector<8x128xf32>, i32 -> vector<8x128xf32>
    %c126_i32 = arith.constant 126 : i32
    %373 = tpu.dynamic_rotate %356 by %c126_i32 dim 1 : vector<8x128xf32>, i32 -> vector<8x128xf32>
    %374 = arith.mulf %30, %372 : vector<8x128xf32>
    %cst_46 = arith.constant 1.000000e+00 : f32
    %375 = vector.broadcast %cst_46 : f32 to vector<8x128xf32>
    %376 = arith.subf %375, %30 : vector<8x128xf32>
    %377 = arith.mulf %376, %373 : vector<8x128xf32>
    %378 = arith.addf %374, %377 : vector<8x128xf32>
    %c2_i32_47 = arith.constant 2 : i32
    %379 = tpu.dynamic_rotate %363 by %c2_i32_47 dim 1 : vector<8x128xf32>, i32 -> vector<8x128xf32>
    %c126_i32_48 = arith.constant 126 : i32
    %380 = tpu.dynamic_rotate %363 by %c126_i32_48 dim 1 : vector<8x128xf32>, i32 -> vector<8x128xf32>
    %381 = arith.mulf %30, %379 : vector<8x128xf32>
    %cst_49 = arith.constant 1.000000e+00 : f32
    %382 = vector.broadcast %cst_49 : f32 to vector<8x128xf32>
    %383 = arith.subf %382, %30 : vector<8x128xf32>
    %384 = arith.mulf %383, %380 : vector<8x128xf32>
    %385 = arith.addf %381, %384 : vector<8x128xf32>
    %386 = arith.subf %370, %364 : f32
    %387 = vector.broadcast %386 : f32 to vector<8x128xf32>
    %388 = arith.mulf %387, %30 : vector<8x128xf32>
    %389 = vector.broadcast %364 : f32 to vector<8x128xf32>
    %390 = arith.addf %389, %388 : vector<8x128xf32>
    %391 = arith.subf %371, %365 : f32
    %392 = vector.broadcast %391 : f32 to vector<8x128xf32>
    %393 = arith.mulf %392, %30 : vector<8x128xf32>
    %394 = vector.broadcast %365 : f32 to vector<8x128xf32>
    %395 = arith.addf %394, %393 : vector<8x128xf32>
    %396 = arith.subf %368, %366 : f32
    %397 = vector.broadcast %396 : f32 to vector<8x128xf32>
    %398 = arith.mulf %397, %30 : vector<8x128xf32>
    %399 = vector.broadcast %366 : f32 to vector<8x128xf32>
    %400 = arith.addf %399, %398 : vector<8x128xf32>
    %401 = arith.subf %369, %367 : f32
    %402 = vector.broadcast %401 : f32 to vector<8x128xf32>
    %403 = arith.mulf %402, %30 : vector<8x128xf32>
    %404 = vector.broadcast %367 : f32 to vector<8x128xf32>
    %405 = arith.addf %404, %403 : vector<8x128xf32>
    %406 = arith.mulf %390, %356 : vector<8x128xf32>
    %407 = arith.mulf %395, %363 : vector<8x128xf32>
    %408 = arith.subf %406, %407 : vector<8x128xf32>
    %409 = arith.mulf %400, %378 : vector<8x128xf32>
    %410 = arith.addf %408, %409 : vector<8x128xf32>
    %411 = arith.mulf %405, %385 : vector<8x128xf32>
    %412 = arith.subf %410, %411 : vector<8x128xf32>
    %413 = arith.mulf %390, %363 : vector<8x128xf32>
    %414 = arith.mulf %395, %356 : vector<8x128xf32>
    %415 = arith.addf %413, %414 : vector<8x128xf32>
    %416 = arith.mulf %400, %385 : vector<8x128xf32>
    %417 = arith.addf %415, %416 : vector<8x128xf32>
    %418 = arith.mulf %405, %378 : vector<8x128xf32>
    %419 = arith.addf %417, %418 : vector<8x128xf32>
    %c48 = arith.constant 48 : index
    %420 = memref.load %arg1[%c48] : memref<224xf32, #tpu.memory_space<smem>>
    %c49 = arith.constant 49 : index
    %421 = memref.load %arg1[%c49] : memref<224xf32, #tpu.memory_space<smem>>
    %c50 = arith.constant 50 : index
    %422 = memref.load %arg1[%c50] : memref<224xf32, #tpu.memory_space<smem>>
    %c51 = arith.constant 51 : index
    %423 = memref.load %arg1[%c51] : memref<224xf32, #tpu.memory_space<smem>>
    %c52 = arith.constant 52 : index
    %424 = memref.load %arg1[%c52] : memref<224xf32, #tpu.memory_space<smem>>
    %c53 = arith.constant 53 : index
    %425 = memref.load %arg1[%c53] : memref<224xf32, #tpu.memory_space<smem>>
    %c54 = arith.constant 54 : index
    %426 = memref.load %arg1[%c54] : memref<224xf32, #tpu.memory_space<smem>>
    %c55 = arith.constant 55 : index
    %427 = memref.load %arg1[%c55] : memref<224xf32, #tpu.memory_space<smem>>
    %c1_i32_50 = arith.constant 1 : i32
    %428 = tpu.dynamic_rotate %412 by %c1_i32_50 dim 1 : vector<8x128xf32>, i32 -> vector<8x128xf32>
    %c127_i32 = arith.constant 127 : i32
    %429 = tpu.dynamic_rotate %412 by %c127_i32 dim 1 : vector<8x128xf32>, i32 -> vector<8x128xf32>
    %430 = arith.mulf %35, %428 : vector<8x128xf32>
    %cst_51 = arith.constant 1.000000e+00 : f32
    %431 = vector.broadcast %cst_51 : f32 to vector<8x128xf32>
    %432 = arith.subf %431, %35 : vector<8x128xf32>
    %433 = arith.mulf %432, %429 : vector<8x128xf32>
    %434 = arith.addf %430, %433 : vector<8x128xf32>
    %c1_i32_52 = arith.constant 1 : i32
    %435 = tpu.dynamic_rotate %419 by %c1_i32_52 dim 1 : vector<8x128xf32>, i32 -> vector<8x128xf32>
    %c127_i32_53 = arith.constant 127 : i32
    %436 = tpu.dynamic_rotate %419 by %c127_i32_53 dim 1 : vector<8x128xf32>, i32 -> vector<8x128xf32>
    %437 = arith.mulf %35, %435 : vector<8x128xf32>
    %cst_54 = arith.constant 1.000000e+00 : f32
    %438 = vector.broadcast %cst_54 : f32 to vector<8x128xf32>
    %439 = arith.subf %438, %35 : vector<8x128xf32>
    %440 = arith.mulf %439, %436 : vector<8x128xf32>
    %441 = arith.addf %437, %440 : vector<8x128xf32>
    %442 = arith.subf %426, %420 : f32
    %443 = vector.broadcast %442 : f32 to vector<8x128xf32>
    %444 = arith.mulf %443, %35 : vector<8x128xf32>
    %445 = vector.broadcast %420 : f32 to vector<8x128xf32>
    %446 = arith.addf %445, %444 : vector<8x128xf32>
    %447 = arith.subf %427, %421 : f32
    %448 = vector.broadcast %447 : f32 to vector<8x128xf32>
    %449 = arith.mulf %448, %35 : vector<8x128xf32>
    %450 = vector.broadcast %421 : f32 to vector<8x128xf32>
    %451 = arith.addf %450, %449 : vector<8x128xf32>
    %452 = arith.subf %424, %422 : f32
    %453 = vector.broadcast %452 : f32 to vector<8x128xf32>
    %454 = arith.mulf %453, %35 : vector<8x128xf32>
    %455 = vector.broadcast %422 : f32 to vector<8x128xf32>
    %456 = arith.addf %455, %454 : vector<8x128xf32>
    %457 = arith.subf %425, %423 : f32
    %458 = vector.broadcast %457 : f32 to vector<8x128xf32>
    %459 = arith.mulf %458, %35 : vector<8x128xf32>
    %460 = vector.broadcast %423 : f32 to vector<8x128xf32>
    %461 = arith.addf %460, %459 : vector<8x128xf32>
    %462 = arith.mulf %446, %412 : vector<8x128xf32>
    %463 = arith.mulf %451, %419 : vector<8x128xf32>
    %464 = arith.subf %462, %463 : vector<8x128xf32>
    %465 = arith.mulf %456, %434 : vector<8x128xf32>
    %466 = arith.addf %464, %465 : vector<8x128xf32>
    %467 = arith.mulf %461, %441 : vector<8x128xf32>
    %468 = arith.subf %466, %467 : vector<8x128xf32>
    %469 = arith.mulf %446, %419 : vector<8x128xf32>
    %470 = arith.mulf %451, %412 : vector<8x128xf32>
    %471 = arith.addf %469, %470 : vector<8x128xf32>
    %472 = arith.mulf %456, %441 : vector<8x128xf32>
    %473 = arith.addf %471, %472 : vector<8x128xf32>
    %474 = arith.mulf %461, %434 : vector<8x128xf32>
    %475 = arith.addf %473, %474 : vector<8x128xf32>
    %476 = arith.mulf %468, %78 : vector<8x128xf32>
    %477 = arith.mulf %475, %78 : vector<8x128xf32>
    %c56 = arith.constant 56 : index
    %478 = memref.load %arg1[%c56] : memref<224xf32, #tpu.memory_space<smem>>
    %c57 = arith.constant 57 : index
    %479 = memref.load %arg1[%c57] : memref<224xf32, #tpu.memory_space<smem>>
    %c58 = arith.constant 58 : index
    %480 = memref.load %arg1[%c58] : memref<224xf32, #tpu.memory_space<smem>>
    %c59 = arith.constant 59 : index
    %481 = memref.load %arg1[%c59] : memref<224xf32, #tpu.memory_space<smem>>
    %c60 = arith.constant 60 : index
    %482 = memref.load %arg1[%c60] : memref<224xf32, #tpu.memory_space<smem>>
    %c61 = arith.constant 61 : index
    %483 = memref.load %arg1[%c61] : memref<224xf32, #tpu.memory_space<smem>>
    %c62 = arith.constant 62 : index
    %484 = memref.load %arg1[%c62] : memref<224xf32, #tpu.memory_space<smem>>
    %c63 = arith.constant 63 : index
    %485 = memref.load %arg1[%c63] : memref<224xf32, #tpu.memory_space<smem>>
    %c64_i32_55 = arith.constant 64 : i32
    %486 = tpu.dynamic_rotate %476 by %c64_i32_55 dim 1 : vector<8x128xf32>, i32 -> vector<8x128xf32>
    %c64_i32_56 = arith.constant 64 : i32
    %487 = tpu.dynamic_rotate %476 by %c64_i32_56 dim 1 : vector<8x128xf32>, i32 -> vector<8x128xf32>
    %488 = arith.mulf %5, %486 : vector<8x128xf32>
    %cst_57 = arith.constant 1.000000e+00 : f32
    %489 = vector.broadcast %cst_57 : f32 to vector<8x128xf32>
    %490 = arith.subf %489, %5 : vector<8x128xf32>
    %491 = arith.mulf %490, %487 : vector<8x128xf32>
    %492 = arith.addf %488, %491 : vector<8x128xf32>
    %c64_i32_58 = arith.constant 64 : i32
    %493 = tpu.dynamic_rotate %477 by %c64_i32_58 dim 1 : vector<8x128xf32>, i32 -> vector<8x128xf32>
    %c64_i32_59 = arith.constant 64 : i32
    %494 = tpu.dynamic_rotate %477 by %c64_i32_59 dim 1 : vector<8x128xf32>, i32 -> vector<8x128xf32>
    %495 = arith.mulf %5, %493 : vector<8x128xf32>
    %cst_60 = arith.constant 1.000000e+00 : f32
    %496 = vector.broadcast %cst_60 : f32 to vector<8x128xf32>
    %497 = arith.subf %496, %5 : vector<8x128xf32>
    %498 = arith.mulf %497, %494 : vector<8x128xf32>
    %499 = arith.addf %495, %498 : vector<8x128xf32>
    %500 = arith.subf %484, %478 : f32
    %501 = vector.broadcast %500 : f32 to vector<8x128xf32>
    %502 = arith.mulf %501, %5 : vector<8x128xf32>
    %503 = vector.broadcast %478 : f32 to vector<8x128xf32>
    %504 = arith.addf %503, %502 : vector<8x128xf32>
    %505 = arith.subf %485, %479 : f32
    %506 = vector.broadcast %505 : f32 to vector<8x128xf32>
    %507 = arith.mulf %506, %5 : vector<8x128xf32>
    %508 = vector.broadcast %479 : f32 to vector<8x128xf32>
    %509 = arith.addf %508, %507 : vector<8x128xf32>
    %510 = arith.subf %482, %480 : f32
    %511 = vector.broadcast %510 : f32 to vector<8x128xf32>
    %512 = arith.mulf %511, %5 : vector<8x128xf32>
    %513 = vector.broadcast %480 : f32 to vector<8x128xf32>
    %514 = arith.addf %513, %512 : vector<8x128xf32>
    %515 = arith.subf %483, %481 : f32
    %516 = vector.broadcast %515 : f32 to vector<8x128xf32>
    %517 = arith.mulf %516, %5 : vector<8x128xf32>
    %518 = vector.broadcast %481 : f32 to vector<8x128xf32>
    %519 = arith.addf %518, %517 : vector<8x128xf32>
    %520 = arith.mulf %504, %476 : vector<8x128xf32>
    %521 = arith.mulf %509, %477 : vector<8x128xf32>
    %522 = arith.subf %520, %521 : vector<8x128xf32>
    %523 = arith.mulf %514, %492 : vector<8x128xf32>
    %524 = arith.addf %522, %523 : vector<8x128xf32>
    %525 = arith.mulf %519, %499 : vector<8x128xf32>
    %526 = arith.subf %524, %525 : vector<8x128xf32>
    %527 = arith.mulf %504, %477 : vector<8x128xf32>
    %528 = arith.mulf %509, %476 : vector<8x128xf32>
    %529 = arith.addf %527, %528 : vector<8x128xf32>
    %530 = arith.mulf %514, %499 : vector<8x128xf32>
    %531 = arith.addf %529, %530 : vector<8x128xf32>
    %532 = arith.mulf %519, %492 : vector<8x128xf32>
    %533 = arith.addf %531, %532 : vector<8x128xf32>
    %c64 = arith.constant 64 : index
    %534 = memref.load %arg1[%c64] : memref<224xf32, #tpu.memory_space<smem>>
    %c65 = arith.constant 65 : index
    %535 = memref.load %arg1[%c65] : memref<224xf32, #tpu.memory_space<smem>>
    %c66 = arith.constant 66 : index
    %536 = memref.load %arg1[%c66] : memref<224xf32, #tpu.memory_space<smem>>
    %c67 = arith.constant 67 : index
    %537 = memref.load %arg1[%c67] : memref<224xf32, #tpu.memory_space<smem>>
    %c68 = arith.constant 68 : index
    %538 = memref.load %arg1[%c68] : memref<224xf32, #tpu.memory_space<smem>>
    %c69 = arith.constant 69 : index
    %539 = memref.load %arg1[%c69] : memref<224xf32, #tpu.memory_space<smem>>
    %c70 = arith.constant 70 : index
    %540 = memref.load %arg1[%c70] : memref<224xf32, #tpu.memory_space<smem>>
    %c71 = arith.constant 71 : index
    %541 = memref.load %arg1[%c71] : memref<224xf32, #tpu.memory_space<smem>>
    %c32_i32_61 = arith.constant 32 : i32
    %542 = tpu.dynamic_rotate %526 by %c32_i32_61 dim 1 : vector<8x128xf32>, i32 -> vector<8x128xf32>
    %c96_i32_62 = arith.constant 96 : i32
    %543 = tpu.dynamic_rotate %526 by %c96_i32_62 dim 1 : vector<8x128xf32>, i32 -> vector<8x128xf32>
    %544 = arith.mulf %10, %542 : vector<8x128xf32>
    %cst_63 = arith.constant 1.000000e+00 : f32
    %545 = vector.broadcast %cst_63 : f32 to vector<8x128xf32>
    %546 = arith.subf %545, %10 : vector<8x128xf32>
    %547 = arith.mulf %546, %543 : vector<8x128xf32>
    %548 = arith.addf %544, %547 : vector<8x128xf32>
    %c32_i32_64 = arith.constant 32 : i32
    %549 = tpu.dynamic_rotate %533 by %c32_i32_64 dim 1 : vector<8x128xf32>, i32 -> vector<8x128xf32>
    %c96_i32_65 = arith.constant 96 : i32
    %550 = tpu.dynamic_rotate %533 by %c96_i32_65 dim 1 : vector<8x128xf32>, i32 -> vector<8x128xf32>
    %551 = arith.mulf %10, %549 : vector<8x128xf32>
    %cst_66 = arith.constant 1.000000e+00 : f32
    %552 = vector.broadcast %cst_66 : f32 to vector<8x128xf32>
    %553 = arith.subf %552, %10 : vector<8x128xf32>
    %554 = arith.mulf %553, %550 : vector<8x128xf32>
    %555 = arith.addf %551, %554 : vector<8x128xf32>
    %556 = arith.subf %540, %534 : f32
    %557 = vector.broadcast %556 : f32 to vector<8x128xf32>
    %558 = arith.mulf %557, %10 : vector<8x128xf32>
    %559 = vector.broadcast %534 : f32 to vector<8x128xf32>
    %560 = arith.addf %559, %558 : vector<8x128xf32>
    %561 = arith.subf %541, %535 : f32
    %562 = vector.broadcast %561 : f32 to vector<8x128xf32>
    %563 = arith.mulf %562, %10 : vector<8x128xf32>
    %564 = vector.broadcast %535 : f32 to vector<8x128xf32>
    %565 = arith.addf %564, %563 : vector<8x128xf32>
    %566 = arith.subf %538, %536 : f32
    %567 = vector.broadcast %566 : f32 to vector<8x128xf32>
    %568 = arith.mulf %567, %10 : vector<8x128xf32>
    %569 = vector.broadcast %536 : f32 to vector<8x128xf32>
    %570 = arith.addf %569, %568 : vector<8x128xf32>
    %571 = arith.subf %539, %537 : f32
    %572 = vector.broadcast %571 : f32 to vector<8x128xf32>
    %573 = arith.mulf %572, %10 : vector<8x128xf32>
    %574 = vector.broadcast %537 : f32 to vector<8x128xf32>
    %575 = arith.addf %574, %573 : vector<8x128xf32>
    %576 = arith.mulf %560, %526 : vector<8x128xf32>
    %577 = arith.mulf %565, %533 : vector<8x128xf32>
    %578 = arith.subf %576, %577 : vector<8x128xf32>
    %579 = arith.mulf %570, %548 : vector<8x128xf32>
    %580 = arith.addf %578, %579 : vector<8x128xf32>
    %581 = arith.mulf %575, %555 : vector<8x128xf32>
    %582 = arith.subf %580, %581 : vector<8x128xf32>
    %583 = arith.mulf %560, %533 : vector<8x128xf32>
    %584 = arith.mulf %565, %526 : vector<8x128xf32>
    %585 = arith.addf %583, %584 : vector<8x128xf32>
    %586 = arith.mulf %570, %555 : vector<8x128xf32>
    %587 = arith.addf %585, %586 : vector<8x128xf32>
    %588 = arith.mulf %575, %548 : vector<8x128xf32>
    %589 = arith.addf %587, %588 : vector<8x128xf32>
    %c72 = arith.constant 72 : index
    %590 = memref.load %arg1[%c72] : memref<224xf32, #tpu.memory_space<smem>>
    %c73 = arith.constant 73 : index
    %591 = memref.load %arg1[%c73] : memref<224xf32, #tpu.memory_space<smem>>
    %c74 = arith.constant 74 : index
    %592 = memref.load %arg1[%c74] : memref<224xf32, #tpu.memory_space<smem>>
    %c75 = arith.constant 75 : index
    %593 = memref.load %arg1[%c75] : memref<224xf32, #tpu.memory_space<smem>>
    %c76 = arith.constant 76 : index
    %594 = memref.load %arg1[%c76] : memref<224xf32, #tpu.memory_space<smem>>
    %c77 = arith.constant 77 : index
    %595 = memref.load %arg1[%c77] : memref<224xf32, #tpu.memory_space<smem>>
    %c78 = arith.constant 78 : index
    %596 = memref.load %arg1[%c78] : memref<224xf32, #tpu.memory_space<smem>>
    %c79 = arith.constant 79 : index
    %597 = memref.load %arg1[%c79] : memref<224xf32, #tpu.memory_space<smem>>
    %c16_i32_67 = arith.constant 16 : i32
    %598 = tpu.dynamic_rotate %582 by %c16_i32_67 dim 1 : vector<8x128xf32>, i32 -> vector<8x128xf32>
    %c112_i32_68 = arith.constant 112 : i32
    %599 = tpu.dynamic_rotate %582 by %c112_i32_68 dim 1 : vector<8x128xf32>, i32 -> vector<8x128xf32>
    %600 = arith.mulf %15, %598 : vector<8x128xf32>
    %cst_69 = arith.constant 1.000000e+00 : f32
    %601 = vector.broadcast %cst_69 : f32 to vector<8x128xf32>
    %602 = arith.subf %601, %15 : vector<8x128xf32>
    %603 = arith.mulf %602, %599 : vector<8x128xf32>
    %604 = arith.addf %600, %603 : vector<8x128xf32>
    %c16_i32_70 = arith.constant 16 : i32
    %605 = tpu.dynamic_rotate %589 by %c16_i32_70 dim 1 : vector<8x128xf32>, i32 -> vector<8x128xf32>
    %c112_i32_71 = arith.constant 112 : i32
    %606 = tpu.dynamic_rotate %589 by %c112_i32_71 dim 1 : vector<8x128xf32>, i32 -> vector<8x128xf32>
    %607 = arith.mulf %15, %605 : vector<8x128xf32>
    %cst_72 = arith.constant 1.000000e+00 : f32
    %608 = vector.broadcast %cst_72 : f32 to vector<8x128xf32>
    %609 = arith.subf %608, %15 : vector<8x128xf32>
    %610 = arith.mulf %609, %606 : vector<8x128xf32>
    %611 = arith.addf %607, %610 : vector<8x128xf32>
    %612 = arith.subf %596, %590 : f32
    %613 = vector.broadcast %612 : f32 to vector<8x128xf32>
    %614 = arith.mulf %613, %15 : vector<8x128xf32>
    %615 = vector.broadcast %590 : f32 to vector<8x128xf32>
    %616 = arith.addf %615, %614 : vector<8x128xf32>
    %617 = arith.subf %597, %591 : f32
    %618 = vector.broadcast %617 : f32 to vector<8x128xf32>
    %619 = arith.mulf %618, %15 : vector<8x128xf32>
    %620 = vector.broadcast %591 : f32 to vector<8x128xf32>
    %621 = arith.addf %620, %619 : vector<8x128xf32>
    %622 = arith.subf %594, %592 : f32
    %623 = vector.broadcast %622 : f32 to vector<8x128xf32>
    %624 = arith.mulf %623, %15 : vector<8x128xf32>
    %625 = vector.broadcast %592 : f32 to vector<8x128xf32>
    %626 = arith.addf %625, %624 : vector<8x128xf32>
    %627 = arith.subf %595, %593 : f32
    %628 = vector.broadcast %627 : f32 to vector<8x128xf32>
    %629 = arith.mulf %628, %15 : vector<8x128xf32>
    %630 = vector.broadcast %593 : f32 to vector<8x128xf32>
    %631 = arith.addf %630, %629 : vector<8x128xf32>
    %632 = arith.mulf %616, %582 : vector<8x128xf32>
    %633 = arith.mulf %621, %589 : vector<8x128xf32>
    %634 = arith.subf %632, %633 : vector<8x128xf32>
    %635 = arith.mulf %626, %604 : vector<8x128xf32>
    %636 = arith.addf %634, %635 : vector<8x128xf32>
    %637 = arith.mulf %631, %611 : vector<8x128xf32>
    %638 = arith.subf %636, %637 : vector<8x128xf32>
    %639 = arith.mulf %616, %589 : vector<8x128xf32>
    %640 = arith.mulf %621, %582 : vector<8x128xf32>
    %641 = arith.addf %639, %640 : vector<8x128xf32>
    %642 = arith.mulf %626, %611 : vector<8x128xf32>
    %643 = arith.addf %641, %642 : vector<8x128xf32>
    %644 = arith.mulf %631, %604 : vector<8x128xf32>
    %645 = arith.addf %643, %644 : vector<8x128xf32>
    %c80 = arith.constant 80 : index
    %646 = memref.load %arg1[%c80] : memref<224xf32, #tpu.memory_space<smem>>
    %c81 = arith.constant 81 : index
    %647 = memref.load %arg1[%c81] : memref<224xf32, #tpu.memory_space<smem>>
    %c82 = arith.constant 82 : index
    %648 = memref.load %arg1[%c82] : memref<224xf32, #tpu.memory_space<smem>>
    %c83 = arith.constant 83 : index
    %649 = memref.load %arg1[%c83] : memref<224xf32, #tpu.memory_space<smem>>
    %c84 = arith.constant 84 : index
    %650 = memref.load %arg1[%c84] : memref<224xf32, #tpu.memory_space<smem>>
    %c85 = arith.constant 85 : index
    %651 = memref.load %arg1[%c85] : memref<224xf32, #tpu.memory_space<smem>>
    %c86 = arith.constant 86 : index
    %652 = memref.load %arg1[%c86] : memref<224xf32, #tpu.memory_space<smem>>
    %c87 = arith.constant 87 : index
    %653 = memref.load %arg1[%c87] : memref<224xf32, #tpu.memory_space<smem>>
    %c8_i32_73 = arith.constant 8 : i32
    %654 = tpu.dynamic_rotate %638 by %c8_i32_73 dim 1 : vector<8x128xf32>, i32 -> vector<8x128xf32>
    %c120_i32_74 = arith.constant 120 : i32
    %655 = tpu.dynamic_rotate %638 by %c120_i32_74 dim 1 : vector<8x128xf32>, i32 -> vector<8x128xf32>
    %656 = arith.mulf %20, %654 : vector<8x128xf32>
    %cst_75 = arith.constant 1.000000e+00 : f32
    %657 = vector.broadcast %cst_75 : f32 to vector<8x128xf32>
    %658 = arith.subf %657, %20 : vector<8x128xf32>
    %659 = arith.mulf %658, %655 : vector<8x128xf32>
    %660 = arith.addf %656, %659 : vector<8x128xf32>
    %c8_i32_76 = arith.constant 8 : i32
    %661 = tpu.dynamic_rotate %645 by %c8_i32_76 dim 1 : vector<8x128xf32>, i32 -> vector<8x128xf32>
    %c120_i32_77 = arith.constant 120 : i32
    %662 = tpu.dynamic_rotate %645 by %c120_i32_77 dim 1 : vector<8x128xf32>, i32 -> vector<8x128xf32>
    %663 = arith.mulf %20, %661 : vector<8x128xf32>
    %cst_78 = arith.constant 1.000000e+00 : f32
    %664 = vector.broadcast %cst_78 : f32 to vector<8x128xf32>
    %665 = arith.subf %664, %20 : vector<8x128xf32>
    %666 = arith.mulf %665, %662 : vector<8x128xf32>
    %667 = arith.addf %663, %666 : vector<8x128xf32>
    %668 = arith.subf %652, %646 : f32
    %669 = vector.broadcast %668 : f32 to vector<8x128xf32>
    %670 = arith.mulf %669, %20 : vector<8x128xf32>
    %671 = vector.broadcast %646 : f32 to vector<8x128xf32>
    %672 = arith.addf %671, %670 : vector<8x128xf32>
    %673 = arith.subf %653, %647 : f32
    %674 = vector.broadcast %673 : f32 to vector<8x128xf32>
    %675 = arith.mulf %674, %20 : vector<8x128xf32>
    %676 = vector.broadcast %647 : f32 to vector<8x128xf32>
    %677 = arith.addf %676, %675 : vector<8x128xf32>
    %678 = arith.subf %650, %648 : f32
    %679 = vector.broadcast %678 : f32 to vector<8x128xf32>
    %680 = arith.mulf %679, %20 : vector<8x128xf32>
    %681 = vector.broadcast %648 : f32 to vector<8x128xf32>
    %682 = arith.addf %681, %680 : vector<8x128xf32>
    %683 = arith.subf %651, %649 : f32
    %684 = vector.broadcast %683 : f32 to vector<8x128xf32>
    %685 = arith.mulf %684, %20 : vector<8x128xf32>
    %686 = vector.broadcast %649 : f32 to vector<8x128xf32>
    %687 = arith.addf %686, %685 : vector<8x128xf32>
    %688 = arith.mulf %672, %638 : vector<8x128xf32>
    %689 = arith.mulf %677, %645 : vector<8x128xf32>
    %690 = arith.subf %688, %689 : vector<8x128xf32>
    %691 = arith.mulf %682, %660 : vector<8x128xf32>
    %692 = arith.addf %690, %691 : vector<8x128xf32>
    %693 = arith.mulf %687, %667 : vector<8x128xf32>
    %694 = arith.subf %692, %693 : vector<8x128xf32>
    %695 = arith.mulf %672, %645 : vector<8x128xf32>
    %696 = arith.mulf %677, %638 : vector<8x128xf32>
    %697 = arith.addf %695, %696 : vector<8x128xf32>
    %698 = arith.mulf %682, %667 : vector<8x128xf32>
    %699 = arith.addf %697, %698 : vector<8x128xf32>
    %700 = arith.mulf %687, %660 : vector<8x128xf32>
    %701 = arith.addf %699, %700 : vector<8x128xf32>
    %c88 = arith.constant 88 : index
    %702 = memref.load %arg1[%c88] : memref<224xf32, #tpu.memory_space<smem>>
    %c89 = arith.constant 89 : index
    %703 = memref.load %arg1[%c89] : memref<224xf32, #tpu.memory_space<smem>>
    %c90 = arith.constant 90 : index
    %704 = memref.load %arg1[%c90] : memref<224xf32, #tpu.memory_space<smem>>
    %c91 = arith.constant 91 : index
    %705 = memref.load %arg1[%c91] : memref<224xf32, #tpu.memory_space<smem>>
    %c92 = arith.constant 92 : index
    %706 = memref.load %arg1[%c92] : memref<224xf32, #tpu.memory_space<smem>>
    %c93 = arith.constant 93 : index
    %707 = memref.load %arg1[%c93] : memref<224xf32, #tpu.memory_space<smem>>
    %c94 = arith.constant 94 : index
    %708 = memref.load %arg1[%c94] : memref<224xf32, #tpu.memory_space<smem>>
    %c95 = arith.constant 95 : index
    %709 = memref.load %arg1[%c95] : memref<224xf32, #tpu.memory_space<smem>>
    %c4_i32_79 = arith.constant 4 : i32
    %710 = tpu.dynamic_rotate %694 by %c4_i32_79 dim 1 : vector<8x128xf32>, i32 -> vector<8x128xf32>
    %c124_i32_80 = arith.constant 124 : i32
    %711 = tpu.dynamic_rotate %694 by %c124_i32_80 dim 1 : vector<8x128xf32>, i32 -> vector<8x128xf32>
    %712 = arith.mulf %25, %710 : vector<8x128xf32>
    %cst_81 = arith.constant 1.000000e+00 : f32
    %713 = vector.broadcast %cst_81 : f32 to vector<8x128xf32>
    %714 = arith.subf %713, %25 : vector<8x128xf32>
    %715 = arith.mulf %714, %711 : vector<8x128xf32>
    %716 = arith.addf %712, %715 : vector<8x128xf32>
    %c4_i32_82 = arith.constant 4 : i32
    %717 = tpu.dynamic_rotate %701 by %c4_i32_82 dim 1 : vector<8x128xf32>, i32 -> vector<8x128xf32>
    %c124_i32_83 = arith.constant 124 : i32
    %718 = tpu.dynamic_rotate %701 by %c124_i32_83 dim 1 : vector<8x128xf32>, i32 -> vector<8x128xf32>
    %719 = arith.mulf %25, %717 : vector<8x128xf32>
    %cst_84 = arith.constant 1.000000e+00 : f32
    %720 = vector.broadcast %cst_84 : f32 to vector<8x128xf32>
    %721 = arith.subf %720, %25 : vector<8x128xf32>
    %722 = arith.mulf %721, %718 : vector<8x128xf32>
    %723 = arith.addf %719, %722 : vector<8x128xf32>
    %724 = arith.subf %708, %702 : f32
    %725 = vector.broadcast %724 : f32 to vector<8x128xf32>
    %726 = arith.mulf %725, %25 : vector<8x128xf32>
    %727 = vector.broadcast %702 : f32 to vector<8x128xf32>
    %728 = arith.addf %727, %726 : vector<8x128xf32>
    %729 = arith.subf %709, %703 : f32
    %730 = vector.broadcast %729 : f32 to vector<8x128xf32>
    %731 = arith.mulf %730, %25 : vector<8x128xf32>
    %732 = vector.broadcast %703 : f32 to vector<8x128xf32>
    %733 = arith.addf %732, %731 : vector<8x128xf32>
    %734 = arith.subf %706, %704 : f32
    %735 = vector.broadcast %734 : f32 to vector<8x128xf32>
    %736 = arith.mulf %735, %25 : vector<8x128xf32>
    %737 = vector.broadcast %704 : f32 to vector<8x128xf32>
    %738 = arith.addf %737, %736 : vector<8x128xf32>
    %739 = arith.subf %707, %705 : f32
    %740 = vector.broadcast %739 : f32 to vector<8x128xf32>
    %741 = arith.mulf %740, %25 : vector<8x128xf32>
    %742 = vector.broadcast %705 : f32 to vector<8x128xf32>
    %743 = arith.addf %742, %741 : vector<8x128xf32>
    %744 = arith.mulf %728, %694 : vector<8x128xf32>
    %745 = arith.mulf %733, %701 : vector<8x128xf32>
    %746 = arith.subf %744, %745 : vector<8x128xf32>
    %747 = arith.mulf %738, %716 : vector<8x128xf32>
    %748 = arith.addf %746, %747 : vector<8x128xf32>
    %749 = arith.mulf %743, %723 : vector<8x128xf32>
    %750 = arith.subf %748, %749 : vector<8x128xf32>
    %751 = arith.mulf %728, %701 : vector<8x128xf32>
    %752 = arith.mulf %733, %694 : vector<8x128xf32>
    %753 = arith.addf %751, %752 : vector<8x128xf32>
    %754 = arith.mulf %738, %723 : vector<8x128xf32>
    %755 = arith.addf %753, %754 : vector<8x128xf32>
    %756 = arith.mulf %743, %716 : vector<8x128xf32>
    %757 = arith.addf %755, %756 : vector<8x128xf32>
    %c96 = arith.constant 96 : index
    %758 = memref.load %arg1[%c96] : memref<224xf32, #tpu.memory_space<smem>>
    %c97 = arith.constant 97 : index
    %759 = memref.load %arg1[%c97] : memref<224xf32, #tpu.memory_space<smem>>
    %c98 = arith.constant 98 : index
    %760 = memref.load %arg1[%c98] : memref<224xf32, #tpu.memory_space<smem>>
    %c99 = arith.constant 99 : index
    %761 = memref.load %arg1[%c99] : memref<224xf32, #tpu.memory_space<smem>>
    %c100 = arith.constant 100 : index
    %762 = memref.load %arg1[%c100] : memref<224xf32, #tpu.memory_space<smem>>
    %c101 = arith.constant 101 : index
    %763 = memref.load %arg1[%c101] : memref<224xf32, #tpu.memory_space<smem>>
    %c102 = arith.constant 102 : index
    %764 = memref.load %arg1[%c102] : memref<224xf32, #tpu.memory_space<smem>>
    %c103 = arith.constant 103 : index
    %765 = memref.load %arg1[%c103] : memref<224xf32, #tpu.memory_space<smem>>
    %c2_i32_85 = arith.constant 2 : i32
    %766 = tpu.dynamic_rotate %750 by %c2_i32_85 dim 1 : vector<8x128xf32>, i32 -> vector<8x128xf32>
    %c126_i32_86 = arith.constant 126 : i32
    %767 = tpu.dynamic_rotate %750 by %c126_i32_86 dim 1 : vector<8x128xf32>, i32 -> vector<8x128xf32>
    %768 = arith.mulf %30, %766 : vector<8x128xf32>
    %cst_87 = arith.constant 1.000000e+00 : f32
    %769 = vector.broadcast %cst_87 : f32 to vector<8x128xf32>
    %770 = arith.subf %769, %30 : vector<8x128xf32>
    %771 = arith.mulf %770, %767 : vector<8x128xf32>
    %772 = arith.addf %768, %771 : vector<8x128xf32>
    %c2_i32_88 = arith.constant 2 : i32
    %773 = tpu.dynamic_rotate %757 by %c2_i32_88 dim 1 : vector<8x128xf32>, i32 -> vector<8x128xf32>
    %c126_i32_89 = arith.constant 126 : i32
    %774 = tpu.dynamic_rotate %757 by %c126_i32_89 dim 1 : vector<8x128xf32>, i32 -> vector<8x128xf32>
    %775 = arith.mulf %30, %773 : vector<8x128xf32>
    %cst_90 = arith.constant 1.000000e+00 : f32
    %776 = vector.broadcast %cst_90 : f32 to vector<8x128xf32>
    %777 = arith.subf %776, %30 : vector<8x128xf32>
    %778 = arith.mulf %777, %774 : vector<8x128xf32>
    %779 = arith.addf %775, %778 : vector<8x128xf32>
    %780 = arith.subf %764, %758 : f32
    %781 = vector.broadcast %780 : f32 to vector<8x128xf32>
    %782 = arith.mulf %781, %30 : vector<8x128xf32>
    %783 = vector.broadcast %758 : f32 to vector<8x128xf32>
    %784 = arith.addf %783, %782 : vector<8x128xf32>
    %785 = arith.subf %765, %759 : f32
    %786 = vector.broadcast %785 : f32 to vector<8x128xf32>
    %787 = arith.mulf %786, %30 : vector<8x128xf32>
    %788 = vector.broadcast %759 : f32 to vector<8x128xf32>
    %789 = arith.addf %788, %787 : vector<8x128xf32>
    %790 = arith.subf %762, %760 : f32
    %791 = vector.broadcast %790 : f32 to vector<8x128xf32>
    %792 = arith.mulf %791, %30 : vector<8x128xf32>
    %793 = vector.broadcast %760 : f32 to vector<8x128xf32>
    %794 = arith.addf %793, %792 : vector<8x128xf32>
    %795 = arith.subf %763, %761 : f32
    %796 = vector.broadcast %795 : f32 to vector<8x128xf32>
    %797 = arith.mulf %796, %30 : vector<8x128xf32>
    %798 = vector.broadcast %761 : f32 to vector<8x128xf32>
    %799 = arith.addf %798, %797 : vector<8x128xf32>
    %800 = arith.mulf %784, %750 : vector<8x128xf32>
    %801 = arith.mulf %789, %757 : vector<8x128xf32>
    %802 = arith.subf %800, %801 : vector<8x128xf32>
    %803 = arith.mulf %794, %772 : vector<8x128xf32>
    %804 = arith.addf %802, %803 : vector<8x128xf32>
    %805 = arith.mulf %799, %779 : vector<8x128xf32>
    %806 = arith.subf %804, %805 : vector<8x128xf32>
    %807 = arith.mulf %784, %757 : vector<8x128xf32>
    %808 = arith.mulf %789, %750 : vector<8x128xf32>
    %809 = arith.addf %807, %808 : vector<8x128xf32>
    %810 = arith.mulf %794, %779 : vector<8x128xf32>
    %811 = arith.addf %809, %810 : vector<8x128xf32>
    %812 = arith.mulf %799, %772 : vector<8x128xf32>
    %813 = arith.addf %811, %812 : vector<8x128xf32>
    %c104 = arith.constant 104 : index
    %814 = memref.load %arg1[%c104] : memref<224xf32, #tpu.memory_space<smem>>
    %c105 = arith.constant 105 : index
    %815 = memref.load %arg1[%c105] : memref<224xf32, #tpu.memory_space<smem>>
    %c106 = arith.constant 106 : index
    %816 = memref.load %arg1[%c106] : memref<224xf32, #tpu.memory_space<smem>>
    %c107 = arith.constant 107 : index
    %817 = memref.load %arg1[%c107] : memref<224xf32, #tpu.memory_space<smem>>
    %c108 = arith.constant 108 : index
    %818 = memref.load %arg1[%c108] : memref<224xf32, #tpu.memory_space<smem>>
    %c109 = arith.constant 109 : index
    %819 = memref.load %arg1[%c109] : memref<224xf32, #tpu.memory_space<smem>>
    %c110 = arith.constant 110 : index
    %820 = memref.load %arg1[%c110] : memref<224xf32, #tpu.memory_space<smem>>
    %c111 = arith.constant 111 : index
    %821 = memref.load %arg1[%c111] : memref<224xf32, #tpu.memory_space<smem>>
    %c1_i32_91 = arith.constant 1 : i32
    %822 = tpu.dynamic_rotate %806 by %c1_i32_91 dim 1 : vector<8x128xf32>, i32 -> vector<8x128xf32>
    %c127_i32_92 = arith.constant 127 : i32
    %823 = tpu.dynamic_rotate %806 by %c127_i32_92 dim 1 : vector<8x128xf32>, i32 -> vector<8x128xf32>
    %824 = arith.mulf %35, %822 : vector<8x128xf32>
    %cst_93 = arith.constant 1.000000e+00 : f32
    %825 = vector.broadcast %cst_93 : f32 to vector<8x128xf32>
    %826 = arith.subf %825, %35 : vector<8x128xf32>
    %827 = arith.mulf %826, %823 : vector<8x128xf32>
    %828 = arith.addf %824, %827 : vector<8x128xf32>
    %c1_i32_94 = arith.constant 1 : i32
    %829 = tpu.dynamic_rotate %813 by %c1_i32_94 dim 1 : vector<8x128xf32>, i32 -> vector<8x128xf32>
    %c127_i32_95 = arith.constant 127 : i32
    %830 = tpu.dynamic_rotate %813 by %c127_i32_95 dim 1 : vector<8x128xf32>, i32 -> vector<8x128xf32>
    %831 = arith.mulf %35, %829 : vector<8x128xf32>
    %cst_96 = arith.constant 1.000000e+00 : f32
    %832 = vector.broadcast %cst_96 : f32 to vector<8x128xf32>
    %833 = arith.subf %832, %35 : vector<8x128xf32>
    %834 = arith.mulf %833, %830 : vector<8x128xf32>
    %835 = arith.addf %831, %834 : vector<8x128xf32>
    %836 = arith.subf %820, %814 : f32
    %837 = vector.broadcast %836 : f32 to vector<8x128xf32>
    %838 = arith.mulf %837, %35 : vector<8x128xf32>
    %839 = vector.broadcast %814 : f32 to vector<8x128xf32>
    %840 = arith.addf %839, %838 : vector<8x128xf32>
    %841 = arith.subf %821, %815 : f32
    %842 = vector.broadcast %841 : f32 to vector<8x128xf32>
    %843 = arith.mulf %842, %35 : vector<8x128xf32>
    %844 = vector.broadcast %815 : f32 to vector<8x128xf32>
    %845 = arith.addf %844, %843 : vector<8x128xf32>
    %846 = arith.subf %818, %816 : f32
    %847 = vector.broadcast %846 : f32 to vector<8x128xf32>
    %848 = arith.mulf %847, %35 : vector<8x128xf32>
    %849 = vector.broadcast %816 : f32 to vector<8x128xf32>
    %850 = arith.addf %849, %848 : vector<8x128xf32>
    %851 = arith.subf %819, %817 : f32
    %852 = vector.broadcast %851 : f32 to vector<8x128xf32>
    %853 = arith.mulf %852, %35 : vector<8x128xf32>
    %854 = vector.broadcast %817 : f32 to vector<8x128xf32>
    %855 = arith.addf %854, %853 : vector<8x128xf32>
    %856 = arith.mulf %840, %806 : vector<8x128xf32>
    %857 = arith.mulf %845, %813 : vector<8x128xf32>
    %858 = arith.subf %856, %857 : vector<8x128xf32>
    %859 = arith.mulf %850, %828 : vector<8x128xf32>
    %860 = arith.addf %858, %859 : vector<8x128xf32>
    %861 = arith.mulf %855, %835 : vector<8x128xf32>
    %862 = arith.subf %860, %861 : vector<8x128xf32>
    %863 = arith.mulf %840, %813 : vector<8x128xf32>
    %864 = arith.mulf %845, %806 : vector<8x128xf32>
    %865 = arith.addf %863, %864 : vector<8x128xf32>
    %866 = arith.mulf %850, %835 : vector<8x128xf32>
    %867 = arith.addf %865, %866 : vector<8x128xf32>
    %868 = arith.mulf %855, %828 : vector<8x128xf32>
    %869 = arith.addf %867, %868 : vector<8x128xf32>
    %870 = arith.mulf %862, %78 : vector<8x128xf32>
    %871 = arith.mulf %869, %78 : vector<8x128xf32>
    %c112 = arith.constant 112 : index
    %872 = memref.load %arg1[%c112] : memref<224xf32, #tpu.memory_space<smem>>
    %c113 = arith.constant 113 : index
    %873 = memref.load %arg1[%c113] : memref<224xf32, #tpu.memory_space<smem>>
    %c114 = arith.constant 114 : index
    %874 = memref.load %arg1[%c114] : memref<224xf32, #tpu.memory_space<smem>>
    %c115 = arith.constant 115 : index
    %875 = memref.load %arg1[%c115] : memref<224xf32, #tpu.memory_space<smem>>
    %c116 = arith.constant 116 : index
    %876 = memref.load %arg1[%c116] : memref<224xf32, #tpu.memory_space<smem>>
    %c117 = arith.constant 117 : index
    %877 = memref.load %arg1[%c117] : memref<224xf32, #tpu.memory_space<smem>>
    %c118 = arith.constant 118 : index
    %878 = memref.load %arg1[%c118] : memref<224xf32, #tpu.memory_space<smem>>
    %c119 = arith.constant 119 : index
    %879 = memref.load %arg1[%c119] : memref<224xf32, #tpu.memory_space<smem>>
    %c64_i32_97 = arith.constant 64 : i32
    %880 = tpu.dynamic_rotate %870 by %c64_i32_97 dim 1 : vector<8x128xf32>, i32 -> vector<8x128xf32>
    %c64_i32_98 = arith.constant 64 : i32
    %881 = tpu.dynamic_rotate %870 by %c64_i32_98 dim 1 : vector<8x128xf32>, i32 -> vector<8x128xf32>
    %882 = arith.mulf %5, %880 : vector<8x128xf32>
    %cst_99 = arith.constant 1.000000e+00 : f32
    %883 = vector.broadcast %cst_99 : f32 to vector<8x128xf32>
    %884 = arith.subf %883, %5 : vector<8x128xf32>
    %885 = arith.mulf %884, %881 : vector<8x128xf32>
    %886 = arith.addf %882, %885 : vector<8x128xf32>
    %c64_i32_100 = arith.constant 64 : i32
    %887 = tpu.dynamic_rotate %871 by %c64_i32_100 dim 1 : vector<8x128xf32>, i32 -> vector<8x128xf32>
    %c64_i32_101 = arith.constant 64 : i32
    %888 = tpu.dynamic_rotate %871 by %c64_i32_101 dim 1 : vector<8x128xf32>, i32 -> vector<8x128xf32>
    %889 = arith.mulf %5, %887 : vector<8x128xf32>
    %cst_102 = arith.constant 1.000000e+00 : f32
    %890 = vector.broadcast %cst_102 : f32 to vector<8x128xf32>
    %891 = arith.subf %890, %5 : vector<8x128xf32>
    %892 = arith.mulf %891, %888 : vector<8x128xf32>
    %893 = arith.addf %889, %892 : vector<8x128xf32>
    %894 = arith.subf %878, %872 : f32
    %895 = vector.broadcast %894 : f32 to vector<8x128xf32>
    %896 = arith.mulf %895, %5 : vector<8x128xf32>
    %897 = vector.broadcast %872 : f32 to vector<8x128xf32>
    %898 = arith.addf %897, %896 : vector<8x128xf32>
    %899 = arith.subf %879, %873 : f32
    %900 = vector.broadcast %899 : f32 to vector<8x128xf32>
    %901 = arith.mulf %900, %5 : vector<8x128xf32>
    %902 = vector.broadcast %873 : f32 to vector<8x128xf32>
    %903 = arith.addf %902, %901 : vector<8x128xf32>
    %904 = arith.subf %876, %874 : f32
    %905 = vector.broadcast %904 : f32 to vector<8x128xf32>
    %906 = arith.mulf %905, %5 : vector<8x128xf32>
    %907 = vector.broadcast %874 : f32 to vector<8x128xf32>
    %908 = arith.addf %907, %906 : vector<8x128xf32>
    %909 = arith.subf %877, %875 : f32
    %910 = vector.broadcast %909 : f32 to vector<8x128xf32>
    %911 = arith.mulf %910, %5 : vector<8x128xf32>
    %912 = vector.broadcast %875 : f32 to vector<8x128xf32>
    %913 = arith.addf %912, %911 : vector<8x128xf32>
    %914 = arith.mulf %898, %870 : vector<8x128xf32>
    %915 = arith.mulf %903, %871 : vector<8x128xf32>
    %916 = arith.subf %914, %915 : vector<8x128xf32>
    %917 = arith.mulf %908, %886 : vector<8x128xf32>
    %918 = arith.addf %916, %917 : vector<8x128xf32>
    %919 = arith.mulf %913, %893 : vector<8x128xf32>
    %920 = arith.subf %918, %919 : vector<8x128xf32>
    %921 = arith.mulf %898, %871 : vector<8x128xf32>
    %922 = arith.mulf %903, %870 : vector<8x128xf32>
    %923 = arith.addf %921, %922 : vector<8x128xf32>
    %924 = arith.mulf %908, %893 : vector<8x128xf32>
    %925 = arith.addf %923, %924 : vector<8x128xf32>
    %926 = arith.mulf %913, %886 : vector<8x128xf32>
    %927 = arith.addf %925, %926 : vector<8x128xf32>
    %c120 = arith.constant 120 : index
    %928 = memref.load %arg1[%c120] : memref<224xf32, #tpu.memory_space<smem>>
    %c121 = arith.constant 121 : index
    %929 = memref.load %arg1[%c121] : memref<224xf32, #tpu.memory_space<smem>>
    %c122 = arith.constant 122 : index
    %930 = memref.load %arg1[%c122] : memref<224xf32, #tpu.memory_space<smem>>
    %c123 = arith.constant 123 : index
    %931 = memref.load %arg1[%c123] : memref<224xf32, #tpu.memory_space<smem>>
    %c124 = arith.constant 124 : index
    %932 = memref.load %arg1[%c124] : memref<224xf32, #tpu.memory_space<smem>>
    %c125 = arith.constant 125 : index
    %933 = memref.load %arg1[%c125] : memref<224xf32, #tpu.memory_space<smem>>
    %c126 = arith.constant 126 : index
    %934 = memref.load %arg1[%c126] : memref<224xf32, #tpu.memory_space<smem>>
    %c127 = arith.constant 127 : index
    %935 = memref.load %arg1[%c127] : memref<224xf32, #tpu.memory_space<smem>>
    %c32_i32_103 = arith.constant 32 : i32
    %936 = tpu.dynamic_rotate %920 by %c32_i32_103 dim 1 : vector<8x128xf32>, i32 -> vector<8x128xf32>
    %c96_i32_104 = arith.constant 96 : i32
    %937 = tpu.dynamic_rotate %920 by %c96_i32_104 dim 1 : vector<8x128xf32>, i32 -> vector<8x128xf32>
    %938 = arith.mulf %10, %936 : vector<8x128xf32>
    %cst_105 = arith.constant 1.000000e+00 : f32
    %939 = vector.broadcast %cst_105 : f32 to vector<8x128xf32>
    %940 = arith.subf %939, %10 : vector<8x128xf32>
    %941 = arith.mulf %940, %937 : vector<8x128xf32>
    %942 = arith.addf %938, %941 : vector<8x128xf32>
    %c32_i32_106 = arith.constant 32 : i32
    %943 = tpu.dynamic_rotate %927 by %c32_i32_106 dim 1 : vector<8x128xf32>, i32 -> vector<8x128xf32>
    %c96_i32_107 = arith.constant 96 : i32
    %944 = tpu.dynamic_rotate %927 by %c96_i32_107 dim 1 : vector<8x128xf32>, i32 -> vector<8x128xf32>
    %945 = arith.mulf %10, %943 : vector<8x128xf32>
    %cst_108 = arith.constant 1.000000e+00 : f32
    %946 = vector.broadcast %cst_108 : f32 to vector<8x128xf32>
    %947 = arith.subf %946, %10 : vector<8x128xf32>
    %948 = arith.mulf %947, %944 : vector<8x128xf32>
    %949 = arith.addf %945, %948 : vector<8x128xf32>
    %950 = arith.subf %934, %928 : f32
    %951 = vector.broadcast %950 : f32 to vector<8x128xf32>
    %952 = arith.mulf %951, %10 : vector<8x128xf32>
    %953 = vector.broadcast %928 : f32 to vector<8x128xf32>
    %954 = arith.addf %953, %952 : vector<8x128xf32>
    %955 = arith.subf %935, %929 : f32
    %956 = vector.broadcast %955 : f32 to vector<8x128xf32>
    %957 = arith.mulf %956, %10 : vector<8x128xf32>
    %958 = vector.broadcast %929 : f32 to vector<8x128xf32>
    %959 = arith.addf %958, %957 : vector<8x128xf32>
    %960 = arith.subf %932, %930 : f32
    %961 = vector.broadcast %960 : f32 to vector<8x128xf32>
    %962 = arith.mulf %961, %10 : vector<8x128xf32>
    %963 = vector.broadcast %930 : f32 to vector<8x128xf32>
    %964 = arith.addf %963, %962 : vector<8x128xf32>
    %965 = arith.subf %933, %931 : f32
    %966 = vector.broadcast %965 : f32 to vector<8x128xf32>
    %967 = arith.mulf %966, %10 : vector<8x128xf32>
    %968 = vector.broadcast %931 : f32 to vector<8x128xf32>
    %969 = arith.addf %968, %967 : vector<8x128xf32>
    %970 = arith.mulf %954, %920 : vector<8x128xf32>
    %971 = arith.mulf %959, %927 : vector<8x128xf32>
    %972 = arith.subf %970, %971 : vector<8x128xf32>
    %973 = arith.mulf %964, %942 : vector<8x128xf32>
    %974 = arith.addf %972, %973 : vector<8x128xf32>
    %975 = arith.mulf %969, %949 : vector<8x128xf32>
    %976 = arith.subf %974, %975 : vector<8x128xf32>
    %977 = arith.mulf %954, %927 : vector<8x128xf32>
    %978 = arith.mulf %959, %920 : vector<8x128xf32>
    %979 = arith.addf %977, %978 : vector<8x128xf32>
    %980 = arith.mulf %964, %949 : vector<8x128xf32>
    %981 = arith.addf %979, %980 : vector<8x128xf32>
    %982 = arith.mulf %969, %942 : vector<8x128xf32>
    %983 = arith.addf %981, %982 : vector<8x128xf32>
    %c128 = arith.constant 128 : index
    %984 = memref.load %arg1[%c128] : memref<224xf32, #tpu.memory_space<smem>>
    %c129 = arith.constant 129 : index
    %985 = memref.load %arg1[%c129] : memref<224xf32, #tpu.memory_space<smem>>
    %c130 = arith.constant 130 : index
    %986 = memref.load %arg1[%c130] : memref<224xf32, #tpu.memory_space<smem>>
    %c131 = arith.constant 131 : index
    %987 = memref.load %arg1[%c131] : memref<224xf32, #tpu.memory_space<smem>>
    %c132 = arith.constant 132 : index
    %988 = memref.load %arg1[%c132] : memref<224xf32, #tpu.memory_space<smem>>
    %c133 = arith.constant 133 : index
    %989 = memref.load %arg1[%c133] : memref<224xf32, #tpu.memory_space<smem>>
    %c134 = arith.constant 134 : index
    %990 = memref.load %arg1[%c134] : memref<224xf32, #tpu.memory_space<smem>>
    %c135 = arith.constant 135 : index
    %991 = memref.load %arg1[%c135] : memref<224xf32, #tpu.memory_space<smem>>
    %c16_i32_109 = arith.constant 16 : i32
    %992 = tpu.dynamic_rotate %976 by %c16_i32_109 dim 1 : vector<8x128xf32>, i32 -> vector<8x128xf32>
    %c112_i32_110 = arith.constant 112 : i32
    %993 = tpu.dynamic_rotate %976 by %c112_i32_110 dim 1 : vector<8x128xf32>, i32 -> vector<8x128xf32>
    %994 = arith.mulf %15, %992 : vector<8x128xf32>
    %cst_111 = arith.constant 1.000000e+00 : f32
    %995 = vector.broadcast %cst_111 : f32 to vector<8x128xf32>
    %996 = arith.subf %995, %15 : vector<8x128xf32>
    %997 = arith.mulf %996, %993 : vector<8x128xf32>
    %998 = arith.addf %994, %997 : vector<8x128xf32>
    %c16_i32_112 = arith.constant 16 : i32
    %999 = tpu.dynamic_rotate %983 by %c16_i32_112 dim 1 : vector<8x128xf32>, i32 -> vector<8x128xf32>
    %c112_i32_113 = arith.constant 112 : i32
    %1000 = tpu.dynamic_rotate %983 by %c112_i32_113 dim 1 : vector<8x128xf32>, i32 -> vector<8x128xf32>
    %1001 = arith.mulf %15, %999 : vector<8x128xf32>
    %cst_114 = arith.constant 1.000000e+00 : f32
    %1002 = vector.broadcast %cst_114 : f32 to vector<8x128xf32>
    %1003 = arith.subf %1002, %15 : vector<8x128xf32>
    %1004 = arith.mulf %1003, %1000 : vector<8x128xf32>
    %1005 = arith.addf %1001, %1004 : vector<8x128xf32>
    %1006 = arith.subf %990, %984 : f32
    %1007 = vector.broadcast %1006 : f32 to vector<8x128xf32>
    %1008 = arith.mulf %1007, %15 : vector<8x128xf32>
    %1009 = vector.broadcast %984 : f32 to vector<8x128xf32>
    %1010 = arith.addf %1009, %1008 : vector<8x128xf32>
    %1011 = arith.subf %991, %985 : f32
    %1012 = vector.broadcast %1011 : f32 to vector<8x128xf32>
    %1013 = arith.mulf %1012, %15 : vector<8x128xf32>
    %1014 = vector.broadcast %985 : f32 to vector<8x128xf32>
    %1015 = arith.addf %1014, %1013 : vector<8x128xf32>
    %1016 = arith.subf %988, %986 : f32
    %1017 = vector.broadcast %1016 : f32 to vector<8x128xf32>
    %1018 = arith.mulf %1017, %15 : vector<8x128xf32>
    %1019 = vector.broadcast %986 : f32 to vector<8x128xf32>
    %1020 = arith.addf %1019, %1018 : vector<8x128xf32>
    %1021 = arith.subf %989, %987 : f32
    %1022 = vector.broadcast %1021 : f32 to vector<8x128xf32>
    %1023 = arith.mulf %1022, %15 : vector<8x128xf32>
    %1024 = vector.broadcast %987 : f32 to vector<8x128xf32>
    %1025 = arith.addf %1024, %1023 : vector<8x128xf32>
    %1026 = arith.mulf %1010, %976 : vector<8x128xf32>
    %1027 = arith.mulf %1015, %983 : vector<8x128xf32>
    %1028 = arith.subf %1026, %1027 : vector<8x128xf32>
    %1029 = arith.mulf %1020, %998 : vector<8x128xf32>
    %1030 = arith.addf %1028, %1029 : vector<8x128xf32>
    %1031 = arith.mulf %1025, %1005 : vector<8x128xf32>
    %1032 = arith.subf %1030, %1031 : vector<8x128xf32>
    %1033 = arith.mulf %1010, %983 : vector<8x128xf32>
    %1034 = arith.mulf %1015, %976 : vector<8x128xf32>
    %1035 = arith.addf %1033, %1034 : vector<8x128xf32>
    %1036 = arith.mulf %1020, %1005 : vector<8x128xf32>
    %1037 = arith.addf %1035, %1036 : vector<8x128xf32>
    %1038 = arith.mulf %1025, %998 : vector<8x128xf32>
    %1039 = arith.addf %1037, %1038 : vector<8x128xf32>
    %c136 = arith.constant 136 : index
    %1040 = memref.load %arg1[%c136] : memref<224xf32, #tpu.memory_space<smem>>
    %c137 = arith.constant 137 : index
    %1041 = memref.load %arg1[%c137] : memref<224xf32, #tpu.memory_space<smem>>
    %c138 = arith.constant 138 : index
    %1042 = memref.load %arg1[%c138] : memref<224xf32, #tpu.memory_space<smem>>
    %c139 = arith.constant 139 : index
    %1043 = memref.load %arg1[%c139] : memref<224xf32, #tpu.memory_space<smem>>
    %c140 = arith.constant 140 : index
    %1044 = memref.load %arg1[%c140] : memref<224xf32, #tpu.memory_space<smem>>
    %c141 = arith.constant 141 : index
    %1045 = memref.load %arg1[%c141] : memref<224xf32, #tpu.memory_space<smem>>
    %c142 = arith.constant 142 : index
    %1046 = memref.load %arg1[%c142] : memref<224xf32, #tpu.memory_space<smem>>
    %c143 = arith.constant 143 : index
    %1047 = memref.load %arg1[%c143] : memref<224xf32, #tpu.memory_space<smem>>
    %c8_i32_115 = arith.constant 8 : i32
    %1048 = tpu.dynamic_rotate %1032 by %c8_i32_115 dim 1 : vector<8x128xf32>, i32 -> vector<8x128xf32>
    %c120_i32_116 = arith.constant 120 : i32
    %1049 = tpu.dynamic_rotate %1032 by %c120_i32_116 dim 1 : vector<8x128xf32>, i32 -> vector<8x128xf32>
    %1050 = arith.mulf %20, %1048 : vector<8x128xf32>
    %cst_117 = arith.constant 1.000000e+00 : f32
    %1051 = vector.broadcast %cst_117 : f32 to vector<8x128xf32>
    %1052 = arith.subf %1051, %20 : vector<8x128xf32>
    %1053 = arith.mulf %1052, %1049 : vector<8x128xf32>
    %1054 = arith.addf %1050, %1053 : vector<8x128xf32>
    %c8_i32_118 = arith.constant 8 : i32
    %1055 = tpu.dynamic_rotate %1039 by %c8_i32_118 dim 1 : vector<8x128xf32>, i32 -> vector<8x128xf32>
    %c120_i32_119 = arith.constant 120 : i32
    %1056 = tpu.dynamic_rotate %1039 by %c120_i32_119 dim 1 : vector<8x128xf32>, i32 -> vector<8x128xf32>
    %1057 = arith.mulf %20, %1055 : vector<8x128xf32>
    %cst_120 = arith.constant 1.000000e+00 : f32
    %1058 = vector.broadcast %cst_120 : f32 to vector<8x128xf32>
    %1059 = arith.subf %1058, %20 : vector<8x128xf32>
    %1060 = arith.mulf %1059, %1056 : vector<8x128xf32>
    %1061 = arith.addf %1057, %1060 : vector<8x128xf32>
    %1062 = arith.subf %1046, %1040 : f32
    %1063 = vector.broadcast %1062 : f32 to vector<8x128xf32>
    %1064 = arith.mulf %1063, %20 : vector<8x128xf32>
    %1065 = vector.broadcast %1040 : f32 to vector<8x128xf32>
    %1066 = arith.addf %1065, %1064 : vector<8x128xf32>
    %1067 = arith.subf %1047, %1041 : f32
    %1068 = vector.broadcast %1067 : f32 to vector<8x128xf32>
    %1069 = arith.mulf %1068, %20 : vector<8x128xf32>
    %1070 = vector.broadcast %1041 : f32 to vector<8x128xf32>
    %1071 = arith.addf %1070, %1069 : vector<8x128xf32>
    %1072 = arith.subf %1044, %1042 : f32
    %1073 = vector.broadcast %1072 : f32 to vector<8x128xf32>
    %1074 = arith.mulf %1073, %20 : vector<8x128xf32>
    %1075 = vector.broadcast %1042 : f32 to vector<8x128xf32>
    %1076 = arith.addf %1075, %1074 : vector<8x128xf32>
    %1077 = arith.subf %1045, %1043 : f32
    %1078 = vector.broadcast %1077 : f32 to vector<8x128xf32>
    %1079 = arith.mulf %1078, %20 : vector<8x128xf32>
    %1080 = vector.broadcast %1043 : f32 to vector<8x128xf32>
    %1081 = arith.addf %1080, %1079 : vector<8x128xf32>
    %1082 = arith.mulf %1066, %1032 : vector<8x128xf32>
    %1083 = arith.mulf %1071, %1039 : vector<8x128xf32>
    %1084 = arith.subf %1082, %1083 : vector<8x128xf32>
    %1085 = arith.mulf %1076, %1054 : vector<8x128xf32>
    %1086 = arith.addf %1084, %1085 : vector<8x128xf32>
    %1087 = arith.mulf %1081, %1061 : vector<8x128xf32>
    %1088 = arith.subf %1086, %1087 : vector<8x128xf32>
    %1089 = arith.mulf %1066, %1039 : vector<8x128xf32>
    %1090 = arith.mulf %1071, %1032 : vector<8x128xf32>
    %1091 = arith.addf %1089, %1090 : vector<8x128xf32>
    %1092 = arith.mulf %1076, %1061 : vector<8x128xf32>
    %1093 = arith.addf %1091, %1092 : vector<8x128xf32>
    %1094 = arith.mulf %1081, %1054 : vector<8x128xf32>
    %1095 = arith.addf %1093, %1094 : vector<8x128xf32>
    %c144 = arith.constant 144 : index
    %1096 = memref.load %arg1[%c144] : memref<224xf32, #tpu.memory_space<smem>>
    %c145 = arith.constant 145 : index
    %1097 = memref.load %arg1[%c145] : memref<224xf32, #tpu.memory_space<smem>>
    %c146 = arith.constant 146 : index
    %1098 = memref.load %arg1[%c146] : memref<224xf32, #tpu.memory_space<smem>>
    %c147 = arith.constant 147 : index
    %1099 = memref.load %arg1[%c147] : memref<224xf32, #tpu.memory_space<smem>>
    %c148 = arith.constant 148 : index
    %1100 = memref.load %arg1[%c148] : memref<224xf32, #tpu.memory_space<smem>>
    %c149 = arith.constant 149 : index
    %1101 = memref.load %arg1[%c149] : memref<224xf32, #tpu.memory_space<smem>>
    %c150 = arith.constant 150 : index
    %1102 = memref.load %arg1[%c150] : memref<224xf32, #tpu.memory_space<smem>>
    %c151 = arith.constant 151 : index
    %1103 = memref.load %arg1[%c151] : memref<224xf32, #tpu.memory_space<smem>>
    %c4_i32_121 = arith.constant 4 : i32
    %1104 = tpu.dynamic_rotate %1088 by %c4_i32_121 dim 1 : vector<8x128xf32>, i32 -> vector<8x128xf32>
    %c124_i32_122 = arith.constant 124 : i32
    %1105 = tpu.dynamic_rotate %1088 by %c124_i32_122 dim 1 : vector<8x128xf32>, i32 -> vector<8x128xf32>
    %1106 = arith.mulf %25, %1104 : vector<8x128xf32>
    %cst_123 = arith.constant 1.000000e+00 : f32
    %1107 = vector.broadcast %cst_123 : f32 to vector<8x128xf32>
    %1108 = arith.subf %1107, %25 : vector<8x128xf32>
    %1109 = arith.mulf %1108, %1105 : vector<8x128xf32>
    %1110 = arith.addf %1106, %1109 : vector<8x128xf32>
    %c4_i32_124 = arith.constant 4 : i32
    %1111 = tpu.dynamic_rotate %1095 by %c4_i32_124 dim 1 : vector<8x128xf32>, i32 -> vector<8x128xf32>
    %c124_i32_125 = arith.constant 124 : i32
    %1112 = tpu.dynamic_rotate %1095 by %c124_i32_125 dim 1 : vector<8x128xf32>, i32 -> vector<8x128xf32>
    %1113 = arith.mulf %25, %1111 : vector<8x128xf32>
    %cst_126 = arith.constant 1.000000e+00 : f32
    %1114 = vector.broadcast %cst_126 : f32 to vector<8x128xf32>
    %1115 = arith.subf %1114, %25 : vector<8x128xf32>
    %1116 = arith.mulf %1115, %1112 : vector<8x128xf32>
    %1117 = arith.addf %1113, %1116 : vector<8x128xf32>
    %1118 = arith.subf %1102, %1096 : f32
    %1119 = vector.broadcast %1118 : f32 to vector<8x128xf32>
    %1120 = arith.mulf %1119, %25 : vector<8x128xf32>
    %1121 = vector.broadcast %1096 : f32 to vector<8x128xf32>
    %1122 = arith.addf %1121, %1120 : vector<8x128xf32>
    %1123 = arith.subf %1103, %1097 : f32
    %1124 = vector.broadcast %1123 : f32 to vector<8x128xf32>
    %1125 = arith.mulf %1124, %25 : vector<8x128xf32>
    %1126 = vector.broadcast %1097 : f32 to vector<8x128xf32>
    %1127 = arith.addf %1126, %1125 : vector<8x128xf32>
    %1128 = arith.subf %1100, %1098 : f32
    %1129 = vector.broadcast %1128 : f32 to vector<8x128xf32>
    %1130 = arith.mulf %1129, %25 : vector<8x128xf32>
    %1131 = vector.broadcast %1098 : f32 to vector<8x128xf32>
    %1132 = arith.addf %1131, %1130 : vector<8x128xf32>
    %1133 = arith.subf %1101, %1099 : f32
    %1134 = vector.broadcast %1133 : f32 to vector<8x128xf32>
    %1135 = arith.mulf %1134, %25 : vector<8x128xf32>
    %1136 = vector.broadcast %1099 : f32 to vector<8x128xf32>
    %1137 = arith.addf %1136, %1135 : vector<8x128xf32>
    %1138 = arith.mulf %1122, %1088 : vector<8x128xf32>
    %1139 = arith.mulf %1127, %1095 : vector<8x128xf32>
    %1140 = arith.subf %1138, %1139 : vector<8x128xf32>
    %1141 = arith.mulf %1132, %1110 : vector<8x128xf32>
    %1142 = arith.addf %1140, %1141 : vector<8x128xf32>
    %1143 = arith.mulf %1137, %1117 : vector<8x128xf32>
    %1144 = arith.subf %1142, %1143 : vector<8x128xf32>
    %1145 = arith.mulf %1122, %1095 : vector<8x128xf32>
    %1146 = arith.mulf %1127, %1088 : vector<8x128xf32>
    %1147 = arith.addf %1145, %1146 : vector<8x128xf32>
    %1148 = arith.mulf %1132, %1117 : vector<8x128xf32>
    %1149 = arith.addf %1147, %1148 : vector<8x128xf32>
    %1150 = arith.mulf %1137, %1110 : vector<8x128xf32>
    %1151 = arith.addf %1149, %1150 : vector<8x128xf32>
    %c152 = arith.constant 152 : index
    %1152 = memref.load %arg1[%c152] : memref<224xf32, #tpu.memory_space<smem>>
    %c153 = arith.constant 153 : index
    %1153 = memref.load %arg1[%c153] : memref<224xf32, #tpu.memory_space<smem>>
    %c154 = arith.constant 154 : index
    %1154 = memref.load %arg1[%c154] : memref<224xf32, #tpu.memory_space<smem>>
    %c155 = arith.constant 155 : index
    %1155 = memref.load %arg1[%c155] : memref<224xf32, #tpu.memory_space<smem>>
    %c156 = arith.constant 156 : index
    %1156 = memref.load %arg1[%c156] : memref<224xf32, #tpu.memory_space<smem>>
    %c157 = arith.constant 157 : index
    %1157 = memref.load %arg1[%c157] : memref<224xf32, #tpu.memory_space<smem>>
    %c158 = arith.constant 158 : index
    %1158 = memref.load %arg1[%c158] : memref<224xf32, #tpu.memory_space<smem>>
    %c159 = arith.constant 159 : index
    %1159 = memref.load %arg1[%c159] : memref<224xf32, #tpu.memory_space<smem>>
    %c2_i32_127 = arith.constant 2 : i32
    %1160 = tpu.dynamic_rotate %1144 by %c2_i32_127 dim 1 : vector<8x128xf32>, i32 -> vector<8x128xf32>
    %c126_i32_128 = arith.constant 126 : i32
    %1161 = tpu.dynamic_rotate %1144 by %c126_i32_128 dim 1 : vector<8x128xf32>, i32 -> vector<8x128xf32>
    %1162 = arith.mulf %30, %1160 : vector<8x128xf32>
    %cst_129 = arith.constant 1.000000e+00 : f32
    %1163 = vector.broadcast %cst_129 : f32 to vector<8x128xf32>
    %1164 = arith.subf %1163, %30 : vector<8x128xf32>
    %1165 = arith.mulf %1164, %1161 : vector<8x128xf32>
    %1166 = arith.addf %1162, %1165 : vector<8x128xf32>
    %c2_i32_130 = arith.constant 2 : i32
    %1167 = tpu.dynamic_rotate %1151 by %c2_i32_130 dim 1 : vector<8x128xf32>, i32 -> vector<8x128xf32>
    %c126_i32_131 = arith.constant 126 : i32
    %1168 = tpu.dynamic_rotate %1151 by %c126_i32_131 dim 1 : vector<8x128xf32>, i32 -> vector<8x128xf32>
    %1169 = arith.mulf %30, %1167 : vector<8x128xf32>
    %cst_132 = arith.constant 1.000000e+00 : f32
    %1170 = vector.broadcast %cst_132 : f32 to vector<8x128xf32>
    %1171 = arith.subf %1170, %30 : vector<8x128xf32>
    %1172 = arith.mulf %1171, %1168 : vector<8x128xf32>
    %1173 = arith.addf %1169, %1172 : vector<8x128xf32>
    %1174 = arith.subf %1158, %1152 : f32
    %1175 = vector.broadcast %1174 : f32 to vector<8x128xf32>
    %1176 = arith.mulf %1175, %30 : vector<8x128xf32>
    %1177 = vector.broadcast %1152 : f32 to vector<8x128xf32>
    %1178 = arith.addf %1177, %1176 : vector<8x128xf32>
    %1179 = arith.subf %1159, %1153 : f32
    %1180 = vector.broadcast %1179 : f32 to vector<8x128xf32>
    %1181 = arith.mulf %1180, %30 : vector<8x128xf32>
    %1182 = vector.broadcast %1153 : f32 to vector<8x128xf32>
    %1183 = arith.addf %1182, %1181 : vector<8x128xf32>
    %1184 = arith.subf %1156, %1154 : f32
    %1185 = vector.broadcast %1184 : f32 to vector<8x128xf32>
    %1186 = arith.mulf %1185, %30 : vector<8x128xf32>
    %1187 = vector.broadcast %1154 : f32 to vector<8x128xf32>
    %1188 = arith.addf %1187, %1186 : vector<8x128xf32>
    %1189 = arith.subf %1157, %1155 : f32
    %1190 = vector.broadcast %1189 : f32 to vector<8x128xf32>
    %1191 = arith.mulf %1190, %30 : vector<8x128xf32>
    %1192 = vector.broadcast %1155 : f32 to vector<8x128xf32>
    %1193 = arith.addf %1192, %1191 : vector<8x128xf32>
    %1194 = arith.mulf %1178, %1144 : vector<8x128xf32>
    %1195 = arith.mulf %1183, %1151 : vector<8x128xf32>
    %1196 = arith.subf %1194, %1195 : vector<8x128xf32>
    %1197 = arith.mulf %1188, %1166 : vector<8x128xf32>
    %1198 = arith.addf %1196, %1197 : vector<8x128xf32>
    %1199 = arith.mulf %1193, %1173 : vector<8x128xf32>
    %1200 = arith.subf %1198, %1199 : vector<8x128xf32>
    %1201 = arith.mulf %1178, %1151 : vector<8x128xf32>
    %1202 = arith.mulf %1183, %1144 : vector<8x128xf32>
    %1203 = arith.addf %1201, %1202 : vector<8x128xf32>
    %1204 = arith.mulf %1188, %1173 : vector<8x128xf32>
    %1205 = arith.addf %1203, %1204 : vector<8x128xf32>
    %1206 = arith.mulf %1193, %1166 : vector<8x128xf32>
    %1207 = arith.addf %1205, %1206 : vector<8x128xf32>
    %c160 = arith.constant 160 : index
    %1208 = memref.load %arg1[%c160] : memref<224xf32, #tpu.memory_space<smem>>
    %c161 = arith.constant 161 : index
    %1209 = memref.load %arg1[%c161] : memref<224xf32, #tpu.memory_space<smem>>
    %c162 = arith.constant 162 : index
    %1210 = memref.load %arg1[%c162] : memref<224xf32, #tpu.memory_space<smem>>
    %c163 = arith.constant 163 : index
    %1211 = memref.load %arg1[%c163] : memref<224xf32, #tpu.memory_space<smem>>
    %c164 = arith.constant 164 : index
    %1212 = memref.load %arg1[%c164] : memref<224xf32, #tpu.memory_space<smem>>
    %c165 = arith.constant 165 : index
    %1213 = memref.load %arg1[%c165] : memref<224xf32, #tpu.memory_space<smem>>
    %c166 = arith.constant 166 : index
    %1214 = memref.load %arg1[%c166] : memref<224xf32, #tpu.memory_space<smem>>
    %c167 = arith.constant 167 : index
    %1215 = memref.load %arg1[%c167] : memref<224xf32, #tpu.memory_space<smem>>
    %c1_i32_133 = arith.constant 1 : i32
    %1216 = tpu.dynamic_rotate %1200 by %c1_i32_133 dim 1 : vector<8x128xf32>, i32 -> vector<8x128xf32>
    %c127_i32_134 = arith.constant 127 : i32
    %1217 = tpu.dynamic_rotate %1200 by %c127_i32_134 dim 1 : vector<8x128xf32>, i32 -> vector<8x128xf32>
    %1218 = arith.mulf %35, %1216 : vector<8x128xf32>
    %cst_135 = arith.constant 1.000000e+00 : f32
    %1219 = vector.broadcast %cst_135 : f32 to vector<8x128xf32>
    %1220 = arith.subf %1219, %35 : vector<8x128xf32>
    %1221 = arith.mulf %1220, %1217 : vector<8x128xf32>
    %1222 = arith.addf %1218, %1221 : vector<8x128xf32>
    %c1_i32_136 = arith.constant 1 : i32
    %1223 = tpu.dynamic_rotate %1207 by %c1_i32_136 dim 1 : vector<8x128xf32>, i32 -> vector<8x128xf32>
    %c127_i32_137 = arith.constant 127 : i32
    %1224 = tpu.dynamic_rotate %1207 by %c127_i32_137 dim 1 : vector<8x128xf32>, i32 -> vector<8x128xf32>
    %1225 = arith.mulf %35, %1223 : vector<8x128xf32>
    %cst_138 = arith.constant 1.000000e+00 : f32
    %1226 = vector.broadcast %cst_138 : f32 to vector<8x128xf32>
    %1227 = arith.subf %1226, %35 : vector<8x128xf32>
    %1228 = arith.mulf %1227, %1224 : vector<8x128xf32>
    %1229 = arith.addf %1225, %1228 : vector<8x128xf32>
    %1230 = arith.subf %1214, %1208 : f32
    %1231 = vector.broadcast %1230 : f32 to vector<8x128xf32>
    %1232 = arith.mulf %1231, %35 : vector<8x128xf32>
    %1233 = vector.broadcast %1208 : f32 to vector<8x128xf32>
    %1234 = arith.addf %1233, %1232 : vector<8x128xf32>
    %1235 = arith.subf %1215, %1209 : f32
    %1236 = vector.broadcast %1235 : f32 to vector<8x128xf32>
    %1237 = arith.mulf %1236, %35 : vector<8x128xf32>
    %1238 = vector.broadcast %1209 : f32 to vector<8x128xf32>
    %1239 = arith.addf %1238, %1237 : vector<8x128xf32>
    %1240 = arith.subf %1212, %1210 : f32
    %1241 = vector.broadcast %1240 : f32 to vector<8x128xf32>
    %1242 = arith.mulf %1241, %35 : vector<8x128xf32>
    %1243 = vector.broadcast %1210 : f32 to vector<8x128xf32>
    %1244 = arith.addf %1243, %1242 : vector<8x128xf32>
    %1245 = arith.subf %1213, %1211 : f32
    %1246 = vector.broadcast %1245 : f32 to vector<8x128xf32>
    %1247 = arith.mulf %1246, %35 : vector<8x128xf32>
    %1248 = vector.broadcast %1211 : f32 to vector<8x128xf32>
    %1249 = arith.addf %1248, %1247 : vector<8x128xf32>
    %1250 = arith.mulf %1234, %1200 : vector<8x128xf32>
    %1251 = arith.mulf %1239, %1207 : vector<8x128xf32>
    %1252 = arith.subf %1250, %1251 : vector<8x128xf32>
    %1253 = arith.mulf %1244, %1222 : vector<8x128xf32>
    %1254 = arith.addf %1252, %1253 : vector<8x128xf32>
    %1255 = arith.mulf %1249, %1229 : vector<8x128xf32>
    %1256 = arith.subf %1254, %1255 : vector<8x128xf32>
    %1257 = arith.mulf %1234, %1207 : vector<8x128xf32>
    %1258 = arith.mulf %1239, %1200 : vector<8x128xf32>
    %1259 = arith.addf %1257, %1258 : vector<8x128xf32>
    %1260 = arith.mulf %1244, %1229 : vector<8x128xf32>
    %1261 = arith.addf %1259, %1260 : vector<8x128xf32>
    %1262 = arith.mulf %1249, %1222 : vector<8x128xf32>
    %1263 = arith.addf %1261, %1262 : vector<8x128xf32>
    %1264 = arith.mulf %1256, %78 : vector<8x128xf32>
    %1265 = arith.mulf %1263, %78 : vector<8x128xf32>
    %c168 = arith.constant 168 : index
    %1266 = memref.load %arg1[%c168] : memref<224xf32, #tpu.memory_space<smem>>
    %c169 = arith.constant 169 : index
    %1267 = memref.load %arg1[%c169] : memref<224xf32, #tpu.memory_space<smem>>
    %c170 = arith.constant 170 : index
    %1268 = memref.load %arg1[%c170] : memref<224xf32, #tpu.memory_space<smem>>
    %c171 = arith.constant 171 : index
    %1269 = memref.load %arg1[%c171] : memref<224xf32, #tpu.memory_space<smem>>
    %c172 = arith.constant 172 : index
    %1270 = memref.load %arg1[%c172] : memref<224xf32, #tpu.memory_space<smem>>
    %c173 = arith.constant 173 : index
    %1271 = memref.load %arg1[%c173] : memref<224xf32, #tpu.memory_space<smem>>
    %c174 = arith.constant 174 : index
    %1272 = memref.load %arg1[%c174] : memref<224xf32, #tpu.memory_space<smem>>
    %c175 = arith.constant 175 : index
    %1273 = memref.load %arg1[%c175] : memref<224xf32, #tpu.memory_space<smem>>
    %c64_i32_139 = arith.constant 64 : i32
    %1274 = tpu.dynamic_rotate %1264 by %c64_i32_139 dim 1 : vector<8x128xf32>, i32 -> vector<8x128xf32>
    %c64_i32_140 = arith.constant 64 : i32
    %1275 = tpu.dynamic_rotate %1264 by %c64_i32_140 dim 1 : vector<8x128xf32>, i32 -> vector<8x128xf32>
    %1276 = arith.mulf %5, %1274 : vector<8x128xf32>
    %cst_141 = arith.constant 1.000000e+00 : f32
    %1277 = vector.broadcast %cst_141 : f32 to vector<8x128xf32>
    %1278 = arith.subf %1277, %5 : vector<8x128xf32>
    %1279 = arith.mulf %1278, %1275 : vector<8x128xf32>
    %1280 = arith.addf %1276, %1279 : vector<8x128xf32>
    %c64_i32_142 = arith.constant 64 : i32
    %1281 = tpu.dynamic_rotate %1265 by %c64_i32_142 dim 1 : vector<8x128xf32>, i32 -> vector<8x128xf32>
    %c64_i32_143 = arith.constant 64 : i32
    %1282 = tpu.dynamic_rotate %1265 by %c64_i32_143 dim 1 : vector<8x128xf32>, i32 -> vector<8x128xf32>
    %1283 = arith.mulf %5, %1281 : vector<8x128xf32>
    %cst_144 = arith.constant 1.000000e+00 : f32
    %1284 = vector.broadcast %cst_144 : f32 to vector<8x128xf32>
    %1285 = arith.subf %1284, %5 : vector<8x128xf32>
    %1286 = arith.mulf %1285, %1282 : vector<8x128xf32>
    %1287 = arith.addf %1283, %1286 : vector<8x128xf32>
    %1288 = arith.subf %1272, %1266 : f32
    %1289 = vector.broadcast %1288 : f32 to vector<8x128xf32>
    %1290 = arith.mulf %1289, %5 : vector<8x128xf32>
    %1291 = vector.broadcast %1266 : f32 to vector<8x128xf32>
    %1292 = arith.addf %1291, %1290 : vector<8x128xf32>
    %1293 = arith.subf %1273, %1267 : f32
    %1294 = vector.broadcast %1293 : f32 to vector<8x128xf32>
    %1295 = arith.mulf %1294, %5 : vector<8x128xf32>
    %1296 = vector.broadcast %1267 : f32 to vector<8x128xf32>
    %1297 = arith.addf %1296, %1295 : vector<8x128xf32>
    %1298 = arith.subf %1270, %1268 : f32
    %1299 = vector.broadcast %1298 : f32 to vector<8x128xf32>
    %1300 = arith.mulf %1299, %5 : vector<8x128xf32>
    %1301 = vector.broadcast %1268 : f32 to vector<8x128xf32>
    %1302 = arith.addf %1301, %1300 : vector<8x128xf32>
    %1303 = arith.subf %1271, %1269 : f32
    %1304 = vector.broadcast %1303 : f32 to vector<8x128xf32>
    %1305 = arith.mulf %1304, %5 : vector<8x128xf32>
    %1306 = vector.broadcast %1269 : f32 to vector<8x128xf32>
    %1307 = arith.addf %1306, %1305 : vector<8x128xf32>
    %1308 = arith.mulf %1292, %1264 : vector<8x128xf32>
    %1309 = arith.mulf %1297, %1265 : vector<8x128xf32>
    %1310 = arith.subf %1308, %1309 : vector<8x128xf32>
    %1311 = arith.mulf %1302, %1280 : vector<8x128xf32>
    %1312 = arith.addf %1310, %1311 : vector<8x128xf32>
    %1313 = arith.mulf %1307, %1287 : vector<8x128xf32>
    %1314 = arith.subf %1312, %1313 : vector<8x128xf32>
    %1315 = arith.mulf %1292, %1265 : vector<8x128xf32>
    %1316 = arith.mulf %1297, %1264 : vector<8x128xf32>
    %1317 = arith.addf %1315, %1316 : vector<8x128xf32>
    %1318 = arith.mulf %1302, %1287 : vector<8x128xf32>
    %1319 = arith.addf %1317, %1318 : vector<8x128xf32>
    %1320 = arith.mulf %1307, %1280 : vector<8x128xf32>
    %1321 = arith.addf %1319, %1320 : vector<8x128xf32>
    %c176 = arith.constant 176 : index
    %1322 = memref.load %arg1[%c176] : memref<224xf32, #tpu.memory_space<smem>>
    %c177 = arith.constant 177 : index
    %1323 = memref.load %arg1[%c177] : memref<224xf32, #tpu.memory_space<smem>>
    %c178 = arith.constant 178 : index
    %1324 = memref.load %arg1[%c178] : memref<224xf32, #tpu.memory_space<smem>>
    %c179 = arith.constant 179 : index
    %1325 = memref.load %arg1[%c179] : memref<224xf32, #tpu.memory_space<smem>>
    %c180 = arith.constant 180 : index
    %1326 = memref.load %arg1[%c180] : memref<224xf32, #tpu.memory_space<smem>>
    %c181 = arith.constant 181 : index
    %1327 = memref.load %arg1[%c181] : memref<224xf32, #tpu.memory_space<smem>>
    %c182 = arith.constant 182 : index
    %1328 = memref.load %arg1[%c182] : memref<224xf32, #tpu.memory_space<smem>>
    %c183 = arith.constant 183 : index
    %1329 = memref.load %arg1[%c183] : memref<224xf32, #tpu.memory_space<smem>>
    %c32_i32_145 = arith.constant 32 : i32
    %1330 = tpu.dynamic_rotate %1314 by %c32_i32_145 dim 1 : vector<8x128xf32>, i32 -> vector<8x128xf32>
    %c96_i32_146 = arith.constant 96 : i32
    %1331 = tpu.dynamic_rotate %1314 by %c96_i32_146 dim 1 : vector<8x128xf32>, i32 -> vector<8x128xf32>
    %1332 = arith.mulf %10, %1330 : vector<8x128xf32>
    %cst_147 = arith.constant 1.000000e+00 : f32
    %1333 = vector.broadcast %cst_147 : f32 to vector<8x128xf32>
    %1334 = arith.subf %1333, %10 : vector<8x128xf32>
    %1335 = arith.mulf %1334, %1331 : vector<8x128xf32>
    %1336 = arith.addf %1332, %1335 : vector<8x128xf32>
    %c32_i32_148 = arith.constant 32 : i32
    %1337 = tpu.dynamic_rotate %1321 by %c32_i32_148 dim 1 : vector<8x128xf32>, i32 -> vector<8x128xf32>
    %c96_i32_149 = arith.constant 96 : i32
    %1338 = tpu.dynamic_rotate %1321 by %c96_i32_149 dim 1 : vector<8x128xf32>, i32 -> vector<8x128xf32>
    %1339 = arith.mulf %10, %1337 : vector<8x128xf32>
    %cst_150 = arith.constant 1.000000e+00 : f32
    %1340 = vector.broadcast %cst_150 : f32 to vector<8x128xf32>
    %1341 = arith.subf %1340, %10 : vector<8x128xf32>
    %1342 = arith.mulf %1341, %1338 : vector<8x128xf32>
    %1343 = arith.addf %1339, %1342 : vector<8x128xf32>
    %1344 = arith.subf %1328, %1322 : f32
    %1345 = vector.broadcast %1344 : f32 to vector<8x128xf32>
    %1346 = arith.mulf %1345, %10 : vector<8x128xf32>
    %1347 = vector.broadcast %1322 : f32 to vector<8x128xf32>
    %1348 = arith.addf %1347, %1346 : vector<8x128xf32>
    %1349 = arith.subf %1329, %1323 : f32
    %1350 = vector.broadcast %1349 : f32 to vector<8x128xf32>
    %1351 = arith.mulf %1350, %10 : vector<8x128xf32>
    %1352 = vector.broadcast %1323 : f32 to vector<8x128xf32>
    %1353 = arith.addf %1352, %1351 : vector<8x128xf32>
    %1354 = arith.subf %1326, %1324 : f32
    %1355 = vector.broadcast %1354 : f32 to vector<8x128xf32>
    %1356 = arith.mulf %1355, %10 : vector<8x128xf32>
    %1357 = vector.broadcast %1324 : f32 to vector<8x128xf32>
    %1358 = arith.addf %1357, %1356 : vector<8x128xf32>
    %1359 = arith.subf %1327, %1325 : f32
    %1360 = vector.broadcast %1359 : f32 to vector<8x128xf32>
    %1361 = arith.mulf %1360, %10 : vector<8x128xf32>
    %1362 = vector.broadcast %1325 : f32 to vector<8x128xf32>
    %1363 = arith.addf %1362, %1361 : vector<8x128xf32>
    %1364 = arith.mulf %1348, %1314 : vector<8x128xf32>
    %1365 = arith.mulf %1353, %1321 : vector<8x128xf32>
    %1366 = arith.subf %1364, %1365 : vector<8x128xf32>
    %1367 = arith.mulf %1358, %1336 : vector<8x128xf32>
    %1368 = arith.addf %1366, %1367 : vector<8x128xf32>
    %1369 = arith.mulf %1363, %1343 : vector<8x128xf32>
    %1370 = arith.subf %1368, %1369 : vector<8x128xf32>
    %1371 = arith.mulf %1348, %1321 : vector<8x128xf32>
    %1372 = arith.mulf %1353, %1314 : vector<8x128xf32>
    %1373 = arith.addf %1371, %1372 : vector<8x128xf32>
    %1374 = arith.mulf %1358, %1343 : vector<8x128xf32>
    %1375 = arith.addf %1373, %1374 : vector<8x128xf32>
    %1376 = arith.mulf %1363, %1336 : vector<8x128xf32>
    %1377 = arith.addf %1375, %1376 : vector<8x128xf32>
    %c184 = arith.constant 184 : index
    %1378 = memref.load %arg1[%c184] : memref<224xf32, #tpu.memory_space<smem>>
    %c185 = arith.constant 185 : index
    %1379 = memref.load %arg1[%c185] : memref<224xf32, #tpu.memory_space<smem>>
    %c186 = arith.constant 186 : index
    %1380 = memref.load %arg1[%c186] : memref<224xf32, #tpu.memory_space<smem>>
    %c187 = arith.constant 187 : index
    %1381 = memref.load %arg1[%c187] : memref<224xf32, #tpu.memory_space<smem>>
    %c188 = arith.constant 188 : index
    %1382 = memref.load %arg1[%c188] : memref<224xf32, #tpu.memory_space<smem>>
    %c189 = arith.constant 189 : index
    %1383 = memref.load %arg1[%c189] : memref<224xf32, #tpu.memory_space<smem>>
    %c190 = arith.constant 190 : index
    %1384 = memref.load %arg1[%c190] : memref<224xf32, #tpu.memory_space<smem>>
    %c191 = arith.constant 191 : index
    %1385 = memref.load %arg1[%c191] : memref<224xf32, #tpu.memory_space<smem>>
    %c16_i32_151 = arith.constant 16 : i32
    %1386 = tpu.dynamic_rotate %1370 by %c16_i32_151 dim 1 : vector<8x128xf32>, i32 -> vector<8x128xf32>
    %c112_i32_152 = arith.constant 112 : i32
    %1387 = tpu.dynamic_rotate %1370 by %c112_i32_152 dim 1 : vector<8x128xf32>, i32 -> vector<8x128xf32>
    %1388 = arith.mulf %15, %1386 : vector<8x128xf32>
    %cst_153 = arith.constant 1.000000e+00 : f32
    %1389 = vector.broadcast %cst_153 : f32 to vector<8x128xf32>
    %1390 = arith.subf %1389, %15 : vector<8x128xf32>
    %1391 = arith.mulf %1390, %1387 : vector<8x128xf32>
    %1392 = arith.addf %1388, %1391 : vector<8x128xf32>
    %c16_i32_154 = arith.constant 16 : i32
    %1393 = tpu.dynamic_rotate %1377 by %c16_i32_154 dim 1 : vector<8x128xf32>, i32 -> vector<8x128xf32>
    %c112_i32_155 = arith.constant 112 : i32
    %1394 = tpu.dynamic_rotate %1377 by %c112_i32_155 dim 1 : vector<8x128xf32>, i32 -> vector<8x128xf32>
    %1395 = arith.mulf %15, %1393 : vector<8x128xf32>
    %cst_156 = arith.constant 1.000000e+00 : f32
    %1396 = vector.broadcast %cst_156 : f32 to vector<8x128xf32>
    %1397 = arith.subf %1396, %15 : vector<8x128xf32>
    %1398 = arith.mulf %1397, %1394 : vector<8x128xf32>
    %1399 = arith.addf %1395, %1398 : vector<8x128xf32>
    %1400 = arith.subf %1384, %1378 : f32
    %1401 = vector.broadcast %1400 : f32 to vector<8x128xf32>
    %1402 = arith.mulf %1401, %15 : vector<8x128xf32>
    %1403 = vector.broadcast %1378 : f32 to vector<8x128xf32>
    %1404 = arith.addf %1403, %1402 : vector<8x128xf32>
    %1405 = arith.subf %1385, %1379 : f32
    %1406 = vector.broadcast %1405 : f32 to vector<8x128xf32>
    %1407 = arith.mulf %1406, %15 : vector<8x128xf32>
    %1408 = vector.broadcast %1379 : f32 to vector<8x128xf32>
    %1409 = arith.addf %1408, %1407 : vector<8x128xf32>
    %1410 = arith.subf %1382, %1380 : f32
    %1411 = vector.broadcast %1410 : f32 to vector<8x128xf32>
    %1412 = arith.mulf %1411, %15 : vector<8x128xf32>
    %1413 = vector.broadcast %1380 : f32 to vector<8x128xf32>
    %1414 = arith.addf %1413, %1412 : vector<8x128xf32>
    %1415 = arith.subf %1383, %1381 : f32
    %1416 = vector.broadcast %1415 : f32 to vector<8x128xf32>
    %1417 = arith.mulf %1416, %15 : vector<8x128xf32>
    %1418 = vector.broadcast %1381 : f32 to vector<8x128xf32>
    %1419 = arith.addf %1418, %1417 : vector<8x128xf32>
    %1420 = arith.mulf %1404, %1370 : vector<8x128xf32>
    %1421 = arith.mulf %1409, %1377 : vector<8x128xf32>
    %1422 = arith.subf %1420, %1421 : vector<8x128xf32>
    %1423 = arith.mulf %1414, %1392 : vector<8x128xf32>
    %1424 = arith.addf %1422, %1423 : vector<8x128xf32>
    %1425 = arith.mulf %1419, %1399 : vector<8x128xf32>
    %1426 = arith.subf %1424, %1425 : vector<8x128xf32>
    %1427 = arith.mulf %1404, %1377 : vector<8x128xf32>
    %1428 = arith.mulf %1409, %1370 : vector<8x128xf32>
    %1429 = arith.addf %1427, %1428 : vector<8x128xf32>
    %1430 = arith.mulf %1414, %1399 : vector<8x128xf32>
    %1431 = arith.addf %1429, %1430 : vector<8x128xf32>
    %1432 = arith.mulf %1419, %1392 : vector<8x128xf32>
    %1433 = arith.addf %1431, %1432 : vector<8x128xf32>
    %c192 = arith.constant 192 : index
    %1434 = memref.load %arg1[%c192] : memref<224xf32, #tpu.memory_space<smem>>
    %c193 = arith.constant 193 : index
    %1435 = memref.load %arg1[%c193] : memref<224xf32, #tpu.memory_space<smem>>
    %c194 = arith.constant 194 : index
    %1436 = memref.load %arg1[%c194] : memref<224xf32, #tpu.memory_space<smem>>
    %c195 = arith.constant 195 : index
    %1437 = memref.load %arg1[%c195] : memref<224xf32, #tpu.memory_space<smem>>
    %c196 = arith.constant 196 : index
    %1438 = memref.load %arg1[%c196] : memref<224xf32, #tpu.memory_space<smem>>
    %c197 = arith.constant 197 : index
    %1439 = memref.load %arg1[%c197] : memref<224xf32, #tpu.memory_space<smem>>
    %c198 = arith.constant 198 : index
    %1440 = memref.load %arg1[%c198] : memref<224xf32, #tpu.memory_space<smem>>
    %c199 = arith.constant 199 : index
    %1441 = memref.load %arg1[%c199] : memref<224xf32, #tpu.memory_space<smem>>
    %c8_i32_157 = arith.constant 8 : i32
    %1442 = tpu.dynamic_rotate %1426 by %c8_i32_157 dim 1 : vector<8x128xf32>, i32 -> vector<8x128xf32>
    %c120_i32_158 = arith.constant 120 : i32
    %1443 = tpu.dynamic_rotate %1426 by %c120_i32_158 dim 1 : vector<8x128xf32>, i32 -> vector<8x128xf32>
    %1444 = arith.mulf %20, %1442 : vector<8x128xf32>
    %cst_159 = arith.constant 1.000000e+00 : f32
    %1445 = vector.broadcast %cst_159 : f32 to vector<8x128xf32>
    %1446 = arith.subf %1445, %20 : vector<8x128xf32>
    %1447 = arith.mulf %1446, %1443 : vector<8x128xf32>
    %1448 = arith.addf %1444, %1447 : vector<8x128xf32>
    %c8_i32_160 = arith.constant 8 : i32
    %1449 = tpu.dynamic_rotate %1433 by %c8_i32_160 dim 1 : vector<8x128xf32>, i32 -> vector<8x128xf32>
    %c120_i32_161 = arith.constant 120 : i32
    %1450 = tpu.dynamic_rotate %1433 by %c120_i32_161 dim 1 : vector<8x128xf32>, i32 -> vector<8x128xf32>
    %1451 = arith.mulf %20, %1449 : vector<8x128xf32>
    %cst_162 = arith.constant 1.000000e+00 : f32
    %1452 = vector.broadcast %cst_162 : f32 to vector<8x128xf32>
    %1453 = arith.subf %1452, %20 : vector<8x128xf32>
    %1454 = arith.mulf %1453, %1450 : vector<8x128xf32>
    %1455 = arith.addf %1451, %1454 : vector<8x128xf32>
    %1456 = arith.subf %1440, %1434 : f32
    %1457 = vector.broadcast %1456 : f32 to vector<8x128xf32>
    %1458 = arith.mulf %1457, %20 : vector<8x128xf32>
    %1459 = vector.broadcast %1434 : f32 to vector<8x128xf32>
    %1460 = arith.addf %1459, %1458 : vector<8x128xf32>
    %1461 = arith.subf %1441, %1435 : f32
    %1462 = vector.broadcast %1461 : f32 to vector<8x128xf32>
    %1463 = arith.mulf %1462, %20 : vector<8x128xf32>
    %1464 = vector.broadcast %1435 : f32 to vector<8x128xf32>
    %1465 = arith.addf %1464, %1463 : vector<8x128xf32>
    %1466 = arith.subf %1438, %1436 : f32
    %1467 = vector.broadcast %1466 : f32 to vector<8x128xf32>
    %1468 = arith.mulf %1467, %20 : vector<8x128xf32>
    %1469 = vector.broadcast %1436 : f32 to vector<8x128xf32>
    %1470 = arith.addf %1469, %1468 : vector<8x128xf32>
    %1471 = arith.subf %1439, %1437 : f32
    %1472 = vector.broadcast %1471 : f32 to vector<8x128xf32>
    %1473 = arith.mulf %1472, %20 : vector<8x128xf32>
    %1474 = vector.broadcast %1437 : f32 to vector<8x128xf32>
    %1475 = arith.addf %1474, %1473 : vector<8x128xf32>
    %1476 = arith.mulf %1460, %1426 : vector<8x128xf32>
    %1477 = arith.mulf %1465, %1433 : vector<8x128xf32>
    %1478 = arith.subf %1476, %1477 : vector<8x128xf32>
    %1479 = arith.mulf %1470, %1448 : vector<8x128xf32>
    %1480 = arith.addf %1478, %1479 : vector<8x128xf32>
    %1481 = arith.mulf %1475, %1455 : vector<8x128xf32>
    %1482 = arith.subf %1480, %1481 : vector<8x128xf32>
    %1483 = arith.mulf %1460, %1433 : vector<8x128xf32>
    %1484 = arith.mulf %1465, %1426 : vector<8x128xf32>
    %1485 = arith.addf %1483, %1484 : vector<8x128xf32>
    %1486 = arith.mulf %1470, %1455 : vector<8x128xf32>
    %1487 = arith.addf %1485, %1486 : vector<8x128xf32>
    %1488 = arith.mulf %1475, %1448 : vector<8x128xf32>
    %1489 = arith.addf %1487, %1488 : vector<8x128xf32>
    %c200 = arith.constant 200 : index
    %1490 = memref.load %arg1[%c200] : memref<224xf32, #tpu.memory_space<smem>>
    %c201 = arith.constant 201 : index
    %1491 = memref.load %arg1[%c201] : memref<224xf32, #tpu.memory_space<smem>>
    %c202 = arith.constant 202 : index
    %1492 = memref.load %arg1[%c202] : memref<224xf32, #tpu.memory_space<smem>>
    %c203 = arith.constant 203 : index
    %1493 = memref.load %arg1[%c203] : memref<224xf32, #tpu.memory_space<smem>>
    %c204 = arith.constant 204 : index
    %1494 = memref.load %arg1[%c204] : memref<224xf32, #tpu.memory_space<smem>>
    %c205 = arith.constant 205 : index
    %1495 = memref.load %arg1[%c205] : memref<224xf32, #tpu.memory_space<smem>>
    %c206 = arith.constant 206 : index
    %1496 = memref.load %arg1[%c206] : memref<224xf32, #tpu.memory_space<smem>>
    %c207 = arith.constant 207 : index
    %1497 = memref.load %arg1[%c207] : memref<224xf32, #tpu.memory_space<smem>>
    %c4_i32_163 = arith.constant 4 : i32
    %1498 = tpu.dynamic_rotate %1482 by %c4_i32_163 dim 1 : vector<8x128xf32>, i32 -> vector<8x128xf32>
    %c124_i32_164 = arith.constant 124 : i32
    %1499 = tpu.dynamic_rotate %1482 by %c124_i32_164 dim 1 : vector<8x128xf32>, i32 -> vector<8x128xf32>
    %1500 = arith.mulf %25, %1498 : vector<8x128xf32>
    %cst_165 = arith.constant 1.000000e+00 : f32
    %1501 = vector.broadcast %cst_165 : f32 to vector<8x128xf32>
    %1502 = arith.subf %1501, %25 : vector<8x128xf32>
    %1503 = arith.mulf %1502, %1499 : vector<8x128xf32>
    %1504 = arith.addf %1500, %1503 : vector<8x128xf32>
    %c4_i32_166 = arith.constant 4 : i32
    %1505 = tpu.dynamic_rotate %1489 by %c4_i32_166 dim 1 : vector<8x128xf32>, i32 -> vector<8x128xf32>
    %c124_i32_167 = arith.constant 124 : i32
    %1506 = tpu.dynamic_rotate %1489 by %c124_i32_167 dim 1 : vector<8x128xf32>, i32 -> vector<8x128xf32>
    %1507 = arith.mulf %25, %1505 : vector<8x128xf32>
    %cst_168 = arith.constant 1.000000e+00 : f32
    %1508 = vector.broadcast %cst_168 : f32 to vector<8x128xf32>
    %1509 = arith.subf %1508, %25 : vector<8x128xf32>
    %1510 = arith.mulf %1509, %1506 : vector<8x128xf32>
    %1511 = arith.addf %1507, %1510 : vector<8x128xf32>
    %1512 = arith.subf %1496, %1490 : f32
    %1513 = vector.broadcast %1512 : f32 to vector<8x128xf32>
    %1514 = arith.mulf %1513, %25 : vector<8x128xf32>
    %1515 = vector.broadcast %1490 : f32 to vector<8x128xf32>
    %1516 = arith.addf %1515, %1514 : vector<8x128xf32>
    %1517 = arith.subf %1497, %1491 : f32
    %1518 = vector.broadcast %1517 : f32 to vector<8x128xf32>
    %1519 = arith.mulf %1518, %25 : vector<8x128xf32>
    %1520 = vector.broadcast %1491 : f32 to vector<8x128xf32>
    %1521 = arith.addf %1520, %1519 : vector<8x128xf32>
    %1522 = arith.subf %1494, %1492 : f32
    %1523 = vector.broadcast %1522 : f32 to vector<8x128xf32>
    %1524 = arith.mulf %1523, %25 : vector<8x128xf32>
    %1525 = vector.broadcast %1492 : f32 to vector<8x128xf32>
    %1526 = arith.addf %1525, %1524 : vector<8x128xf32>
    %1527 = arith.subf %1495, %1493 : f32
    %1528 = vector.broadcast %1527 : f32 to vector<8x128xf32>
    %1529 = arith.mulf %1528, %25 : vector<8x128xf32>
    %1530 = vector.broadcast %1493 : f32 to vector<8x128xf32>
    %1531 = arith.addf %1530, %1529 : vector<8x128xf32>
    %1532 = arith.mulf %1516, %1482 : vector<8x128xf32>
    %1533 = arith.mulf %1521, %1489 : vector<8x128xf32>
    %1534 = arith.subf %1532, %1533 : vector<8x128xf32>
    %1535 = arith.mulf %1526, %1504 : vector<8x128xf32>
    %1536 = arith.addf %1534, %1535 : vector<8x128xf32>
    %1537 = arith.mulf %1531, %1511 : vector<8x128xf32>
    %1538 = arith.subf %1536, %1537 : vector<8x128xf32>
    %1539 = arith.mulf %1516, %1489 : vector<8x128xf32>
    %1540 = arith.mulf %1521, %1482 : vector<8x128xf32>
    %1541 = arith.addf %1539, %1540 : vector<8x128xf32>
    %1542 = arith.mulf %1526, %1511 : vector<8x128xf32>
    %1543 = arith.addf %1541, %1542 : vector<8x128xf32>
    %1544 = arith.mulf %1531, %1504 : vector<8x128xf32>
    %1545 = arith.addf %1543, %1544 : vector<8x128xf32>
    %c208 = arith.constant 208 : index
    %1546 = memref.load %arg1[%c208] : memref<224xf32, #tpu.memory_space<smem>>
    %c209 = arith.constant 209 : index
    %1547 = memref.load %arg1[%c209] : memref<224xf32, #tpu.memory_space<smem>>
    %c210 = arith.constant 210 : index
    %1548 = memref.load %arg1[%c210] : memref<224xf32, #tpu.memory_space<smem>>
    %c211 = arith.constant 211 : index
    %1549 = memref.load %arg1[%c211] : memref<224xf32, #tpu.memory_space<smem>>
    %c212 = arith.constant 212 : index
    %1550 = memref.load %arg1[%c212] : memref<224xf32, #tpu.memory_space<smem>>
    %c213 = arith.constant 213 : index
    %1551 = memref.load %arg1[%c213] : memref<224xf32, #tpu.memory_space<smem>>
    %c214 = arith.constant 214 : index
    %1552 = memref.load %arg1[%c214] : memref<224xf32, #tpu.memory_space<smem>>
    %c215 = arith.constant 215 : index
    %1553 = memref.load %arg1[%c215] : memref<224xf32, #tpu.memory_space<smem>>
    %c2_i32_169 = arith.constant 2 : i32
    %1554 = tpu.dynamic_rotate %1538 by %c2_i32_169 dim 1 : vector<8x128xf32>, i32 -> vector<8x128xf32>
    %c126_i32_170 = arith.constant 126 : i32
    %1555 = tpu.dynamic_rotate %1538 by %c126_i32_170 dim 1 : vector<8x128xf32>, i32 -> vector<8x128xf32>
    %1556 = arith.mulf %30, %1554 : vector<8x128xf32>
    %cst_171 = arith.constant 1.000000e+00 : f32
    %1557 = vector.broadcast %cst_171 : f32 to vector<8x128xf32>
    %1558 = arith.subf %1557, %30 : vector<8x128xf32>
    %1559 = arith.mulf %1558, %1555 : vector<8x128xf32>
    %1560 = arith.addf %1556, %1559 : vector<8x128xf32>
    %c2_i32_172 = arith.constant 2 : i32
    %1561 = tpu.dynamic_rotate %1545 by %c2_i32_172 dim 1 : vector<8x128xf32>, i32 -> vector<8x128xf32>
    %c126_i32_173 = arith.constant 126 : i32
    %1562 = tpu.dynamic_rotate %1545 by %c126_i32_173 dim 1 : vector<8x128xf32>, i32 -> vector<8x128xf32>
    %1563 = arith.mulf %30, %1561 : vector<8x128xf32>
    %cst_174 = arith.constant 1.000000e+00 : f32
    %1564 = vector.broadcast %cst_174 : f32 to vector<8x128xf32>
    %1565 = arith.subf %1564, %30 : vector<8x128xf32>
    %1566 = arith.mulf %1565, %1562 : vector<8x128xf32>
    %1567 = arith.addf %1563, %1566 : vector<8x128xf32>
    %1568 = arith.subf %1552, %1546 : f32
    %1569 = vector.broadcast %1568 : f32 to vector<8x128xf32>
    %1570 = arith.mulf %1569, %30 : vector<8x128xf32>
    %1571 = vector.broadcast %1546 : f32 to vector<8x128xf32>
    %1572 = arith.addf %1571, %1570 : vector<8x128xf32>
    %1573 = arith.subf %1553, %1547 : f32
    %1574 = vector.broadcast %1573 : f32 to vector<8x128xf32>
    %1575 = arith.mulf %1574, %30 : vector<8x128xf32>
    %1576 = vector.broadcast %1547 : f32 to vector<8x128xf32>
    %1577 = arith.addf %1576, %1575 : vector<8x128xf32>
    %1578 = arith.subf %1550, %1548 : f32
    %1579 = vector.broadcast %1578 : f32 to vector<8x128xf32>
    %1580 = arith.mulf %1579, %30 : vector<8x128xf32>
    %1581 = vector.broadcast %1548 : f32 to vector<8x128xf32>
    %1582 = arith.addf %1581, %1580 : vector<8x128xf32>
    %1583 = arith.subf %1551, %1549 : f32
    %1584 = vector.broadcast %1583 : f32 to vector<8x128xf32>
    %1585 = arith.mulf %1584, %30 : vector<8x128xf32>
    %1586 = vector.broadcast %1549 : f32 to vector<8x128xf32>
    %1587 = arith.addf %1586, %1585 : vector<8x128xf32>
    %1588 = arith.mulf %1572, %1538 : vector<8x128xf32>
    %1589 = arith.mulf %1577, %1545 : vector<8x128xf32>
    %1590 = arith.subf %1588, %1589 : vector<8x128xf32>
    %1591 = arith.mulf %1582, %1560 : vector<8x128xf32>
    %1592 = arith.addf %1590, %1591 : vector<8x128xf32>
    %1593 = arith.mulf %1587, %1567 : vector<8x128xf32>
    %1594 = arith.subf %1592, %1593 : vector<8x128xf32>
    %1595 = arith.mulf %1572, %1545 : vector<8x128xf32>
    %1596 = arith.mulf %1577, %1538 : vector<8x128xf32>
    %1597 = arith.addf %1595, %1596 : vector<8x128xf32>
    %1598 = arith.mulf %1582, %1567 : vector<8x128xf32>
    %1599 = arith.addf %1597, %1598 : vector<8x128xf32>
    %1600 = arith.mulf %1587, %1560 : vector<8x128xf32>
    %1601 = arith.addf %1599, %1600 : vector<8x128xf32>
    %c216 = arith.constant 216 : index
    %1602 = memref.load %arg1[%c216] : memref<224xf32, #tpu.memory_space<smem>>
    %c217 = arith.constant 217 : index
    %1603 = memref.load %arg1[%c217] : memref<224xf32, #tpu.memory_space<smem>>
    %c218 = arith.constant 218 : index
    %1604 = memref.load %arg1[%c218] : memref<224xf32, #tpu.memory_space<smem>>
    %c219 = arith.constant 219 : index
    %1605 = memref.load %arg1[%c219] : memref<224xf32, #tpu.memory_space<smem>>
    %c220 = arith.constant 220 : index
    %1606 = memref.load %arg1[%c220] : memref<224xf32, #tpu.memory_space<smem>>
    %c221 = arith.constant 221 : index
    %1607 = memref.load %arg1[%c221] : memref<224xf32, #tpu.memory_space<smem>>
    %c222 = arith.constant 222 : index
    %1608 = memref.load %arg1[%c222] : memref<224xf32, #tpu.memory_space<smem>>
    %c223 = arith.constant 223 : index
    %1609 = memref.load %arg1[%c223] : memref<224xf32, #tpu.memory_space<smem>>
    %c1_i32_175 = arith.constant 1 : i32
    %1610 = tpu.dynamic_rotate %1594 by %c1_i32_175 dim 1 : vector<8x128xf32>, i32 -> vector<8x128xf32>
    %c127_i32_176 = arith.constant 127 : i32
    %1611 = tpu.dynamic_rotate %1594 by %c127_i32_176 dim 1 : vector<8x128xf32>, i32 -> vector<8x128xf32>
    %1612 = arith.mulf %35, %1610 : vector<8x128xf32>
    %cst_177 = arith.constant 1.000000e+00 : f32
    %1613 = vector.broadcast %cst_177 : f32 to vector<8x128xf32>
    %1614 = arith.subf %1613, %35 : vector<8x128xf32>
    %1615 = arith.mulf %1614, %1611 : vector<8x128xf32>
    %1616 = arith.addf %1612, %1615 : vector<8x128xf32>
    %c1_i32_178 = arith.constant 1 : i32
    %1617 = tpu.dynamic_rotate %1601 by %c1_i32_178 dim 1 : vector<8x128xf32>, i32 -> vector<8x128xf32>
    %c127_i32_179 = arith.constant 127 : i32
    %1618 = tpu.dynamic_rotate %1601 by %c127_i32_179 dim 1 : vector<8x128xf32>, i32 -> vector<8x128xf32>
    %1619 = arith.mulf %35, %1617 : vector<8x128xf32>
    %cst_180 = arith.constant 1.000000e+00 : f32
    %1620 = vector.broadcast %cst_180 : f32 to vector<8x128xf32>
    %1621 = arith.subf %1620, %35 : vector<8x128xf32>
    %1622 = arith.mulf %1621, %1618 : vector<8x128xf32>
    %1623 = arith.addf %1619, %1622 : vector<8x128xf32>
    %1624 = arith.subf %1608, %1602 : f32
    %1625 = vector.broadcast %1624 : f32 to vector<8x128xf32>
    %1626 = arith.mulf %1625, %35 : vector<8x128xf32>
    %1627 = vector.broadcast %1602 : f32 to vector<8x128xf32>
    %1628 = arith.addf %1627, %1626 : vector<8x128xf32>
    %1629 = arith.subf %1609, %1603 : f32
    %1630 = vector.broadcast %1629 : f32 to vector<8x128xf32>
    %1631 = arith.mulf %1630, %35 : vector<8x128xf32>
    %1632 = vector.broadcast %1603 : f32 to vector<8x128xf32>
    %1633 = arith.addf %1632, %1631 : vector<8x128xf32>
    %1634 = arith.subf %1606, %1604 : f32
    %1635 = vector.broadcast %1634 : f32 to vector<8x128xf32>
    %1636 = arith.mulf %1635, %35 : vector<8x128xf32>
    %1637 = vector.broadcast %1604 : f32 to vector<8x128xf32>
    %1638 = arith.addf %1637, %1636 : vector<8x128xf32>
    %1639 = arith.subf %1607, %1605 : f32
    %1640 = vector.broadcast %1639 : f32 to vector<8x128xf32>
    %1641 = arith.mulf %1640, %35 : vector<8x128xf32>
    %1642 = vector.broadcast %1605 : f32 to vector<8x128xf32>
    %1643 = arith.addf %1642, %1641 : vector<8x128xf32>
    %1644 = arith.mulf %1628, %1594 : vector<8x128xf32>
    %1645 = arith.mulf %1633, %1601 : vector<8x128xf32>
    %1646 = arith.subf %1644, %1645 : vector<8x128xf32>
    %1647 = arith.mulf %1638, %1616 : vector<8x128xf32>
    %1648 = arith.addf %1646, %1647 : vector<8x128xf32>
    %1649 = arith.mulf %1643, %1623 : vector<8x128xf32>
    %1650 = arith.subf %1648, %1649 : vector<8x128xf32>
    %1651 = arith.mulf %1628, %1601 : vector<8x128xf32>
    %1652 = arith.mulf %1633, %1594 : vector<8x128xf32>
    %1653 = arith.addf %1651, %1652 : vector<8x128xf32>
    %1654 = arith.mulf %1638, %1623 : vector<8x128xf32>
    %1655 = arith.addf %1653, %1654 : vector<8x128xf32>
    %1656 = arith.mulf %1643, %1616 : vector<8x128xf32>
    %1657 = arith.addf %1655, %1656 : vector<8x128xf32>
    %1658 = arith.mulf %1650, %1650 : vector<8x128xf32>
    %1659 = arith.mulf %1657, %1657 : vector<8x128xf32>
    %1660 = arith.addf %1658, %1659 : vector<8x128xf32>
    %c0_181 = arith.constant 0 : index
    %c0_182 = arith.constant 0 : index
    %1661 = vector.load %arg2[%c0_181, %c0_182] : memref<8x128xf32, #tpu.memory_space<vmem>>, vector<8x128xf32>
    tpu.vector_store %arg2[%c0_181, %c0_182], %1660 {strides = array<i32>} : memref<8x128xf32, #tpu.memory_space<vmem>>, vector<8x128xf32>,
    return
  }
  func.func @transform_0(%arg0: i32) -> i32 {
    %c0_i32 = arith.constant 0 : i32
    %c0_i32_0 = arith.constant 0 : i32
    return %c0_i32 : i32
  }
  func.func @transform_1(%arg0: i32) -> (i32, i32) {
    %c0_i32 = arith.constant 0 : i32
    %c0_i32_0 = arith.constant 0 : i32
    %c0_i32_1 = arith.constant 0 : i32
    return %c0_i32, %c0_i32_0 : i32, i32
  }
}

</mosaic_0001>

<bundles_post_ra>
// kernel: generator1_forward.1
= control target key start
LH: loop header
LB: loop body
LE: loop exit
PB: predicated region body
PF: predicated region fallthrough
CT: control target
= control target key end

     0   :  { %6 = vsyncpa [#allocation3], 0  ;;  %s2603_s0 = inlined_call_operand.vmem [shape: f32[224], index: 0, kind: input, shape index: {}]   ;;  %s2604_s1 = inlined_call_operand.vmem [shape: f32[8,128], index: 1, kind: output, shape index: {}]  }
   0x1   :  { %s13_s8 = sshll.u32 %s2603_s0, 4  ;;  %s14_s8 = int_to_ptr.vmem [resolvable:$true] %s13_s8 }
   0x2   :  { %s1891_s9 = scalar_lea.vmem %s14_s8, 32  ;;  %p1896_p1 = scmp.lt.s32.totalorder %s14_s8, %s14_s8 }
   0x3   :  { %p1892_p0 = scmp.ne.s32.totalorder %s14_s8, %s1891_s9  ;;  %p1897_p2 = scmp.lt.s32.totalorder %s1891_s9, %s1891_s9 }
   0x5   :  { %p1898_p3 = por %p1897_p2, %p1896_p1 }
   0x7   :  { %p1899_p4 = pnand %p1898_p3, %p1892_p0 }
   0x9   :  { %1902 = shalt.err (!%p1899_p4)
}
   0xa   :  { %s1905_s10 = smov [#allocation2]  }
   0xb   :  { %16 = dma.vmem_to_smem %s14_s8, 32, %s1905_s10, [#allocation3]  }
   0xc   :  { %1903 = dma.done.wait [#allocation3], 32  }
   0xd   :  { %1904 = vsyncadd [#allocation3], 4294967264 }
   0xe   :  { %20 = sfence }
   0xf   :  { %v21_v0 = vlaneseq  ;;  %v1906_v2 = vmov 0.0   ;;  %s1907_s0 = smov 64   ;;  %s73_s11 = sld [smem:[#allocation2]] }
  0x10   :  { %s1648_s12 = sld [smem:[#allocation2 + $0x1]]  ;;  %s1908_s29 = smov 96  }
  0x11   :  { %v1933_v1 = vand.u32 127, %v21_v0  ;;  %s1653_s13 = sld [smem:[#allocation2 + $0x6]]  ;;  %s1909_s30 = smov 32  }
  0x12   :  { %s1654_s14 = sld [smem:[#allocation2 + $0x7]] }
  0x13   :  { %vm70_vm0 = vcmp.eq.s32.totalorder %v1933_v1, 0  ;;  %v23_v5 = vshra.s32 %v1933_v1, 6  ;;  %s1938_s15 = sld [smem:[#allocation2 + $0x2]]  ;;  %v26_v10 = vshra.s32 %v1933_v1, 5 }
  0x14   :  { %v1647_v3 = vsel %vm70_vm0, 1.0, %v1906_v2  ;;  %s1651_s16 = sld [smem:[#allocation2 + $0x4]] }
  0x15   :  { %v1886_v4 = vpack.i.bf16 %v1906_v2, %v1647_v3  ;;  %s1940_s17 = sld [smem:[#allocation2 + $0x3]]  ;;  %v24_v6 = vand.u32 1, %v23_v5  ;;  %v95_v12 = vstv %s73_s11  ;;  %v27_v15 = vand.u32 1, %v26_v10 }
  0x16   :  { %s1652_s18 = sld [smem:[#allocation2 + $0x5]]  ;;  %v100_v14 = vstv %s1648_s12  ;;  %v29_v2 = vshra.s32 %v1933_v1, 4 }
  0x17   :  { %1887 = vrot.lane.b32.xlu0 %v1886_v4, %s1907_s0  ;;  %s92_s19 = ssub.f32 %s1653_s13, %s73_s11  ;;  %v1944_v7 = vcvt.s32.f32 %v24_v6  ;;  %v1959_v21 = vcvt.s32.f32 %v27_v15 }
  0x18   :  { %s97_s20 = ssub.f32 %s1654_s14, %s1648_s12  ;;  %v30_v6 = vand.u32 1, %v29_v2  ;;  %s1910_s14 = smov 112  }
  0x19   :  { %s1942_s21 = sld [smem:[#allocation2 + $0x8]]  ;;  %v93_v8 = vstv %s92_s19  ;;  %v105_v23 = vstv %s1938_s15  ;;  %v1963_v24 = vsub.f32 1.0, %v1944_v7  ;;  %v1988_v4 = vsub.f32 1.0, %v1959_v21 }
  0x1a   :  { %s1946_s22 = sld [smem:[#allocation2 + $0x9]]  ;;  %v98_v9 = vstv %s97_s20  ;;  %v94_v11 = vmul.f32 %v93_v8, %v1944_v7  ;;  %v1995_v15 = vcvt.s32.f32 %v30_v6 }
  0x1b   :  { %s1948_s23 = sld [smem:[#allocation2 + $0xe]]  ;;  %v99_v13 = vmul.f32 %v98_v9, %v1944_v7  ;;  %v110_v35 = vstv %s1940_s17 }
  0x1c   :  { %s1662_s24 = sld [smem:[#allocation2 + $0xf]]  ;;  %v96_v16 = vadd.f32 %v95_v12, %v94_v11 }
  0x1d   :  { %s102_s25 = ssub.f32 %s1651_s16, %s1938_s15  ;;  %v101_v18 = vadd.f32 %v100_v14, %v99_v13  ;;  %s1911_s15 = smov 16  }
  0x1e   :  { %s107_s26 = ssub.f32 %s1652_s18, %s1940_s17  ;;  %v112_v22 = vmul.f32 %v1647_v3, %v96_v16  ;;  %v119_v26 = vmul.f32 0.0, %v96_v16 }
  0x1f   :  { %v103_v17 = vstv %s102_s25  ;;  %v113_v25 = vmul.f32 0.0, %v101_v18  ;;  %v120_v27 = vmul.f32 %v1647_v3, %v101_v18  ;;  %v152_v36 = vstv %s1942_s21  ;;  %s1657_s2 = sld [smem:[#allocation2 + $0xa]] }
  0x20   :  { %v108_v19 = vstv %s107_s26  ;;  %v104_v20 = vmul.f32 %v103_v17, %v1944_v7  ;;  %v157_v48 = vstv %s1946_s22  ;;  %s1659_s3 = sld [smem:[#allocation2 + $0xc]] }
  0x21   :  { %s149_s27 = ssub.f32 %s1948_s23, %s1942_s21  ;;  %v109_v29 = vmul.f32 %v108_v19, %v1944_v7  ;;  %v114_v41 = vsub.f32 %v112_v22, %v113_v25  ;;  %v121_v42 = vadd.f32 %v120_v27, %v119_v26 }
  0x22   :  { %s154_s28 = ssub.f32 %s1662_s24, %s1946_s22  ;;  %v106_v34 = vadd.f32 %v105_v23, %v104_v20 }
  0x23   :  { %v150_v32 = vstv %s149_s27  ;;  %v111_v47 = vadd.f32 %v110_v35, %v109_v29  ;;  %s1979_s4 = sld [smem:[#allocation2 + $0xb]] }
  0x24   :  { %v155_v33 = vstv %s154_s28  ;;  %v151_v43 = vmul.f32 %v150_v32, %v1959_v21  ;;  %s1660_s5 = sld [smem:[#allocation2 + $0xd]]  ;;  %s1912_s28 = smov 120  }
  0x25   :  { %v156_v44 = vmul.f32 %v155_v33, %v1959_v21  ;;  %s1981_s7 = sld [smem:[#allocation2 + $0x10]]  ;;  %v162_v8 = vstv %s1657_s2 }
  0x26   :  { %v153_v51 = vadd.f32 %v152_v36, %v151_v43  ;;  %s159_s6 = ssub.f32 %s1659_s3, %s1657_s2  ;;  %s1913_s2 = smov 8  }
  0x27   :  { %v158_v52 = vadd.f32 %v157_v48, %v156_v44  ;;  %s1983_s8 = sld [smem:[#allocation2 + $0x11]] }
  0x28   :  { %s1669_s9 = sld [smem:[#allocation2 + $0x16]]  ;;  %v160_v3 = vstv %s159_s6 }
  0x29   :  { %s1670_s10 = sld [smem:[#allocation2 + $0x17]]  ;;  %v161_v5 = vmul.f32 %v160_v3, %v1959_v21  ;;  %v167_v19 = vstv %s1979_s4 }
  0x2a   :  { %s164_s11 = ssub.f32 %s1660_s5, %s1979_s4 }
  0x2b   :  { %v163_v13 = vadd.f32 %v162_v8, %v161_v5  ;;  %s1665_s16 = sld [smem:[#allocation2 + $0x12]] }
  0x2c   :  { %v165_v10 = vstv %s164_s11  ;;  %s1667_s17 = sld [smem:[#allocation2 + $0x14]] }
  0x2d   :  { %v166_v16 = vmul.f32 %v165_v10, %v1959_v21  ;;  %v214_v33 = vstv %s1983_s8  ;;  %s2009_s18 = sld [smem:[#allocation2 + $0x13]] }
  0x2e   :  { %s206_s12 = ssub.f32 %s1669_s9, %s1981_s7 }
  0x2f   :  { %s211_s13 = ssub.f32 %s1670_s10, %s1983_s8  ;;  %v168_v29 = vadd.f32 %v167_v19, %v166_v16 }
  0x30   :  { %v207_v18 = vstv %s206_s12  ;;  %s1668_s19 = sld [smem:[#allocation2 + $0x15]] }
  0x31   :  { %v212_v23 = vstv %s211_s13  ;;  %s2011_s21 = sld [smem:[#allocation2 + $0x18]] }
  0x32   :  { %v213_v32 = vmul.f32 %v212_v23, %v1995_v15  ;;  %s216_s20 = ssub.f32 %s1667_s17, %s1665_s16  ;;  %s1914_s17 = smov 124  }
  0x33   :  { %s2013_s22 = sld [smem:[#allocation2 + $0x19]]  ;;  %v224_v2 = vstv %s2009_s18 }
  0x34   :  { %s1677_s23 = sld [smem:[#allocation2 + $0x1e]] }
  0x35   :  { %s1678_s24 = sld [smem:[#allocation2 + $0x1f]] }
  0x36   :  { %s221_s25 = ssub.f32 %s1668_s19, %s2009_s18  ;;  %s1915_s18 = smov 4  }
  0x37   :  { %s1673_s3 = sld [smem:[#allocation2 + $0x1a]] }
  0x38   :  { %s1675_s4 = sld [smem:[#allocation2 + $0x1c]] }
  0x39   :  { %s2039_s5 = sld [smem:[#allocation2 + $0x1b]] }
  0x3a   :  { %s263_s26 = ssub.f32 %s1677_s23, %s2011_s21 }
  0x3b   :  { %s268_s27 = ssub.f32 %s1678_s24, %s2013_s22 }
  0x3c   :  { %s1676_s6 = sld [smem:[#allocation2 + $0x1d]] }
  0x3d   :  { %v269_v6 = vstv %s268_s27  ;;  %s2041_s8 = sld [smem:[#allocation2 + $0x20]] }
  0x3e   :  { %s2043_s9 = sld [smem:[#allocation2 + $0x21]] }
  0x3f   :  { %s1685_s10 = sld [smem:[#allocation2 + $0x26]] }
  0x40   :  { %s1686_s11 = sld [smem:[#allocation2 + $0x27]] }
  0x41   :  { %s1681_s19 = sld [smem:[#allocation2 + $0x22]] }
  0x42   :  { %s278_s12 = ssub.f32 %s1676_s6, %s2039_s5  ;;  %s1916_s6 = smov 126  }
  0x43   :  { %s2071_s24 = sld [smem:[#allocation2 + $0x28]] }
  0x44   :  { %s1694_s27 = sld [smem:[#allocation2 + $0x2f]] }
  0x45   :  { %s320_s13 = ssub.f32 %s1685_s10, %s2041_s8 }
  0x46   :  { %s2099_s10 = sld [smem:[#allocation2 + $0x2b]] }
  0x89   :  { %v1888_v28 = vpop.permute.xlu0 %1887 }
  0x8a   :  { %v1890_v30 = vunpack.i.h.bf16 %v1888_v28  ;;  %v1889_v31 = vunpack.i.l.bf16 %v1888_v28  ;;  %v208_v28 = vmul.f32 %v207_v18, %v1995_v15 }
  0x8c   :  { %v83_v37 = vmul.f32 %v1889_v31, %v1944_v7  ;;  %v85_v38 = vmul.f32 %v1889_v31, %v1963_v24  ;;  %v89_v39 = vmul.f32 %v1890_v30, %v1944_v7  ;;  %v90_v40 = vmul.f32 %v1890_v30, %v1963_v24 }
  0x8d   :  { %v209_v31 = vstv %s1981_s7  ;;  %s273_s7 = ssub.f32 %s1675_s4, %s1673_s3 }
  0x8e   :  { %v86_v45 = vadd.f32 %v85_v38, %v83_v37  ;;  %v91_v46 = vadd.f32 %v90_v40, %v89_v39  ;;  %v210_v37 = vadd.f32 %v209_v31, %v208_v28 }
  0x90   :  { %v115_v49 = vmul.f32 %v106_v34, %v86_v45  ;;  %v122_v50 = vmul.f32 %v106_v34, %v91_v46  ;;  %v117_v54 = vmul.f32 %v111_v47, %v91_v46  ;;  %v124_v56 = vmul.f32 %v111_v47, %v86_v45 }
  0x92   :  { %v116_v53 = vadd.f32 %v115_v49, %v114_v41  ;;  %v123_v55 = vadd.f32 %v122_v50, %v121_v42  ;;  %v215_v41 = vadd.f32 %v214_v33, %v213_v32  ;;  %v32_v49 = vshra.s32 %v1933_v1, 3 }
  0x93   :  { %v217_v50 = vstv %s216_s20  ;;  %s1683_s20 = sld [smem:[#allocation2 + $0x24]] }
  0x94   :  { %v118_v57 = vsub.f32 %v116_v53, %v117_v54  ;;  %v125_v58 = vadd.f32 %v124_v56, %v123_v55  ;;  %v33_v53 = vand.u32 1, %v32_v49  ;;  %v219_v54 = vstv %s1665_s16  ;;  %s325_s16 = ssub.f32 %s1686_s11, %s2043_s9 }
  0x95   :  { %v222_v56 = vstv %s221_s25  ;;  %s2073_s25 = sld [smem:[#allocation2 + $0x29]] }
  0x96   :  { %136 = vrot.lane.b32.xlu1 %v118_v57, %s1908_s29  ;;  %134 = vrot.lane.b32.xlu0 %v118_v57, %s1909_s30  ;;  %v170_v59 = vmul.f32 %v158_v52, %v125_v58  ;;  %v169_v60 = vmul.f32 %v153_v51, %v118_v57  ;;  %v176_v61 = vmul.f32 %v153_v51, %v125_v58  ;;  %v2018_v51 = vsub.f32 1.0, %v1995_v15  ;;  %s1692_s11 = sld [smem:[#allocation2 + $0x2d]] }
  0x97   :  { %v177_v62 = vmul.f32 %v158_v52, %v118_v57  ;;  %v218_v52 = vmul.f32 %v217_v50, %v1995_v15  ;;  %v321_v50 = vstv %s320_s13  ;;  %s2101_s13 = sld [smem:[#allocation2 + $0x30]] }
  0x98   :  { %v171_v63 = vsub.f32 %v169_v60, %v170_v59 }
  0x99   :  { %v178_v0 = vadd.f32 %v177_v62, %v176_v61  ;;  %v220_v59 = vadd.f32 %v219_v54, %v218_v52  ;;  %v2025_v61 = vcvt.s32.f32 %v33_v53  ;;  %v223_v62 = vmul.f32 %v222_v56, %v1995_v15  ;;  %s330_s23 = ssub.f32 %s1683_s20, %s1681_s19 }
  0x9a   :  { %142 = vrot.lane.b32.xlu1 %v125_v58, %s1909_s30  ;;  %144 = vrot.lane.b32.xlu0 %v125_v58, %s1908_s29  ;;  %v281_v52 = vstv %s2039_s5  ;;  %s1702_s20 = sld [smem:[#allocation2 + $0x37]] }
  0x9b   :  { %v270_v16 = vmul.f32 %v269_v6, %v2025_v61  ;;  %s382_s5 = ssub.f32 %s1694_s27, %s2073_s25 }
  0x9c   :  { %s1699_s27 = sld [smem:[#allocation2 + $0x34]] }
 0x108   :  { %v137_v9 = vpop.permute.xlu1 %136  ;;  %v135_v11 = vpop.permute.xlu0 %134 }
 0x109   :  { %v140_v12 = vmul.f32 %v1988_v4, %v137_v9  ;;  %v138_v14 = vmul.f32 %v135_v11, %v1959_v21 }
 0x10b   :  { %v141_v17 = vadd.f32 %v140_v12, %v138_v14  ;;  %v225_v12 = vadd.f32 %v224_v2, %v223_v62  ;;  %v266_v14 = vstv %s2011_s21  ;;  %v328_v2 = vstv %s2043_s9  ;;  %s2069_s21 = sld [smem:[#allocation2 + $0x23]] }
 0x10c   :  { %v143_v20 = vpop.permute.xlu1 %142  ;;  %v145_v22 = vpop.permute.xlu0 %144  ;;  %s1691_s9 = sld [smem:[#allocation2 + $0x2c]] }
 0x10d   :  { %v172_v25 = vmul.f32 %v163_v13, %v141_v17  ;;  %v146_v26 = vmul.f32 %v143_v20, %v1959_v21  ;;  %v147_v27 = vmul.f32 %v145_v22, %v1988_v4  ;;  %v181_v38 = vmul.f32 %v168_v29, %v141_v17 }
 0x10e   :  { %v271_v17 = vstv %s2013_s22  ;;  %s1684_s22 = sld [smem:[#allocation2 + $0x25]] }
 0x10f   :  { %v148_v30 = vadd.f32 %v147_v27, %v146_v26  ;;  %v173_v34 = vadd.f32 %v172_v25, %v171_v63  ;;  %v272_v27 = vadd.f32 %v271_v17, %v270_v16 }
 0x111   :  { %v174_v35 = vmul.f32 %v168_v29, %v148_v30  ;;  %v179_v36 = vmul.f32 %v163_v13, %v148_v30 }
 0x113   :  { %v180_v39 = vadd.f32 %v179_v36, %v178_v0  ;;  %v175_v40 = vsub.f32 %v173_v34, %v174_v35  ;;  %v264_v0 = vstv %s263_s26  ;;  %v35_v35 = vshra.s32 %v1933_v1, 2  ;;  %s1693_s26 = sld [smem:[#allocation2 + $0x2e]] }
 0x114   :  { %v265_v11 = vmul.f32 %v264_v0, %v2025_v61  ;;  %v274_v36 = vstv %s273_s7  ;;  %s1917_s7 = smov 2  }
 0x115   :  { %193 = vrot.lane.b32.xlu0 %v175_v40, %s1910_s14  ;;  %191 = vrot.lane.b32.xlu1 %v175_v40, %s1911_s15  ;;  %v182_v42 = vadd.f32 %v181_v38, %v180_v39  ;;  %v226_v44 = vmul.f32 %v210_v37, %v175_v40  ;;  %v234_v46 = vmul.f32 %v215_v41, %v175_v40  ;;  %v36_v39 = vand.u32 1, %v35_v35 }
 0x116   :  { %v267_v22 = vadd.f32 %v266_v14, %v265_v11  ;;  %v275_v38 = vmul.f32 %v274_v36, %v2025_v61  ;;  %v276_v40 = vstv %s1673_s3  ;;  %s335_s3 = ssub.f32 %s1684_s22, %s2069_s21 }
 0x117   :  { %v227_v43 = vmul.f32 %v215_v41, %v182_v42  ;;  %v233_v45 = vmul.f32 %v210_v37, %v182_v42  ;;  %v2048_v37 = vsub.f32 1.0, %v2025_v61 }
 0x119   :  { %201 = vrot.lane.b32.xlu0 %v182_v42, %s1910_s14  ;;  %199 = vrot.lane.b32.xlu1 %v182_v42, %s1911_s15  ;;  %v228_v47 = vsub.f32 %v226_v44, %v227_v43  ;;  %v235_v48 = vadd.f32 %v234_v46, %v233_v45  ;;  %v279_v42 = vstv %s278_s12  ;;  %v277_v45 = vadd.f32 %v276_v40, %v275_v38  ;;  %s377_s4 = ssub.f32 %s1693_s26, %s2071_s24 }
 0x11a   :  { %v338_v40 = vstv %s2069_s21  ;;  %s392_s21 = ssub.f32 %s1692_s11, %s2099_s10 }
 0x11b   :  { %s2142_s26 = sld [smem:[#allocation2 + $0x32]] }
 0x11c   :  { %s2159_s11 = sld [smem:[#allocation2 + $0x3f]] }
 0x187   :  { %v194_v55 = vpop.permute.xlu0 %193  ;;  %v192_v57 = vpop.permute.xlu1 %191 }
 0x188   :  { %v197_v58 = vmul.f32 %v2018_v51, %v194_v55  ;;  %v195_v60 = vmul.f32 %v192_v57, %v1995_v15  ;;  %v326_v55 = vstv %s325_s16  ;;  %s2103_s16 = sld [smem:[#allocation2 + $0x31]] }
 0x18a   :  { %v198_v63 = vadd.f32 %v197_v58, %v195_v60 }
 0x18b   :  { %v202_v3 = vpop.permute.xlu0 %201  ;;  %v200_v5 = vpop.permute.xlu1 %199 }
 0x18c   :  { %v229_v8 = vmul.f32 %v220_v59, %v198_v63  ;;  %v204_v9 = vmul.f32 %v202_v3, %v2018_v51  ;;  %v203_v10 = vmul.f32 %v200_v5, %v1995_v15  ;;  %v238_v23 = vmul.f32 %v225_v12, %v198_v63 }
 0x18d   :  { %v323_v63 = vstv %s2041_s8  ;;  %s1689_s8 = sld [smem:[#allocation2 + $0x2a]] }
 0x18e   :  { %v205_v13 = vadd.f32 %v204_v9, %v203_v10  ;;  %v230_v18 = vadd.f32 %v229_v8, %v228_v47  ;;  %v2055_v47 = vcvt.s32.f32 %v36_v39  ;;  %v378_v39 = vstv %s377_s4  ;;  %s1700_s4 = sld [smem:[#allocation2 + $0x35]] }
 0x190   :  { %v231_v19 = vmul.f32 %v225_v12, %v205_v13  ;;  %v236_v20 = vmul.f32 %v220_v59, %v205_v13  ;;  %v322_v59 = vmul.f32 %v321_v50, %v2055_v47  ;;  %v327_v0 = vmul.f32 %v326_v55, %v2055_v47 }
 0x192   :  { %v232_v25 = vsub.f32 %v230_v18, %v231_v19  ;;  %v237_v26 = vadd.f32 %v236_v20, %v235_v48  ;;  %v280_v48 = vmul.f32 %v279_v42, %v2025_v61  ;;  %v324_v8 = vadd.f32 %v323_v63, %v322_v59 }
 0x193   :  { %v329_v12 = vadd.f32 %v328_v2, %v327_v0  ;;  %s387_s12 = ssub.f32 %s1691_s9, %s1689_s8 }
 0x194   :  { %250 = vrot.lane.b32.xlu0 %v232_v25, %s1912_s28  ;;  %248 = vrot.lane.b32.xlu1 %v232_v25, %s1913_s2  ;;  %v239_v28 = vadd.f32 %v238_v23, %v237_v26  ;;  %v283_v30 = vmul.f32 %v267_v22, %v232_v25  ;;  %v291_v32 = vmul.f32 %v272_v27, %v232_v25  ;;  %v331_v23 = vstv %s330_s23  ;;  %s439_s23 = ssub.f32 %s1702_s20, %s2103_s16 }
 0x195   :  { %v282_v60 = vadd.f32 %v281_v52, %v280_v48  ;;  %v2078_v25 = vsub.f32 1.0, %v2055_v47  ;;  %v332_v26 = vmul.f32 %v331_v23, %v2055_v47  ;;  %v380_v52 = vstv %s2071_s24  ;;  %s1918_s24 = smov 127   ;;  %s2155_s9 = sld [smem:[#allocation2 + $0x39]] }
 0x196   :  { %v284_v29 = vmul.f32 %v272_v27, %v239_v28  ;;  %v290_v31 = vmul.f32 %v267_v22, %v239_v28  ;;  %v38_v22 = vshra.s32 %v1933_v1, 1  ;;  %s1707_s20 = sld [smem:[#allocation2 + $0x3c]] }
 0x198   :  { %258 = vrot.lane.b32.xlu0 %v239_v28, %s1912_s28  ;;  %256 = vrot.lane.b32.xlu1 %v239_v28, %s1913_s2  ;;  %v285_v33 = vsub.f32 %v283_v30, %v284_v29  ;;  %v292_v34 = vadd.f32 %v291_v32, %v290_v31  ;;  %v39_v27 = vand.u32 1, %v38_v22  ;;  %v333_v28 = vstv %s1681_s19  ;;  %s1701_s19 = sld [smem:[#allocation2 + $0x36]] }
 0x199   :  { %v336_v30 = vstv %s335_s3  ;;  %s2146_s3 = sld [smem:[#allocation2 + $0x33]] }
 0x19a   :  { %v2085_v35 = vcvt.s32.f32 %v39_v27  ;;  %v337_v36 = vmul.f32 %v336_v30, %v2055_v47 }
 0x19c   :  { %v379_v48 = vmul.f32 %v378_v39, %v2085_v35 }
 0x19e   :  { %s434_s22 = ssub.f32 %s1701_s19, %s2101_s13 }
 0x19f   :  { %s1705_s19 = sld [smem:[#allocation2 + $0x3a]] }
 0x206   :  { %v251_v41 = vpop.permute.xlu0 %250  ;;  %v249_v43 = vpop.permute.xlu1 %248 }
 0x207   :  { %v254_v44 = vmul.f32 %v2048_v37, %v251_v41  ;;  %v252_v46 = vmul.f32 %v249_v43, %v2025_v61  ;;  %v383_v43 = vstv %s382_s5  ;;  %s444_s5 = ssub.f32 %s1699_s27, %s2142_s26 }
 0x208   :  { %s2196_s27 = sld [smem:[#allocation2 + $0x41]] }
 0x209   :  { %v255_v49 = vadd.f32 %v254_v44, %v252_v46 }
 0x20a   :  { %v259_v53 = vpop.permute.xlu0 %258  ;;  %v257_v54 = vpop.permute.xlu1 %256 }
 0x20b   :  { %v286_v56 = vmul.f32 %v277_v45, %v255_v49  ;;  %v261_v57 = vmul.f32 %v259_v53, %v2048_v37  ;;  %v260_v58 = vmul.f32 %v257_v54, %v2025_v61  ;;  %v295_v9 = vmul.f32 %v282_v60, %v255_v49 }
 0x20c   :  { %v339_v49 = vadd.f32 %v338_v40, %v337_v36  ;;  %v384_v53 = vmul.f32 %v383_v43, %v2085_v35  ;;  %v385_v54 = vstv %s2073_s25  ;;  %v437_v40 = vstv %s2101_s13  ;;  %s1919_s25 = smov 1  }
 0x20d   :  { %v262_v62 = vadd.f32 %v261_v57, %v260_v58  ;;  %v287_v3 = vadd.f32 %v286_v56, %v285_v33  ;;  %v334_v33 = vadd.f32 %v333_v28, %v332_v26  ;;  %v381_v58 = vadd.f32 %v380_v52, %v379_v48 }
 0x20e   :  { %v386_v63 = vadd.f32 %v385_v54, %v384_v53  ;;  %v435_v28 = vstv %s434_s22  ;;  %s1708_s22 = sld [smem:[#allocation2 + $0x3d]] }
 0x20f   :  { %v288_v5 = vmul.f32 %v282_v60, %v262_v62  ;;  %v293_v6 = vmul.f32 %v277_v45, %v262_v62 }
 0x211   :  { %v289_v10 = vsub.f32 %v287_v3, %v288_v5  ;;  %v294_v11 = vadd.f32 %v293_v6, %v292_v34 }
 0x213   :  { %307 = vrot.lane.b32.xlu0 %v289_v10, %s1914_s17  ;;  %305 = vrot.lane.b32.xlu1 %v289_v10, %s1915_s18  ;;  %v296_v13 = vadd.f32 %v295_v9, %v294_v11  ;;  %v340_v16 = vmul.f32 %v324_v8, %v289_v10  ;;  %v348_v18 = vmul.f32 %v329_v12, %v289_v10  ;;  %v388_v10 = vstv %s387_s12  ;;  %s449_s12 = ssub.f32 %s1700_s4, %s2146_s3 }
 0x214   :  { %v2107_v11 = vsub.f32 1.0, %v2085_v35  ;;  %s1718_s4 = sld [smem:[#allocation2 + $0x47]] }
 0x215   :  { %v341_v14 = vmul.f32 %v329_v12, %v296_v13  ;;  %v347_v17 = vmul.f32 %v324_v8, %v296_v13  ;;  %v389_v12 = vmul.f32 %v388_v10, %v2085_v35 }
 0x217   :  { %315 = vrot.lane.b32.xlu0 %v296_v13, %s1914_s17  ;;  %313 = vrot.lane.b32.xlu1 %v296_v13, %s1915_s18  ;;  %v342_v19 = vsub.f32 %v340_v16, %v341_v14  ;;  %v349_v20 = vadd.f32 %v348_v18, %v347_v17  ;;  %v41_v13 = vand.u32 1, %v1933_v1  ;;  %v390_v14 = vstv %s1689_s8  ;;  %s2151_s8 = sld [smem:[#allocation2 + $0x38]] }
 0x218   :  { %v393_v17 = vstv %s392_s21  ;;  %v395_v1 = vstv %s2099_s10  ;;  %s2157_s10 = sld [smem:[#allocation2 + $0x3e]] }
 0x219   :  { %v2115_v23 = vcvt.s32.f32 %v41_v13  ;;  %v394_v26 = vmul.f32 %v393_v17, %v2085_v35  ;;  %v58_v13 = vmul.f32 2.0, %v2055_v47  ;;  %s1706_s21 = sld [smem:[#allocation2 + $0x3b]] }
 0x21b   :  { %v436_v36 = vmul.f32 %v435_v28, %v2115_v23  ;;  %v59_v17 = vmul.f32 %v58_v13, %v2085_v35  ;;  %v2165_v28 = vsub.f32 1.0, %v2115_v23 }
 0x21e   :  { %s488_s13 = ssub.f32 %s2157_s10, %s2151_s8 }
 0x21f   :  { %s1713_s10 = sld [smem:[#allocation2 + $0x42]] }
 0x285   :  { %v308_v29 = vpop.permute.xlu0 %307  ;;  %v306_v31 = vpop.permute.xlu1 %305 }
 0x286   :  { %v311_v32 = vmul.f32 %v2078_v25, %v308_v29  ;;  %v309_v34 = vmul.f32 %v306_v31, %v2055_v47  ;;  %v440_v31 = vstv %s439_s23  ;;  %s498_s23 = ssub.f32 %s1707_s20, %s1705_s19 }
 0x287   :  { %s2216_s20 = sld [smem:[#allocation2 + $0x49]] }
 0x288   :  { %v312_v38 = vadd.f32 %v311_v32, %v309_v34 }
 0x289   :  { %v316_v41 = vpop.permute.xlu0 %315  ;;  %v314_v42 = vpop.permute.xlu1 %313 }
 0x28a   :  { %v343_v44 = vmul.f32 %v334_v33, %v312_v38  ;;  %v318_v45 = vmul.f32 %v316_v41, %v2078_v25  ;;  %v317_v46 = vmul.f32 %v314_v42, %v2055_v47  ;;  %v352_v59 = vmul.f32 %v339_v49, %v312_v38 }
 0x28b   :  { %v396_v38 = vadd.f32 %v395_v1, %v394_v26  ;;  %v441_v41 = vmul.f32 %v440_v31, %v2115_v23  ;;  %v442_v42 = vstv %s2103_s16  ;;  %v450_v31 = vstv %s449_s12  ;;  %s493_s16 = ssub.f32 %s2159_s11, %s2155_s9 }
 0x28c   :  { %v319_v50 = vadd.f32 %v318_v45, %v317_v46  ;;  %v344_v55 = vadd.f32 %v343_v44, %v342_v19  ;;  %v438_v46 = vadd.f32 %v437_v40, %v436_v36  ;;  %s1715_s11 = sld [smem:[#allocation2 + $0x44]] }
 0x28d   :  { %v443_v52 = vadd.f32 %v442_v42, %v441_v41  ;;  %v451_v41 = vmul.f32 %v450_v31, %v2115_v23  ;;  %s1714_s12 = sld [smem:[#allocation2 + $0x43]] }
 0x28e   :  { %v345_v56 = vmul.f32 %v339_v49, %v319_v50  ;;  %v350_v57 = vmul.f32 %v334_v33, %v319_v50 }
 0x290   :  { %v346_v60 = vsub.f32 %v344_v55, %v345_v56  ;;  %v351_v62 = vadd.f32 %v350_v57, %v349_v20  ;;  %v391_v20 = vadd.f32 %v390_v14, %v389_v12 }
 0x292   :  { %364 = vrot.lane.b32.xlu0 %v346_v60, %s1916_s6  ;;  %362 = vrot.lane.b32.xlu1 %v346_v60, %s1917_s7  ;;  %v353_v0 = vadd.f32 %v352_v59, %v351_v62  ;;  %v397_v3 = vmul.f32 %v381_v58, %v346_v60  ;;  %v405_v6 = vmul.f32 %v386_v63, %v346_v60  ;;  %v43_v60 = vmul.f32 2.0, %v1944_v7 }
 0x293   :  { %v46_v62 = vmul.f32 2.0, %v1959_v21 }
 0x294   :  { %v398_v2 = vmul.f32 %v386_v63, %v353_v0  ;;  %v404_v5 = vmul.f32 %v381_v58, %v353_v0  ;;  %v44_v63 = vmul.f32 %v43_v60, %v1959_v21 }
 0x296   :  { %372 = vrot.lane.b32.xlu0 %v353_v0, %s1916_s6  ;;  %370 = vrot.lane.b32.xlu1 %v353_v0, %s1917_s7  ;;  %v399_v8 = vsub.f32 %v397_v3, %v398_v2  ;;  %v406_v9 = vadd.f32 %v405_v6, %v404_v5  ;;  %v47_v0 = vmul.f32 %v46_v62, %v1995_v15  ;;  %v50_v2 = vmul.f32 2.0, %v1995_v15 }
 0x297   :  { %v45_v3 = vsub.f32 1.0, %v44_v63 }
 0x298   :  { %v48_v5 = vsub.f32 1.0, %v47_v0  ;;  %v51_v6 = vmul.f32 %v50_v2, %v2025_v61 }
 0x29a   :  { %v52_v10 = vsub.f32 1.0, %v51_v6  ;;  %v491_v6 = vstv %s2151_s8 }
 0x304   :  { %v365_v16 = vpop.permute.xlu0 %364  ;;  %v363_v18 = vpop.permute.xlu1 %362 }
 0x305   :  { %v368_v19 = vmul.f32 %v2107_v11, %v365_v16  ;;  %v366_v22 = vmul.f32 %v363_v18, %v2085_v35  ;;  %v62_v18 = vmul.f32 2.0, %v2085_v35 }
 0x307   :  { %v369_v27 = vadd.f32 %v368_v19, %v366_v22  ;;  %v445_v19 = vstv %s444_s5  ;;  %v60_v22 = vsub.f32 1.0, %v59_v17  ;;  %v63_v26 = vmul.f32 %v62_v18, %v2115_v23  ;;  %s503_s5 = ssub.f32 %s1708_s22, %s1706_s21 }
 0x308   :  { %v373_v29 = vpop.permute.xlu0 %372  ;;  %v371_v30 = vpop.permute.xlu1 %370  ;;  %v446_v1 = vmul.f32 %v445_v19, %v2115_v23  ;;  %s1726_s22 = sld [smem:[#allocation2 + $0x4f]] }
 0x309   :  { %v400_v32 = vmul.f32 %v391_v20, %v369_v27  ;;  %v375_v33 = vmul.f32 %v373_v29, %v2107_v11  ;;  %v374_v34 = vmul.f32 %v371_v30, %v2085_v35  ;;  %v409_v48 = vmul.f32 %v396_v38, %v369_v27 }
 0x30a   :  { %v66_v27 = vmul.f32 2.0, %v2115_v23  ;;  %v447_v29 = vstv %s2142_s26  ;;  %s2194_s26 = sld [smem:[#allocation2 + $0x40]] }
 0x30b   :  { %v376_v39 = vadd.f32 %v375_v33, %v374_v34  ;;  %v401_v43 = vadd.f32 %v400_v32, %v399_v8  ;;  %v54_v8 = vmul.f32 2.0, %v2025_v61  ;;  %v64_v34 = vsub.f32 1.0, %v63_v26 }
 0x30c   :  { %v67_v36 = vmul.f32 %v66_v27, %v1944_v7  ;;  %v504_v27 = vstv %s503_s5  ;;  %s1722_s5 = sld [smem:[#allocation2 + $0x4b]] }
 0x30d   :  { %v402_v44 = vmul.f32 %v396_v38, %v376_v39  ;;  %v407_v45 = vmul.f32 %v391_v20, %v376_v39  ;;  %v55_v12 = vmul.f32 %v54_v8, %v2055_v47  ;;  %v448_v39 = vadd.f32 %v447_v29, %v446_v1 }
 0x30e   :  { %v496_v8 = vstv %s2155_s9  ;;  %v501_v1 = vstv %s1705_s19  ;;  %s549_s9 = ssub.f32 %s1718_s4, %s2196_s27  ;;  %v505_v29 = vmul.f32 %v504_v27, %v1944_v7 }
 0x30f   :  { %v403_v49 = vsub.f32 %v401_v43, %v402_v44  ;;  %v408_v50 = vadd.f32 %v407_v45, %v406_v9  ;;  %v49_v9 = vmul.f32 %v48_v5, %v45_v3  ;;  %v56_v16 = vsub.f32 1.0, %v55_v12  ;;  %s2214_s19 = sld [smem:[#allocation2 + $0x48]] }
 0x310   :  { %v452_v43 = vstv %s2146_s3  ;;  %s1717_s3 = sld [smem:[#allocation2 + $0x46]] }
 0x311   :  { %421 = vrot.lane.b32.xlu0 %v403_v49, %s1918_s24  ;;  %419 = vrot.lane.b32.xlu1 %v403_v49, %s1919_s25  ;;  %v410_v53 = vadd.f32 %v409_v48, %v408_v50  ;;  %v2129_v55 = vmul.f32 %v438_v46, %v403_v49  ;;  %v462_v57 = vmul.f32 %v443_v52, %v403_v49  ;;  %v68_v48 = vsub.f32 1.0, %v67_v36  ;;  %s1723_s4 = sld [smem:[#allocation2 + $0x4c]] }
 0x312   :  { %v53_v14 = vmul.f32 %v52_v10, %v49_v9 }
 0x313   :  { %v2127_v54 = vmul.f32 %v443_v52, %v410_v53  ;;  %v461_v56 = vmul.f32 %v438_v46, %v410_v53 }
 0x314   :  { %v57_v20 = vmul.f32 %v56_v16, %v53_v14 }
 0x315   :  { %429 = vrot.lane.b32.xlu0 %v410_v53, %s1918_s24  ;;  %427 = vrot.lane.b32.xlu1 %v410_v53, %s1919_s25  ;;  %v456_v58 = vsub.f32 %v2129_v55, %v2127_v54  ;;  %v2135_v59 = vadd.f32 %v462_v57, %v461_v56  ;;  %v489_v53 = vstv %s488_s13  ;;  %v494_v56 = vstv %s493_s16  ;;  %s1716_s13 = sld [smem:[#allocation2 + $0x45]] }
 0x316   :  { %v61_v33 = vmul.f32 %v60_v22, %v57_v20  ;;  %v453_v57 = vadd.f32 %v452_v43, %v451_v41  ;;  %v490_v63 = vmul.f32 %v489_v53, %v1944_v7  ;;  %v495_v5 = vmul.f32 %v494_v56, %v1944_v7  ;;  %s544_s8 = ssub.f32 %s1717_s3, %s2194_s26 }
 0x317   :  { %s554_s16 = ssub.f32 %s1715_s11, %s1713_s10 }
 0x318   :  { %v65_v46 = vmul.f32 %v64_v34, %v61_v33  ;;  %v492_v14 = vadd.f32 %v491_v6, %v490_v63  ;;  %v497_v16 = vadd.f32 %v496_v8, %v495_v5  ;;  %v545_v36 = vstv %s544_s8  ;;  %s1721_s3 = sld [smem:[#allocation2 + $0x4a]] }
 0x319   :  { %s1724_s8 = sld [smem:[#allocation2 + $0x4d]] }
 0x31a   :  { %v2180_v62 = vmul.f32 %v68_v48, %v65_v46  ;;  %v547_v48 = vstv %s2194_s26  ;;  %s2236_s11 = sld [smem:[#allocation2 + $0x51]] }
 0x383   :  { %v422_v30 = vpop.permute.xlu0 %421  ;;  %v420_v32 = vpop.permute.xlu1 %419 }
 0x384   :  { %v425_v38 = vmul.f32 %v2165_v28, %v422_v30  ;;  %v423_v40 = vmul.f32 %v420_v32, %v2115_v23  ;;  %v506_v30 = vstv %s1706_s21  ;;  %s1725_s21 = sld [smem:[#allocation2 + $0x4e]] }
 0x385   :  { %v507_v43 = vadd.f32 %v506_v30, %v505_v29 }
 0x386   :  { %v426_v42 = vadd.f32 %v425_v38, %v423_v40 }
 0x387   :  { %v430_v44 = vpop.permute.xlu0 %429  ;;  %v428_v45 = vpop.permute.xlu1 %427 }
 0x388   :  { %v457_v49 = vmul.f32 %v448_v39, %v426_v42  ;;  %v432_v50 = vmul.f32 %v430_v44, %v2165_v28  ;;  %v431_v52 = vmul.f32 %v428_v45, %v2115_v23  ;;  %v466_v9 = vmul.f32 %v453_v57, %v426_v42 }
 0x389   :  { %v546_v44 = vmul.f32 %v545_v36, %v1959_v21 }
 0x38a   :  { %v433_v60 = vadd.f32 %v432_v50, %v431_v52  ;;  %v458_v0 = vadd.f32 %v457_v49, %v456_v58  ;;  %v552_v50 = vstv %s2196_s27  ;;  %s600_s26 = ssub.f32 %s1725_s21, %s2214_s19 }
 0x38b   :  { %s605_s27 = ssub.f32 %s1726_s22, %s2216_s20 }
 0x38c   :  { %v459_v2 = vmul.f32 %v453_v57, %v433_v60  ;;  %v464_v3 = vmul.f32 %v448_v39, %v433_v60  ;;  %v550_v39 = vstv %s549_s9  ;;  %v548_v57 = vadd.f32 %v547_v48, %v546_v44  ;;  %s610_s9 = ssub.f32 %s1723_s4, %s1721_s3 }
 0x38d   :  { %v551_v49 = vmul.f32 %v550_v39, %v1959_v21  ;;  %v606_v29 = vstv %s605_s27  ;;  %s1729_s21 = sld [smem:[#allocation2 + $0x52]] }
 0x38e   :  { %v465_v10 = vadd.f32 %v464_v3, %v2135_v59  ;;  %v460_v12 = vsub.f32 %v458_v0, %v459_v2  ;;  %v499_v59 = vstv %s498_s23  ;;  %s559_s23 = ssub.f32 %s1716_s13, %s1714_s12  ;;  %v607_v39 = vmul.f32 %v606_v29, %v1995_v15 }
 0x38f   :  { %v500_v26 = vmul.f32 %v499_v59, %v1944_v7  ;;  %v553_v2 = vadd.f32 %v552_v50, %v551_v49  ;;  %v601_v59 = vstv %s600_s26  ;;  %s1734_s13 = sld [smem:[#allocation2 + $0x57]]  ;;  %v664_v29 = vstv %s2236_s11 }
 0x390   :  { %v468_v13 = vmul.f32 %v460_v12, %v2180_v62  ;;  %v467_v17 = vadd.f32 %v466_v9, %v465_v10  ;;  %s1731_s22 = sld [smem:[#allocation2 + $0x54]] }
 0x391   :  { %v502_v32 = vadd.f32 %v501_v1, %v500_v26  ;;  %v562_v26 = vstv %s1714_s12  ;;  %s1733_s12 = sld [smem:[#allocation2 + $0x56]] }
 0x392   :  { %478 = vrot.lane.b32.xlu1 %v468_v13, %s1907_s0  ;;  %v469_v54 = vmul.f32 %v467_v17, %v2180_v62  ;;  %v508_v55 = vmul.f32 %v492_v14, %v468_v13  ;;  %v516_v58 = vmul.f32 %v497_v16, %v468_v13  ;;  %v555_v13 = vstv %s554_s16  ;;  %s615_s16 = ssub.f32 %s1724_s8, %s1722_s5 }
 0x393   :  { %s1732_s26 = sld [smem:[#allocation2 + $0x55]] }
 0x394   :  { %483 = vrot.lane.b32.xlu0 %v469_v54, %s1907_s0  ;;  %v509_v18 = vmul.f32 %v497_v16, %v469_v54  ;;  %v515_v19 = vmul.f32 %v492_v14, %v469_v54  ;;  %v556_v14 = vmul.f32 %v555_v13, %v1959_v21  ;;  %v557_v16 = vstv %s1713_s10  ;;  %s2234_s10 = sld [smem:[#allocation2 + $0x50]] }
 0x395   :  { %v560_v54 = vstv %s559_s23  ;;  %s1730_s23 = sld [smem:[#allocation2 + $0x53]] }
 0x396   :  { %v510_v20 = vsub.f32 %v508_v55, %v509_v18  ;;  %v517_v22 = vadd.f32 %v516_v58, %v515_v19  ;;  %v558_v18 = vadd.f32 %v557_v16, %v556_v14  ;;  %s666_s27 = ssub.f32 %s1731_s22, %s1729_s21 }
 0x397   :  { %s2256_s4 = sld [smem:[#allocation2 + $0x59]] }
 0x398   :  { %s1742_s8 = sld [smem:[#allocation2 + $0x5f]] }
 0x399   :  { %s2276_s22 = sld [smem:[#allocation2 + $0x61]] }
 0x404   :  { %v479_v31 = vpop.permute.xlu1 %478 }
 0x405   :  { %v480_v33 = vmul.f32 %v479_v31, %v1944_v7  ;;  %v481_v34 = vmul.f32 %v479_v31, %v1963_v24 }
 0x406   :  { %v484_v38 = vpop.permute.xlu0 %483 }
 0x407   :  { %v482_v40 = vadd.f32 %v481_v34, %v480_v33  ;;  %v485_v41 = vmul.f32 %v484_v38, %v1944_v7  ;;  %v486_v42 = vmul.f32 %v484_v38, %v1963_v24  ;;  %v602_v33 = vmul.f32 %v601_v59, %v1995_v15 }
 0x408   :  { %v603_v38 = vstv %s2214_s19  ;;  %s656_s19 = ssub.f32 %s1733_s12, %s2234_s10 }
 0x409   :  { %v511_v45 = vmul.f32 %v502_v32, %v482_v40  ;;  %v487_v46 = vadd.f32 %v486_v42, %v485_v41  ;;  %v520_v60 = vmul.f32 %v507_v43, %v482_v40  ;;  %v608_v40 = vstv %s2216_s20  ;;  %s661_s20 = ssub.f32 %s1734_s13, %s2236_s11 }
 0x40a   :  { %v604_v44 = vadd.f32 %v603_v38, %v602_v33  ;;  %v609_v49 = vadd.f32 %v608_v40, %v607_v39  ;;  %v657_v16 = vstv %s656_s19  ;;  %s717_s11 = ssub.f32 %s1742_s8, %s2256_s4 }
 0x40b   :  { %v512_v52 = vadd.f32 %v511_v45, %v510_v20  ;;  %v513_v53 = vmul.f32 %v507_v43, %v487_v46  ;;  %v518_v56 = vmul.f32 %v502_v32, %v487_v46  ;;  %v561_v20 = vmul.f32 %v560_v54, %v1959_v21  ;;  %s1737_s12 = sld [smem:[#allocation2 + $0x5a]] }
 0x40c   :  { %s1739_s13 = sld [smem:[#allocation2 + $0x5c]] }
 0x40d   :  { %v519_v63 = vadd.f32 %v518_v56, %v517_v22  ;;  %v514_v0 = vsub.f32 %v512_v52, %v513_v53  ;;  %v563_v34 = vadd.f32 %v562_v26, %v561_v20  ;;  %s1740_s19 = sld [smem:[#allocation2 + $0x5d]] }
 0x40e   :  { %s1747_s8 = sld [smem:[#allocation2 + $0x64]] }
 0x40f   :  { %532 = vrot.lane.b32.xlu0 %v514_v0, %s1908_s29  ;;  %530 = vrot.lane.b32.xlu1 %v514_v0, %s1909_s30  ;;  %v521_v3 = vadd.f32 %v520_v60, %v519_v63  ;;  %v564_v6 = vmul.f32 %v548_v57, %v514_v0  ;;  %v572_v9 = vmul.f32 %v553_v2, %v514_v0  ;;  %v611_v0 = vstv %s610_s9  ;;  %s671_s9 = ssub.f32 %s1732_s26, %s1730_s23 }
 0x410   :  { %s1750_s26 = sld [smem:[#allocation2 + $0x67]] }
 0x411   :  { %v565_v5 = vmul.f32 %v553_v2, %v521_v3  ;;  %v571_v8 = vmul.f32 %v548_v57, %v521_v3  ;;  %v612_v2 = vmul.f32 %v611_v0, %v1995_v15 }
 0x413   :  { %539 = vrot.lane.b32.xlu0 %v521_v3, %s1908_s29  ;;  %537 = vrot.lane.b32.xlu1 %v521_v3, %s1909_s30  ;;  %v566_v10 = vsub.f32 %v564_v6, %v565_v5  ;;  %v573_v12 = vadd.f32 %v572_v9, %v571_v8  ;;  %v613_v3 = vstv %s1721_s3  ;;  %v616_v6 = vstv %s615_s16  ;;  %s2254_s3 = sld [smem:[#allocation2 + $0x58]] }
 0x414   :  { %v617_v13 = vmul.f32 %v616_v6, %v1995_v15  ;;  %s1738_s16 = sld [smem:[#allocation2 + $0x5b]] }
 0x481   :  { %v533_v17 = vpop.permute.xlu0 %532  ;;  %v531_v55 = vpop.permute.xlu1 %530 }
 0x482   :  { %v535_v58 = vmul.f32 %v533_v17, %v1988_v4  ;;  %v534_v19 = vmul.f32 %v531_v55, %v1959_v21  ;;  %v618_v17 = vstv %s1722_s5  ;;  %s1741_s5 = sld [smem:[#allocation2 + $0x5e]] }
 0x483   :  { %v619_v59 = vadd.f32 %v618_v17, %v617_v13 }
 0x484   :  { %v536_v22 = vadd.f32 %v535_v58, %v534_v19  ;;  %v662_v58 = vstv %s661_s20  ;;  %s722_s20 = ssub.f32 %s1739_s13, %s1737_s12 }
 0x485   :  { %v540_v27 = vpop.permute.xlu0 %539  ;;  %v538_v1 = vpop.permute.xlu1 %537  ;;  %s2296_s13 = sld [smem:[#allocation2 + $0x69]] }
 0x486   :  { %v567_v30 = vmul.f32 %v558_v18, %v536_v22  ;;  %v542_v31 = vmul.f32 %v540_v27, %v1988_v4  ;;  %v541_v32 = vmul.f32 %v538_v1, %v1959_v21  ;;  %v576_v45 = vmul.f32 %v563_v34, %v536_v22 }
 0x487   :  { %v658_v22 = vmul.f32 %v657_v16, %v2025_v61  ;;  %v659_v27 = vstv %s2234_s10  ;;  %v663_v1 = vmul.f32 %v662_v58, %v2025_v61  ;;  %v720_v58 = vstv %s2256_s4  ;;  %s773_s4 = ssub.f32 %s1750_s26, %s2276_s22 }
 0x488   :  { %v543_v36 = vadd.f32 %v542_v31, %v541_v32  ;;  %v568_v41 = vadd.f32 %v567_v30, %v566_v10  ;;  %v614_v10 = vadd.f32 %v613_v3, %v612_v2  ;;  %s712_s10 = ssub.f32 %s1741_s5, %s2254_s3 }
 0x489   :  { %v660_v33 = vadd.f32 %v659_v27, %v658_v22  ;;  %v665_v39 = vadd.f32 %v664_v29, %v663_v1  ;;  %s1745_s5 = sld [smem:[#allocation2 + $0x62]] }
 0x48a   :  { %v569_v42 = vmul.f32 %v563_v34, %v543_v36  ;;  %v574_v43 = vmul.f32 %v558_v18, %v543_v36  ;;  %v713_v3 = vstv %s712_s10  ;;  %s1748_s10 = sld [smem:[#allocation2 + $0x65]] }
 0x48b   :  { %s1755_s26 = sld [smem:[#allocation2 + $0x6c]] }
 0x48c   :  { %v570_v46 = vsub.f32 %v568_v41, %v569_v42  ;;  %v575_v48 = vadd.f32 %v574_v43, %v573_v12 }
 0x48e   :  { %588 = vrot.lane.b32.xlu0 %v570_v46, %s1910_s14  ;;  %586 = vrot.lane.b32.xlu1 %v570_v46, %s1911_s15  ;;  %v577_v50 = vadd.f32 %v576_v45, %v575_v48  ;;  %v620_v53 = vmul.f32 %v604_v44, %v570_v46  ;;  %v628_v57 = vmul.f32 %v609_v49, %v570_v46  ;;  %v667_v48 = vstv %s666_s27  ;;  %s727_s27 = ssub.f32 %s1740_s19, %s1738_s16 }
 0x48f   :  { %s1758_s19 = sld [smem:[#allocation2 + $0x6f]] }
 0x490   :  { %v621_v52 = vmul.f32 %v609_v49, %v577_v50  ;;  %v627_v56 = vmul.f32 %v604_v44, %v577_v50  ;;  %v668_v49 = vmul.f32 %v667_v48, %v2025_v61 }
 0x492   :  { %595 = vrot.lane.b32.xlu0 %v577_v50, %s1910_s14  ;;  %593 = vrot.lane.b32.xlu1 %v577_v50, %s1911_s15  ;;  %v622_v60 = vsub.f32 %v620_v53, %v621_v52  ;;  %v629_v63 = vadd.f32 %v628_v57, %v627_v56  ;;  %v669_v50 = vstv %s1729_s21  ;;  %v672_v53 = vstv %s671_s9  ;;  %s2274_s21 = sld [smem:[#allocation2 + $0x60]] }
 0x493   :  { %v673_v0 = vmul.f32 %v672_v53, %v2025_v61  ;;  %s1746_s9 = sld [smem:[#allocation2 + $0x63]] }
 0x500   :  { %v589_v5 = vpop.permute.xlu0 %588  ;;  %v587_v8 = vpop.permute.xlu1 %586 }
 0x501   :  { %v591_v9 = vmul.f32 %v589_v5, %v2018_v51  ;;  %v590_v12 = vmul.f32 %v587_v8, %v1995_v15  ;;  %v674_v5 = vstv %s1730_s23  ;;  %s1749_s23 = sld [smem:[#allocation2 + $0x66]] }
 0x502   :  { %v675_v16 = vadd.f32 %v674_v5, %v673_v0 }
 0x503   :  { %v592_v14 = vadd.f32 %v591_v9, %v590_v12  ;;  %v718_v9 = vstv %s717_s11  ;;  %s778_s11 = ssub.f32 %s1747_s8, %s1745_s5 }
 0x504   :  { %v596_v54 = vpop.permute.xlu0 %595  ;;  %v594_v55 = vpop.permute.xlu1 %593  ;;  %s2316_s8 = sld [smem:[#allocation2 + $0x71]] }
 0x505   :  { %v623_v18 = vmul.f32 %v614_v10, %v592_v14  ;;  %v598_v19 = vmul.f32 %v596_v54, %v2018_v51  ;;  %v597_v20 = vmul.f32 %v594_v55, %v1995_v15  ;;  %v632_v34 = vmul.f32 %v619_v59, %v592_v14 }
 0x506   :  { %v714_v14 = vmul.f32 %v713_v3, %v2055_v47  ;;  %v715_v54 = vstv %s2254_s3  ;;  %v719_v55 = vmul.f32 %v718_v9, %v2055_v47  ;;  %v776_v9 = vstv %s2276_s22  ;;  %s829_s22 = ssub.f32 %s1758_s19, %s2296_s13 }
 0x507   :  { %v599_v26 = vadd.f32 %v598_v19, %v597_v20  ;;  %v624_v30 = vadd.f32 %v623_v18, %v622_v60  ;;  %v670_v60 = vadd.f32 %v669_v50, %v668_v49  ;;  %s768_s3 = ssub.f32 %s1749_s23, %s2274_s21 }
 0x508   :  { %v716_v22 = vadd.f32 %v715_v54, %v714_v14  ;;  %v721_v1 = vadd.f32 %v720_v58, %v719_v55  ;;  %s1753_s23 = sld [smem:[#allocation2 + $0x6a]] }
 0x509   :  { %v625_v31 = vmul.f32 %v619_v59, %v599_v26  ;;  %v630_v32 = vmul.f32 %v614_v10, %v599_v26  ;;  %v769_v50 = vstv %s768_s3  ;;  %s1756_s3 = sld [smem:[#allocation2 + $0x6d]] }
 0x50a   :  { %s1763_s19 = sld [smem:[#allocation2 + $0x74]] }
 0x50b   :  { %v626_v36 = vsub.f32 %v624_v30, %v625_v31  ;;  %v631_v38 = vadd.f32 %v630_v32, %v629_v63 }
 0x50d   :  { %644 = vrot.lane.b32.xlu0 %v626_v36, %s1912_s28  ;;  %642 = vrot.lane.b32.xlu1 %v626_v36, %s1913_s2  ;;  %v633_v40 = vadd.f32 %v632_v34, %v631_v38  ;;  %v676_v42 = vmul.f32 %v660_v33, %v626_v36  ;;  %v684_v44 = vmul.f32 %v665_v39, %v626_v36  ;;  %v723_v38 = vstv %s722_s20  ;;  %s783_s20 = ssub.f32 %s1748_s10, %s1746_s9 }
 0x50e   :  { %s1766_s10 = sld [smem:[#allocation2 + $0x77]] }
 0x50f   :  { %v677_v41 = vmul.f32 %v665_v39, %v633_v40  ;;  %v683_v43 = vmul.f32 %v660_v33, %v633_v40  ;;  %v724_v39 = vmul.f32 %v723_v38, %v2055_v47 }
 0x511   :  { %651 = vrot.lane.b32.xlu0 %v633_v40, %s1912_s28  ;;  %649 = vrot.lane.b32.xlu1 %v633_v40, %s1913_s2  ;;  %v678_v45 = vsub.f32 %v676_v42, %v677_v41  ;;  %v685_v46 = vadd.f32 %v684_v44, %v683_v43  ;;  %v725_v40 = vstv %s1737_s12  ;;  %v728_v42 = vstv %s727_s27  ;;  %s2294_s12 = sld [smem:[#allocation2 + $0x68]] }
 0x512   :  { %v729_v48 = vmul.f32 %v728_v42, %v2055_v47  ;;  %s1754_s27 = sld [smem:[#allocation2 + $0x6b]] }
 0x57f   :  { %v645_v52 = vpop.permute.xlu0 %644  ;;  %v643_v56 = vpop.permute.xlu1 %642 }
 0x580   :  { %v647_v57 = vmul.f32 %v645_v52, %v2048_v37  ;;  %v646_v63 = vmul.f32 %v643_v56, %v2025_v61  ;;  %v730_v52 = vstv %s1738_s16  ;;  %s1757_s16 = sld [smem:[#allocation2 + $0x6e]] }
 0x581   :  { %v731_v3 = vadd.f32 %v730_v52, %v729_v48 }
 0x582   :  { %v648_v2 = vadd.f32 %v647_v57, %v646_v63  ;;  %v774_v57 = vstv %s773_s4  ;;  %s834_s4 = ssub.f32 %s1755_s26, %s1753_s23 }
 0x583   :  { %v652_v6 = vpop.permute.xlu0 %651  ;;  %v650_v8 = vpop.permute.xlu1 %649  ;;  %s2336_s26 = sld [smem:[#allocation2 + $0x79]] }
 0x584   :  { %v679_v10 = vmul.f32 %v670_v60, %v648_v2  ;;  %v654_v12 = vmul.f32 %v652_v6, %v2048_v37  ;;  %v653_v13 = vmul.f32 %v650_v8, %v2025_v61  ;;  %v688_v59 = vmul.f32 %v675_v16, %v648_v2 }
 0x585   :  { %v770_v2 = vmul.f32 %v769_v50, %v2085_v35  ;;  %v771_v6 = vstv %s2274_s21  ;;  %v775_v8 = vmul.f32 %v774_v57, %v2085_v35  ;;  %v832_v57 = vstv %s2296_s13  ;;  %s883_s13 = ssub.f32 %s1766_s10, %s2316_s8 }
 0x586   :  { %v655_v17 = vadd.f32 %v654_v12, %v653_v13  ;;  %v680_v18 = vadd.f32 %v679_v10, %v678_v45  ;;  %v726_v45 = vadd.f32 %v725_v40, %v724_v39  ;;  %s824_s21 = ssub.f32 %s1757_s16, %s2294_s12 }
 0x587   :  { %v772_v14 = vadd.f32 %v771_v6, %v770_v2  ;;  %v777_v55 = vadd.f32 %v776_v9, %v775_v8  ;;  %s1761_s16 = sld [smem:[#allocation2 + $0x72]] }
 0x588   :  { %v681_v19 = vmul.f32 %v675_v16, %v655_v17  ;;  %v686_v20 = vmul.f32 %v670_v60, %v655_v17  ;;  %v825_v40 = vstv %s824_s21  ;;  %s1764_s21 = sld [smem:[#allocation2 + $0x75]] }
 0x589   :  { %s1771_s10 = sld [smem:[#allocation2 + $0x7c]] }
 0x58a   :  { %v682_v26 = vsub.f32 %v680_v18, %v681_v19  ;;  %v687_v27 = vadd.f32 %v686_v20, %v685_v46 }
 0x58c   :  { %700 = vrot.lane.b32.xlu0 %v682_v26, %s1914_s17  ;;  %698 = vrot.lane.b32.xlu1 %v682_v26, %s1915_s18  ;;  %v689_v29 = vadd.f32 %v688_v59, %v687_v27  ;;  %v732_v31 = vmul.f32 %v716_v22, %v682_v26  ;;  %v740_v33 = vmul.f32 %v721_v1, %v682_v26  ;;  %v779_v27 = vstv %s778_s11  ;;  %s839_s11 = ssub.f32 %s1756_s3, %s1754_s27 }
 0x58d   :  { %s1774_s3 = sld [smem:[#allocation2 + $0x7f]] }
 0x58e   :  { %v733_v30 = vmul.f32 %v721_v1, %v689_v29  ;;  %v739_v32 = vmul.f32 %v716_v22, %v689_v29  ;;  %v780_v1 = vmul.f32 %v779_v27, %v2085_v35 }
 0x590   :  { %707 = vrot.lane.b32.xlu0 %v689_v29, %s1914_s17  ;;  %705 = vrot.lane.b32.xlu1 %v689_v29, %s1915_s18  ;;  %v734_v34 = vsub.f32 %v732_v31, %v733_v30  ;;  %v741_v36 = vadd.f32 %v740_v33, %v739_v32  ;;  %v781_v29 = vstv %s1745_s5  ;;  %v784_v31 = vstv %s783_s20  ;;  %s2314_s5 = sld [smem:[#allocation2 + $0x70]] }
 0x591   :  { %v785_v38 = vmul.f32 %v784_v31, %v2085_v35  ;;  %s1762_s20 = sld [smem:[#allocation2 + $0x73]] }
 0x5fe   :  { %v701_v41 = vpop.permute.xlu0 %700  ;;  %v699_v43 = vpop.permute.xlu1 %698 }
 0x5ff   :  { %v703_v44 = vmul.f32 %v701_v41, %v2078_v25  ;;  %v702_v46 = vmul.f32 %v699_v43, %v2055_v47  ;;  %v786_v41 = vstv %s1746_s9  ;;  %s1765_s9 = sld [smem:[#allocation2 + $0x76]] }
 0x600   :  { %v787_v50 = vadd.f32 %v786_v41, %v785_v38  ;;  %v884_v38 = vstv %s883_s13 }
 0x601   :  { %v704_v49 = vadd.f32 %v703_v44, %v702_v46  ;;  %v830_v44 = vstv %s829_s22  ;;  %s888_s22 = ssub.f32 %s1763_s19, %s1761_s16 }
 0x602   :  { %v708_v53 = vpop.permute.xlu0 %707  ;;  %v706_v56 = vpop.permute.xlu1 %705  ;;  %s2356_s19 = sld [smem:[#allocation2 + $0x81]] }
 0x603   :  { %v735_v60 = vmul.f32 %v726_v45, %v704_v49  ;;  %v710_v63 = vmul.f32 %v708_v53, %v2078_v25  ;;  %v709_v0 = vmul.f32 %v706_v56, %v2055_v47  ;;  %v744_v16 = vmul.f32 %v731_v3, %v704_v49 }
 0x604   :  { %v826_v49 = vmul.f32 %v825_v40, %v2115_v23  ;;  %v827_v53 = vstv %s2294_s12  ;;  %v831_v56 = vmul.f32 %v830_v44, %v2115_v23 }
 0x605   :  { %v711_v5 = vadd.f32 %v710_v63, %v709_v0  ;;  %v736_v10 = vadd.f32 %v735_v60, %v734_v34  ;;  %v782_v34 = vadd.f32 %v781_v29, %v780_v1  ;;  %s878_s12 = ssub.f32 %s1765_s9, %s2314_s5  ;;  %v842_v29 = vstv %s1754_s27 }
 0x606   :  { %v828_v2 = vadd.f32 %v827_v53, %v826_v49  ;;  %v833_v8 = vadd.f32 %v832_v57, %v831_v56  ;;  %s1773_s27 = sld [smem:[#allocation2 + $0x7e]] }
 0x607   :  { %v737_v12 = vmul.f32 %v731_v3, %v711_v5  ;;  %v742_v13 = vmul.f32 %v726_v45, %v711_v5  ;;  %s1769_s9 = sld [smem:[#allocation2 + $0x7a]] }
 0x609   :  { %v738_v17 = vsub.f32 %v736_v10, %v737_v12  ;;  %v743_v54 = vadd.f32 %v742_v13, %v741_v36 }
 0x60b   :  { %756 = vrot.lane.b32.xlu0 %v738_v17, %s1916_s6  ;;  %754 = vrot.lane.b32.xlu1 %v738_v17, %s1917_s7  ;;  %v745_v58 = vadd.f32 %v744_v16, %v743_v54  ;;  %v788_v19 = vmul.f32 %v772_v14, %v738_v17  ;;  %v796_v22 = vmul.f32 %v777_v55, %v738_v17  ;;  %v835_v54 = vstv %s834_s4  ;;  %s893_s4 = ssub.f32 %s1764_s21, %s1762_s20 }
 0x60c   :  { %s1782_s21 = sld [smem:[#allocation2 + $0x87]] }
 0x60d   :  { %v789_v18 = vmul.f32 %v777_v55, %v745_v58  ;;  %v795_v20 = vmul.f32 %v772_v14, %v745_v58  ;;  %v836_v55 = vmul.f32 %v835_v54, %v2115_v23  ;;  %s944_s13 = ssub.f32 %s1771_s10, %s1769_s9 }
 0x60e   :  { %s2376_s10 = sld [smem:[#allocation2 + $0x89]] }
 0x60f   :  { %763 = vrot.lane.b32.xlu0 %v745_v58, %s1916_s6  ;;  %761 = vrot.lane.b32.xlu1 %v745_v58, %s1917_s7  ;;  %v790_v59 = vsub.f32 %v788_v19, %v789_v18  ;;  %v797_v26 = vadd.f32 %v796_v22, %v795_v20  ;;  %v837_v58 = vstv %s1753_s23  ;;  %v840_v19 = vstv %s839_s11  ;;  %s2334_s23 = sld [smem:[#allocation2 + $0x78]] }
 0x610   :  { %v841_v27 = vmul.f32 %v840_v19, %v2115_v23  ;;  %s1770_s11 = sld [smem:[#allocation2 + $0x7b]] }
 0x67d   :  { %v757_v30 = vpop.permute.xlu0 %756  ;;  %v755_v32 = vpop.permute.xlu1 %754 }
 0x67e   :  { %v759_v33 = vmul.f32 %v757_v30, %v2107_v11  ;;  %v758_v36 = vmul.f32 %v755_v32, %v2085_v35 }
 0x680   :  { %v760_v39 = vadd.f32 %v759_v33, %v758_v36  ;;  %v879_v36 = vstv %s878_s12  ;;  %s1772_s12 = sld [smem:[#allocation2 + $0x7d]] }
 0x681   :  { %v764_v42 = vpop.permute.xlu0 %763  ;;  %v762_v43 = vpop.permute.xlu1 %761  ;;  %v880_v41 = vmul.f32 %v879_v36, %v1944_v7 }
 0x682   :  { %v791_v45 = vmul.f32 %v782_v34, %v760_v39  ;;  %v766_v46 = vmul.f32 %v764_v42, %v2107_v11  ;;  %v765_v48 = vmul.f32 %v762_v43, %v2085_v35  ;;  %v800_v3 = vmul.f32 %v787_v50, %v760_v39 }
 0x683   :  { %v843_v39 = vadd.f32 %v842_v29, %v841_v27 }
 0x684   :  { %v767_v52 = vadd.f32 %v766_v46, %v765_v48  ;;  %v792_v60 = vadd.f32 %v791_v45, %v790_v59  ;;  %v838_v59 = vadd.f32 %v837_v58, %v836_v55  ;;  %v885_v45 = vmul.f32 %v884_v38, %v1944_v7 }
 0x685   :  { %v881_v46 = vstv %s2314_s5  ;;  %v886_v48 = vstv %s2316_s8  ;;  %s934_s5 = ssub.f32 %s1773_s27, %s2334_s23 }
 0x686   :  { %v793_v63 = vmul.f32 %v787_v50, %v767_v52  ;;  %v798_v0 = vmul.f32 %v782_v34, %v767_v52  ;;  %v882_v56 = vadd.f32 %v881_v46, %v880_v41  ;;  %v887_v57 = vadd.f32 %v886_v48, %v885_v45  ;;  %s939_s8 = ssub.f32 %s1774_s3, %s2336_s26 }
 0x687   :  { %s1777_s27 = sld [smem:[#allocation2 + $0x82]] }
 0x688   :  { %v794_v5 = vsub.f32 %v792_v60, %v793_v63  ;;  %v799_v6 = vadd.f32 %v798_v0, %v797_v26  ;;  %s1779_s3 = sld [smem:[#allocation2 + $0x84]] }
 0x68a   :  { %812 = vrot.lane.b32.xlu0 %v794_v5, %s1918_s24  ;;  %810 = vrot.lane.b32.xlu1 %v794_v5, %s1919_s25  ;;  %v801_v9 = vadd.f32 %v800_v3, %v799_v6  ;;  %v844_v12 = vmul.f32 %v828_v2, %v794_v5  ;;  %v852_v14 = vmul.f32 %v833_v8, %v794_v5 }
 0x68c   :  { %v845_v10 = vmul.f32 %v833_v8, %v801_v9  ;;  %v851_v13 = vmul.f32 %v828_v2, %v801_v9 }
 0x68e   :  { %819 = vrot.lane.b32.xlu0 %v801_v9, %s1918_s24  ;;  %817 = vrot.lane.b32.xlu1 %v801_v9, %s1919_s25  ;;  %v846_v16 = vsub.f32 %v844_v12, %v845_v10  ;;  %v853_v17 = vadd.f32 %v852_v14, %v851_v13  ;;  %v889_v9 = vstv %s888_s22  ;;  %v894_v12 = vstv %s893_s4  ;;  %s949_s22 = ssub.f32 %s1772_s12, %s1770_s11 }
 0x68f   :  { %v890_v10 = vmul.f32 %v889_v9, %v1944_v7  ;;  %v891_v13 = vstv %s1761_s16  ;;  %v895_v14 = vmul.f32 %v894_v12, %v1944_v7  ;;  %s2354_s16 = sld [smem:[#allocation2 + $0x80]] }
 0x690   :  { %s1778_s4 = sld [smem:[#allocation2 + $0x83]] }
 0x691   :  { %v892_v54 = vadd.f32 %v891_v13, %v890_v10  ;;  %v952_v10 = vstv %s1770_s11  ;;  %s1789_s11 = sld [smem:[#allocation2 + $0x8e]] }
 0x692   :  { %s1790_s12 = sld [smem:[#allocation2 + $0x8f]] }
 0x6fc   :  { %v813_v18 = vpop.permute.xlu0 %812  ;;  %v811_v20 = vpop.permute.xlu1 %810 }
 0x6fd   :  { %v815_v22 = vmul.f32 %v813_v18, %v2165_v28  ;;  %v814_v26 = vmul.f32 %v811_v20, %v2115_v23  ;;  %v935_v18 = vstv %s934_s5  ;;  %v940_v20 = vstv %s939_s8  ;;  %s1780_s5 = sld [smem:[#allocation2 + $0x85]] }
 0x6fe   :  { %s1000_s8 = ssub.f32 %s1779_s3, %s1777_s27 }
 0x6ff   :  { %v816_v1 = vadd.f32 %v815_v22, %v814_v26  ;;  %s2396_s3 = sld [smem:[#allocation2 + $0x91]] }
 0x700   :  { %v820_v30 = vpop.permute.xlu0 %819  ;;  %v818_v31 = vpop.permute.xlu1 %817 }
 0x701   :  { %v847_v32 = vmul.f32 %v838_v59, %v816_v1  ;;  %v822_v33 = vmul.f32 %v820_v30, %v2165_v28  ;;  %v821_v34 = vmul.f32 %v818_v31, %v2115_v23  ;;  %v856_v49 = vmul.f32 %v843_v39, %v816_v1 }
 0x702   :  { %v936_v1 = vmul.f32 %v935_v18, %v1959_v21  ;;  %v937_v31 = vstv %s2334_s23 }
 0x703   :  { %v823_v40 = vadd.f32 %v822_v33, %v821_v34  ;;  %v848_v42 = vadd.f32 %v847_v32, %v846_v16  ;;  %v896_v16 = vstv %s1762_s20  ;;  %v941_v32 = vmul.f32 %v940_v20, %v1959_v21  ;;  %s1781_s20 = sld [smem:[#allocation2 + $0x86]] }
 0x704   :  { %v897_v27 = vadd.f32 %v896_v16, %v895_v14  ;;  %v942_v33 = vstv %s2336_s26  ;;  %s995_s26 = ssub.f32 %s1782_s21, %s2356_s19 }
 0x705   :  { %v849_v43 = vmul.f32 %v843_v39, %v823_v40  ;;  %v854_v44 = vmul.f32 %v838_v59, %v823_v40  ;;  %v938_v39 = vadd.f32 %v937_v31, %v936_v1  ;;  %s1787_s21 = sld [smem:[#allocation2 + $0x8c]] }
 0x706   :  { %v996_v14 = vstv %s995_s26 }
 0x707   :  { %v855_v50 = vadd.f32 %v854_v44, %v853_v17  ;;  %v850_v52 = vsub.f32 %v848_v42, %v849_v43  ;;  %v943_v43 = vadd.f32 %v942_v33, %v941_v32  ;;  %v997_v20 = vmul.f32 %v996_v14, %v1995_v15 }
 0x708   :  { %v1054_v14 = vstv %s2376_s10 }
 0x709   :  { %v858_v53 = vmul.f32 %v850_v52, %v2180_v62  ;;  %v857_v60 = vadd.f32 %v856_v49, %v855_v50  ;;  %s990_s23 = ssub.f32 %s1781_s20, %s2354_s16 }
 0x70a   :  { %s1785_s20 = sld [smem:[#allocation2 + $0x8a]] }
 0x70b   :  { %868 = vrot.lane.b32.xlu1 %v858_v53, %s1907_s0  ;;  %v859_v63 = vmul.f32 %v857_v60, %v2180_v62  ;;  %v898_v0 = vmul.f32 %v882_v56, %v858_v53  ;;  %v906_v2 = vmul.f32 %v887_v57, %v858_v53  ;;  %v945_v53 = vstv %s944_s13  ;;  %s1005_s13 = ssub.f32 %s1780_s5, %s1778_s4 }
 0x70c   :  { %v991_v9 = vstv %s990_s23  ;;  %s1788_s23 = sld [smem:[#allocation2 + $0x8d]] }
 0x70d   :  { %873 = vrot.lane.b32.xlu0 %v859_v63, %s1907_s0  ;;  %v899_v3 = vmul.f32 %v887_v57, %v859_v63  ;;  %v905_v5 = vmul.f32 %v882_v56, %v859_v63  ;;  %v946_v56 = vmul.f32 %v945_v53, %v1959_v21  ;;  %v947_v57 = vstv %s1769_s9  ;;  %s2374_s9 = sld [smem:[#allocation2 + $0x88]] }
 0x70e   :  { %v950_v63 = vstv %s949_s22  ;;  %s1786_s22 = sld [smem:[#allocation2 + $0x8b]] }
 0x70f   :  { %v900_v6 = vsub.f32 %v898_v0, %v899_v3  ;;  %v907_v8 = vadd.f32 %v906_v2, %v905_v5  ;;  %v948_v3 = vadd.f32 %v947_v57, %v946_v56  ;;  %s1798_s5 = sld [smem:[#allocation2 + $0x97]] }
 0x710   :  { %s1056_s26 = ssub.f32 %s1787_s21, %s1785_s20 }
 0x711   :  { %s2416_s21 = sld [smem:[#allocation2 + $0x99]] }
 0x77d   :  { %v869_v17 = vpop.permute.xlu1 %868 }
 0x77e   :  { %v870_v55 = vmul.f32 %v869_v17, %v1944_v7  ;;  %v871_v58 = vmul.f32 %v869_v17, %v1963_v24 }
 0x77f   :  { %v874_v19 = vpop.permute.xlu0 %873 }
 0x780   :  { %v872_v22 = vadd.f32 %v871_v58, %v870_v55  ;;  %v875_v59 = vmul.f32 %v874_v19, %v1944_v7  ;;  %v876_v26 = vmul.f32 %v874_v19, %v1963_v24  ;;  %v992_v55 = vmul.f32 %v991_v9, %v1995_v15 }
 0x781   :  { %v993_v19 = vstv %s2354_s16  ;;  %s1046_s16 = ssub.f32 %s1789_s11, %s2374_s9 }
 0x782   :  { %v901_v29 = vmul.f32 %v892_v54, %v872_v22  ;;  %v877_v30 = vadd.f32 %v876_v26, %v875_v59  ;;  %v910_v40 = vmul.f32 %v897_v27, %v872_v22  ;;  %v998_v22 = vstv %s2356_s19  ;;  %s1051_s19 = ssub.f32 %s1790_s12, %s2376_s10 }
 0x783   :  { %v994_v1 = vadd.f32 %v993_v19, %v992_v55  ;;  %v999_v32 = vadd.f32 %v998_v22, %v997_v20  ;;  %v1047_v57 = vstv %s1046_s16  ;;  %s1107_s10 = ssub.f32 %s1798_s5, %s2396_s3 }
 0x784   :  { %v902_v34 = vadd.f32 %v901_v29, %v900_v6  ;;  %v903_v36 = vmul.f32 %v897_v27, %v877_v30  ;;  %v908_v38 = vmul.f32 %v892_v54, %v877_v30  ;;  %v951_v6 = vmul.f32 %v950_v63, %v1959_v21  ;;  %s1793_s11 = sld [smem:[#allocation2 + $0x92]] }
 0x785   :  { %s1795_s12 = sld [smem:[#allocation2 + $0x94]] }
 0x786   :  { %v909_v41 = vadd.f32 %v908_v38, %v907_v8  ;;  %v904_v42 = vsub.f32 %v902_v34, %v903_v36  ;;  %v953_v58 = vadd.f32 %v952_v10, %v951_v6  ;;  %s1796_s16 = sld [smem:[#allocation2 + $0x95]] }
 0x787   :  { %s1803_s5 = sld [smem:[#allocation2 + $0x9c]] }
 0x788   :  { %922 = vrot.lane.b32.xlu0 %v904_v42, %s1908_s29  ;;  %920 = vrot.lane.b32.xlu1 %v904_v42, %s1909_s30  ;;  %v911_v44 = vadd.f32 %v910_v40, %v909_v41  ;;  %v954_v46 = vmul.f32 %v938_v39, %v904_v42  ;;  %v962_v49 = vmul.f32 %v943_v43, %v904_v42  ;;  %v1001_v42 = vstv %s1000_s8  ;;  %s1061_s8 = ssub.f32 %s1788_s23, %s1786_s22 }
 0x789   :  { %s1806_s23 = sld [smem:[#allocation2 + $0x9f]] }
 0x78a   :  { %v955_v45 = vmul.f32 %v943_v43, %v911_v44  ;;  %v961_v48 = vmul.f32 %v938_v39, %v911_v44  ;;  %v1002_v43 = vmul.f32 %v1001_v42, %v1995_v15 }
 0x78c   :  { %929 = vrot.lane.b32.xlu0 %v911_v44, %s1908_s29  ;;  %927 = vrot.lane.b32.xlu1 %v911_v44, %s1909_s30  ;;  %v956_v50 = vsub.f32 %v954_v46, %v955_v45  ;;  %v963_v52 = vadd.f32 %v962_v49, %v961_v48  ;;  %v1003_v44 = vstv %s1777_s27  ;;  %v1006_v46 = vstv %s1005_s13  ;;  %s2394_s27 = sld [smem:[#allocation2 + $0x90]] }
 0x78d   :  { %v1007_v53 = vmul.f32 %v1006_v46, %v1995_v15  ;;  %s1794_s13 = sld [smem:[#allocation2 + $0x93]] }
 0x7fa   :  { %v923_v60 = vpop.permute.xlu0 %922  ;;  %v921_v0 = vpop.permute.xlu1 %920 }
 0x7fb   :  { %v925_v2 = vmul.f32 %v923_v60, %v1988_v4  ;;  %v924_v5 = vmul.f32 %v921_v0, %v1959_v21  ;;  %v1008_v60 = vstv %s1778_s4  ;;  %s1797_s4 = sld [smem:[#allocation2 + $0x96]] }
 0x7fc   :  { %v1009_v9 = vadd.f32 %v1008_v60, %v1007_v53 }
 0x7fd   :  { %v926_v8 = vadd.f32 %v925_v2, %v924_v5  ;;  %v1052_v2 = vstv %s1051_s19  ;;  %s1112_s19 = ssub.f32 %s1795_s12, %s1793_s11 }
 0x7fe   :  { %v930_v12 = vpop.permute.xlu0 %929  ;;  %v928_v13 = vpop.permute.xlu1 %927  ;;  %s2436_s12 = sld [smem:[#allocation2 + $0xa1]] }
 0x7ff   :  { %v957_v16 = vmul.f32 %v948_v3, %v926_v8  ;;  %v932_v17 = vmul.f32 %v930_v12, %v1988_v4  ;;  %v931_v54 = vmul.f32 %v928_v13, %v1959_v21  ;;  %v966_v29 = vmul.f32 %v953_v58, %v926_v8 }
 0x800   :  { %v1048_v8 = vmul.f32 %v1047_v57, %v2025_v61  ;;  %v1049_v12 = vstv %s2374_s9  ;;  %v1053_v13 = vmul.f32 %v1052_v2, %v2025_v61  ;;  %v1110_v2 = vstv %s2396_s3  ;;  %s1163_s3 = ssub.f32 %s1806_s23, %s2416_s21 }
 0x801   :  { %v933_v18 = vadd.f32 %v932_v17, %v931_v54  ;;  %v958_v59 = vadd.f32 %v957_v16, %v956_v50  ;;  %v1004_v50 = vadd.f32 %v1003_v44, %v1002_v43  ;;  %s1102_s9 = ssub.f32 %s1797_s4, %s2394_s27 }
 0x802   :  { %v1050_v55 = vadd.f32 %v1049_v12, %v1048_v8  ;;  %v1055_v20 = vadd.f32 %v1054_v14, %v1053_v13  ;;  %s1801_s4 = sld [smem:[#allocation2 + $0x9a]] }
 0x803   :  { %v959_v26 = vmul.f32 %v953_v58, %v933_v18  ;;  %v964_v27 = vmul.f32 %v948_v3, %v933_v18  ;;  %v1103_v44 = vstv %s1102_s9  ;;  %s1804_s9 = sld [smem:[#allocation2 + $0x9d]] }
 0x804   :  { %s1811_s23 = sld [smem:[#allocation2 + $0xa4]] }
 0x805   :  { %v960_v30 = vsub.f32 %v958_v59, %v959_v26  ;;  %v965_v31 = vadd.f32 %v964_v27, %v963_v52 }
 0x807   :  { %978 = vrot.lane.b32.xlu0 %v960_v30, %s1910_s14  ;;  %976 = vrot.lane.b32.xlu1 %v960_v30, %s1911_s15  ;;  %v967_v33 = vadd.f32 %v966_v29, %v965_v31  ;;  %v1010_v36 = vmul.f32 %v994_v1, %v960_v30  ;;  %v1018_v39 = vmul.f32 %v999_v32, %v960_v30  ;;  %v1057_v31 = vstv %s1056_s26  ;;  %s1117_s26 = ssub.f32 %s1796_s16, %s1794_s13 }
 0x808   :  { %s1814_s16 = sld [smem:[#allocation2 + $0xa7]] }
 0x809   :  { %v1011_v34 = vmul.f32 %v999_v32, %v967_v33  ;;  %v1017_v38 = vmul.f32 %v994_v1, %v967_v33  ;;  %v1058_v32 = vmul.f32 %v1057_v31, %v2025_v61 }
 0x80b   :  { %985 = vrot.lane.b32.xlu0 %v967_v33, %s1910_s14  ;;  %983 = vrot.lane.b32.xlu1 %v967_v33, %s1911_s15  ;;  %v1012_v40 = vsub.f32 %v1010_v36, %v1011_v34  ;;  %v1019_v41 = vadd.f32 %v1018_v39, %v1017_v38  ;;  %v1059_v33 = vstv %s1785_s20  ;;  %v1062_v36 = vstv %s1061_s8  ;;  %s2414_s20 = sld [smem:[#allocation2 + $0x98]] }
 0x80c   :  { %v1063_v42 = vmul.f32 %v1062_v36, %v2025_v61  ;;  %s1802_s8 = sld [smem:[#allocation2 + $0x9b]] }
 0x879   :  { %v979_v45 = vpop.permute.xlu0 %978  ;;  %v977_v48 = vpop.permute.xlu1 %976 }
 0x87a   :  { %v981_v49 = vmul.f32 %v979_v45, %v2018_v51  ;;  %v980_v52 = vmul.f32 %v977_v48, %v1995_v15  ;;  %v1064_v45 = vstv %s1786_s22  ;;  %s1805_s22 = sld [smem:[#allocation2 + $0x9e]] }
 0x87b   :  { %v1065_v57 = vadd.f32 %v1064_v45, %v1063_v42 }
 0x87c   :  { %v982_v56 = vadd.f32 %v981_v49, %v980_v52  ;;  %v1108_v49 = vstv %s1107_s10  ;;  %s1168_s10 = ssub.f32 %s1803_s5, %s1801_s4 }
 0x87d   :  { %v986_v63 = vpop.permute.xlu0 %985  ;;  %v984_v0 = vpop.permute.xlu1 %983  ;;  %s2456_s5 = sld [smem:[#allocation2 + $0xa9]] }
 0x87e   :  { %v1013_v3 = vmul.f32 %v1004_v50, %v982_v56  ;;  %v988_v5 = vmul.f32 %v986_v63, %v2018_v51  ;;  %v987_v6 = vmul.f32 %v984_v0, %v1995_v15  ;;  %v1022_v58 = vmul.f32 %v1009_v9, %v982_v56 }
 0x87f   :  { %v1104_v56 = vmul.f32 %v1103_v44, %v2055_v47  ;;  %v1105_v63 = vstv %s2394_s27  ;;  %v1109_v0 = vmul.f32 %v1108_v49, %v2055_v47  ;;  %v1166_v49 = vstv %s2416_s21  ;;  %s1219_s21 = ssub.f32 %s1814_s16, %s2436_s12 }
 0x880   :  { %v989_v10 = vadd.f32 %v988_v5, %v987_v6  ;;  %v1014_v16 = vadd.f32 %v1013_v3, %v1012_v40  ;;  %v1060_v40 = vadd.f32 %v1059_v33, %v1058_v32  ;;  %s1158_s27 = ssub.f32 %s1805_s22, %s2414_s20 }
 0x881   :  { %v1106_v8 = vadd.f32 %v1105_v63, %v1104_v56  ;;  %v1111_v13 = vadd.f32 %v1110_v2, %v1109_v0  ;;  %s1809_s22 = sld [smem:[#allocation2 + $0xa2]] }
 0x882   :  { %v1015_v17 = vmul.f32 %v1009_v9, %v989_v10  ;;  %v1020_v54 = vmul.f32 %v1004_v50, %v989_v10  ;;  %v1159_v33 = vstv %s1158_s27  ;;  %s1812_s27 = sld [smem:[#allocation2 + $0xa5]] }
 0x883   :  { %s1819_s16 = sld [smem:[#allocation2 + $0xac]] }
 0x884   :  { %v1016_v18 = vsub.f32 %v1014_v16, %v1015_v17  ;;  %v1021_v19 = vadd.f32 %v1020_v54, %v1019_v41 }
 0x886   :  { %1034 = vrot.lane.b32.xlu0 %v1016_v18, %s1912_s28  ;;  %1032 = vrot.lane.b32.xlu1 %v1016_v18, %s1913_s2  ;;  %v1023_v22 = vadd.f32 %v1022_v58, %v1021_v19  ;;  %v1066_v26 = vmul.f32 %v1050_v55, %v1016_v18  ;;  %v1074_v1 = vmul.f32 %v1055_v20, %v1016_v18  ;;  %v1113_v19 = vstv %s1112_s19  ;;  %s1173_s19 = ssub.f32 %s1804_s9, %s1802_s8 }
 0x887   :  { %s1822_s9 = sld [smem:[#allocation2 + $0xaf]] }
 0x888   :  { %v1067_v59 = vmul.f32 %v1055_v20, %v1023_v22  ;;  %v1073_v27 = vmul.f32 %v1050_v55, %v1023_v22  ;;  %v1114_v20 = vmul.f32 %v1113_v19, %v2055_v47 }
 0x88a   :  { %1041 = vrot.lane.b32.xlu0 %v1023_v22, %s1912_s28  ;;  %1039 = vrot.lane.b32.xlu1 %v1023_v22, %s1913_s2  ;;  %v1068_v29 = vsub.f32 %v1066_v26, %v1067_v59  ;;  %v1075_v30 = vadd.f32 %v1074_v1, %v1073_v27  ;;  %v1115_v22 = vstv %s1793_s11  ;;  %v1118_v26 = vstv %s1117_s26  ;;  %s2434_s11 = sld [smem:[#allocation2 + $0xa0]] }
 0x88b   :  { %v1119_v31 = vmul.f32 %v1118_v26, %v2055_v47  ;;  %s1810_s26 = sld [smem:[#allocation2 + $0xa3]] }
 0x8f8   :  { %v1035_v34 = vpop.permute.xlu0 %1034  ;;  %v1033_v38 = vpop.permute.xlu1 %1032 }
 0x8f9   :  { %v1037_v39 = vmul.f32 %v1035_v34, %v2048_v37  ;;  %v1036_v41 = vmul.f32 %v1033_v38, %v2025_v61  ;;  %v1120_v34 = vstv %s1794_s13  ;;  %s1813_s13 = sld [smem:[#allocation2 + $0xa6]] }
 0x8fa   :  { %v1121_v44 = vadd.f32 %v1120_v34, %v1119_v31 }
 0x8fb   :  { %v1038_v43 = vadd.f32 %v1037_v39, %v1036_v41  ;;  %v1164_v39 = vstv %s1163_s3  ;;  %s1224_s3 = ssub.f32 %s1811_s23, %s1809_s22 }
 0x8fc   :  { %v1042_v46 = vpop.permute.xlu0 %1041  ;;  %v1040_v48 = vpop.permute.xlu1 %1039  ;;  %s2476_s23 = sld [smem:[#allocation2 + $0xb1]] }
 0x8fd   :  { %v1069_v50 = vmul.f32 %v1060_v40, %v1038_v43  ;;  %v1044_v52 = vmul.f32 %v1042_v46, %v2048_v37  ;;  %v1043_v53 = vmul.f32 %v1040_v48, %v2025_v61  ;;  %v1078_v9 = vmul.f32 %v1065_v57, %v1038_v43 }
 0x8fe   :  { %v1160_v43 = vmul.f32 %v1159_v33, %v2085_v35  ;;  %v1161_v46 = vstv %s2414_s20  ;;  %v1165_v48 = vmul.f32 %v1164_v39, %v2085_v35  ;;  %v1222_v39 = vstv %s2436_s12  ;;  %s1273_s12 = ssub.f32 %s1822_s9, %s2456_s5 }
 0x8ff   :  { %v1045_v60 = vadd.f32 %v1044_v52, %v1043_v53  ;;  %v1070_v3 = vadd.f32 %v1069_v50, %v1068_v29  ;;  %v1116_v29 = vadd.f32 %v1115_v22, %v1114_v20  ;;  %s1214_s20 = ssub.f32 %s1813_s13, %s2434_s11 }
 0x900   :  { %v1162_v56 = vadd.f32 %v1161_v46, %v1160_v43  ;;  %v1167_v0 = vadd.f32 %v1166_v49, %v1165_v48  ;;  %s1817_s13 = sld [smem:[#allocation2 + $0xaa]] }
 0x901   :  { %v1071_v5 = vmul.f32 %v1065_v57, %v1045_v60  ;;  %v1076_v6 = vmul.f32 %v1060_v40, %v1045_v60  ;;  %v1215_v22 = vstv %s1214_s20  ;;  %s1820_s20 = sld [smem:[#allocation2 + $0xad]] }
 0x902   :  { %s1826_s9 = sld [smem:[#allocation2 + $0xb3]] }
 0x903   :  { %v1072_v10 = vsub.f32 %v1070_v3, %v1071_v5  ;;  %v1077_v12 = vadd.f32 %v1076_v6, %v1075_v30 }
 0x905   :  { %1090 = vrot.lane.b32.xlu0 %v1072_v10, %s1914_s17  ;;  %1088 = vrot.lane.b32.xlu1 %v1072_v10, %s1915_s18  ;;  %v1079_v14 = vadd.f32 %v1078_v9, %v1077_v12  ;;  %v1122_v17 = vmul.f32 %v1106_v8, %v1072_v10  ;;  %v1130_v55 = vmul.f32 %v1111_v13, %v1072_v10  ;;  %v1169_v12 = vstv %s1168_s10  ;;  %s1229_s10 = ssub.f32 %s1812_s27, %s1810_s26 }
 0x906   :  { %s1830_s27 = sld [smem:[#allocation2 + $0xb7]] }
 0x907   :  { %v1123_v16 = vmul.f32 %v1111_v13, %v1079_v14  ;;  %v1129_v54 = vmul.f32 %v1106_v8, %v1079_v14  ;;  %v1170_v13 = vmul.f32 %v1169_v12, %v2085_v35 }
 0x909   :  { %1097 = vrot.lane.b32.xlu0 %v1079_v14, %s1914_s17  ;;  %1095 = vrot.lane.b32.xlu1 %v1079_v14, %s1915_s18  ;;  %v1124_v58 = vsub.f32 %v1122_v17, %v1123_v16  ;;  %v1131_v18 = vadd.f32 %v1130_v55, %v1129_v54  ;;  %v1171_v14 = vstv %s1801_s4  ;;  %v1174_v17 = vstv %s1173_s19  ;;  %s2454_s4 = sld [smem:[#allocation2 + $0xa8]] }
 0x90a   :  { %v1175_v19 = vmul.f32 %v1174_v17, %v2085_v35  ;;  %s1818_s19 = sld [smem:[#allocation2 + $0xab]] }
 0x977   :  { %v1091_v59 = vpop.permute.xlu0 %1090  ;;  %v1089_v27 = vpop.permute.xlu1 %1088 }
 0x978   :  { %v1093_v1 = vmul.f32 %v1091_v59, %v2078_v25  ;;  %v1092_v30 = vmul.f32 %v1089_v27, %v2055_v47  ;;  %v1176_v59 = vstv %s1802_s8  ;;  %s1821_s8 = sld [smem:[#allocation2 + $0xae]] }
 0x979   :  { %v1177_v33 = vadd.f32 %v1176_v59, %v1175_v19  ;;  %v1274_v19 = vstv %s1273_s12  ;;  %s2494_s12 = sld [smem:[#allocation2 + $0xb8]] }
 0x97a   :  { %v1094_v32 = vadd.f32 %v1093_v1, %v1092_v30  ;;  %v1220_v1 = vstv %s1219_s21  ;;  %s1278_s21 = ssub.f32 %s1819_s16, %s1817_s13 }
 0x97b   :  { %v1098_v36 = vpop.permute.xlu0 %1097  ;;  %v1096_v38 = vpop.permute.xlu1 %1095  ;;  %s1837_s16 = sld [smem:[#allocation2 + $0xbe]] }
 0x97c   :  { %v1125_v40 = vmul.f32 %v1116_v29, %v1094_v32  ;;  %v1100_v41 = vmul.f32 %v1098_v36, %v2078_v25  ;;  %v1099_v42 = vmul.f32 %v1096_v38, %v2055_v47  ;;  %v1134_v57 = vmul.f32 %v1121_v44, %v1094_v32 }
 0x97d   :  { %v1216_v32 = vmul.f32 %v1215_v22, %v2115_v23  ;;  %v1217_v36 = vstv %s2434_s11  ;;  %v1221_v38 = vmul.f32 %v1220_v1, %v2115_v23 }
 0x97e   :  { %v1101_v45 = vadd.f32 %v1100_v41, %v1099_v42  ;;  %v1126_v50 = vadd.f32 %v1125_v40, %v1124_v58  ;;  %v1172_v58 = vadd.f32 %v1171_v14, %v1170_v13  ;;  %s1268_s11 = ssub.f32 %s1821_s8, %s2454_s4  ;;  %v1232_v14 = vstv %s1810_s26 }
 0x97f   :  { %v1218_v43 = vadd.f32 %v1217_v36, %v1216_v32  ;;  %v1223_v48 = vadd.f32 %v1222_v39, %v1221_v38  ;;  %s1829_s26 = sld [smem:[#allocation2 + $0xb6]] }
 0x980   :  { %v1127_v52 = vmul.f32 %v1121_v44, %v1101_v45  ;;  %v1132_v53 = vmul.f32 %v1116_v29, %v1101_v45  ;;  %s1827_s8 = sld [smem:[#allocation2 + $0xb4]] }
 0x982   :  { %v1128_v60 = vsub.f32 %v1126_v50, %v1127_v52  ;;  %v1133_v63 = vadd.f32 %v1132_v53, %v1131_v18 }
 0x984   :  { %1146 = vrot.lane.b32.xlu0 %v1128_v60, %s1916_s6  ;;  %1144 = vrot.lane.b32.xlu1 %v1128_v60, %s1917_s7  ;;  %v1135_v2 = vadd.f32 %v1134_v57, %v1133_v63  ;;  %v1178_v5 = vmul.f32 %v1162_v56, %v1128_v60  ;;  %v1186_v8 = vmul.f32 %v1167_v0, %v1128_v60  ;;  %v1225_v63 = vstv %s1224_s3  ;;  %s1283_s3 = ssub.f32 %s1820_s20, %s1818_s19 }
 0x986   :  { %v1179_v3 = vmul.f32 %v1167_v0, %v1135_v2  ;;  %v1185_v6 = vmul.f32 %v1162_v56, %v1135_v2  ;;  %v1226_v0 = vmul.f32 %v1225_v63, %v2115_v23 }
 0x988   :  { %1153 = vrot.lane.b32.xlu0 %v1135_v2, %s1916_s6  ;;  %1151 = vrot.lane.b32.xlu1 %v1135_v2, %s1917_s7  ;;  %v1180_v9 = vsub.f32 %v1178_v5, %v1179_v3  ;;  %v1187_v10 = vadd.f32 %v1186_v8, %v1185_v6  ;;  %v1227_v2 = vstv %s1809_s22  ;;  %v1230_v5 = vstv %s1229_s10  ;;  %s2474_s22 = sld [smem:[#allocation2 + $0xb0]] }
 0x989   :  { %v1231_v12 = vmul.f32 %v1230_v5, %v2115_v23  ;;  %s1828_s10 = sld [smem:[#allocation2 + $0xb5]] }
 0x98f   :  { %s1339_s20 = ssub.f32 %s1828_s10, %s1826_s9 }
 0x990   :  { %s1843_s10 = sld [smem:[#allocation2 + $0xc4]] }
 0x9f6   :  { %v1147_v16 = vpop.permute.xlu0 %1146  ;;  %v1145_v54 = vpop.permute.xlu1 %1144 }
 0x9f7   :  { %v1149_v55 = vmul.f32 %v1147_v16, %v2107_v11  ;;  %v1148_v18 = vmul.f32 %v1145_v54, %v2085_v35 }
 0x9f9   :  { %v1150_v20 = vadd.f32 %v1149_v55, %v1148_v18  ;;  %v1269_v18 = vstv %s1268_s11 }
 0x9fa   :  { %v1154_v26 = vpop.permute.xlu0 %1153  ;;  %v1152_v27 = vpop.permute.xlu1 %1151  ;;  %v1270_v59 = vmul.f32 %v1269_v18, %v1944_v7 }
 0x9fb   :  { %v1181_v29 = vmul.f32 %v1172_v58, %v1150_v20  ;;  %v1156_v30 = vmul.f32 %v1154_v26, %v2107_v11  ;;  %v1155_v31 = vmul.f32 %v1152_v27, %v2085_v35  ;;  %v1190_v44 = vmul.f32 %v1177_v33, %v1150_v20 }
 0x9fc   :  { %v1233_v20 = vadd.f32 %v1232_v14, %v1231_v12 }
 0x9fd   :  { %v1157_v34 = vadd.f32 %v1156_v30, %v1155_v31  ;;  %v1182_v40 = vadd.f32 %v1181_v29, %v1180_v9  ;;  %v1228_v9 = vadd.f32 %v1227_v2, %v1226_v0  ;;  %v1275_v29 = vmul.f32 %v1274_v19, %v1944_v7 }
 0x9fe   :  { %v1271_v30 = vstv %s2454_s4  ;;  %v1276_v31 = vstv %s2456_s5  ;;  %s1329_s4 = ssub.f32 %s1830_s27, %s2476_s23 }
 0x9ff   :  { %v1183_v41 = vmul.f32 %v1177_v33, %v1157_v34  ;;  %v1188_v42 = vmul.f32 %v1172_v58, %v1157_v34  ;;  %v1272_v38 = vadd.f32 %v1271_v30, %v1270_v59  ;;  %v1277_v39 = vadd.f32 %v1276_v31, %v1275_v29  ;;  %s1825_s5 = sld [smem:[#allocation2 + $0xb2]] }
 0xa00   :  { %v1330_v5 = vstv %s1329_s4  ;;  %s1845_s4 = sld [smem:[#allocation2 + $0xc6]] }
 0xa01   :  { %v1184_v45 = vsub.f32 %v1182_v40, %v1183_v41  ;;  %v1189_v46 = vadd.f32 %v1188_v42, %v1187_v10 }
 0xa03   :  { %1202 = vrot.lane.b32.xlu0 %v1184_v45, %s1918_s24  ;;  %1200 = vrot.lane.b32.xlu1 %v1184_v45, %s1919_s25  ;;  %v1191_v49 = vadd.f32 %v1190_v44, %v1189_v46  ;;  %v1234_v52 = vmul.f32 %v1218_v43, %v1184_v45  ;;  %v1242_v56 = vmul.f32 %v1223_v48, %v1184_v45 }
 0xa05   :  { %v1235_v50 = vmul.f32 %v1223_v48, %v1191_v49  ;;  %v1241_v53 = vmul.f32 %v1218_v43, %v1191_v49  ;;  %s1334_s11 = ssub.f32 %s1827_s8, %s1825_s5 }
 0xa07   :  { %1209 = vrot.lane.b32.xlu0 %v1191_v49, %s1918_s24  ;;  %1207 = vrot.lane.b32.xlu1 %v1191_v49, %s1919_s25  ;;  %v1236_v57 = vsub.f32 %v1234_v52, %v1235_v50  ;;  %v1243_v60 = vadd.f32 %v1242_v56, %v1241_v53  ;;  %v1284_v50 = vstv %s1283_s3  ;;  %v1281_v52 = vstv %s1817_s13  ;;  %s2496_s13 = sld [smem:[#allocation2 + $0xb9]] }
 0xa08   :  { %v1285_v53 = vmul.f32 %v1284_v50, %v1944_v7  ;;  %v1286_v56 = vstv %s1818_s19  ;;  %s1838_s19 = sld [smem:[#allocation2 + $0xbf]] }
 0xa09   :  { %s2514_s3 = sld [smem:[#allocation2 + $0xc0]] }
 0xa75   :  { %v1203_v3 = vpop.permute.xlu0 %1202  ;;  %v1201_v6 = vpop.permute.xlu1 %1200 }
 0xa76   :  { %v1205_v8 = vmul.f32 %v1203_v3, %v2165_v28  ;;  %v1204_v10 = vmul.f32 %v1201_v6, %v2115_v23 }
 0xa78   :  { %v1206_v13 = vadd.f32 %v1205_v8, %v1204_v10  ;;  %v1287_v10 = vadd.f32 %v1286_v56, %v1285_v53 }
 0xa79   :  { %v1210_v16 = vpop.permute.xlu0 %1209  ;;  %v1208_v17 = vpop.permute.xlu1 %1207 }
 0xa7a   :  { %v1237_v54 = vmul.f32 %v1228_v9, %v1206_v13  ;;  %v1212_v55 = vmul.f32 %v1210_v16, %v2165_v28  ;;  %v1211_v58 = vmul.f32 %v1208_v17, %v2115_v23  ;;  %v1246_v32 = vmul.f32 %v1233_v20, %v1206_v13 }
 0xa7b   :  { %v1327_v16 = vstv %s2474_s22  ;;  %v1331_v17 = vmul.f32 %v1330_v5, %v1959_v21 }
 0xa7c   :  { %v1213_v22 = vadd.f32 %v1212_v55, %v1211_v58  ;;  %v1238_v26 = vadd.f32 %v1237_v54, %v1236_v57  ;;  %v1332_v54 = vstv %s2476_s23  ;;  %s1834_s23 = sld [smem:[#allocation2 + $0xbb]] }
 0xa7e   :  { %v1239_v27 = vmul.f32 %v1233_v20, %v1213_v22  ;;  %v1244_v1 = vmul.f32 %v1228_v9, %v1213_v22 }
 0xa80   :  { %v1245_v33 = vadd.f32 %v1244_v1, %v1243_v60  ;;  %v1240_v34 = vsub.f32 %v1238_v26, %v1239_v27  ;;  %v1333_v26 = vadd.f32 %v1332_v54, %v1331_v17 }
 0xa82   :  { %v1248_v36 = vmul.f32 %v1240_v34, %v2180_v62  ;;  %v1247_v40 = vadd.f32 %v1246_v32, %v1245_v33  ;;  %v1335_v32 = vstv %s1334_s11  ;;  %v1337_v34 = vstv %s1825_s5  ;;  %s1846_s5 = sld [smem:[#allocation2 + $0xc7]] }
 0xa83   :  { %v1336_v33 = vmul.f32 %v1335_v32, %v1959_v21  ;;  %s1842_s11 = sld [smem:[#allocation2 + $0xc3]] }
 0xa84   :  { %1258 = vrot.lane.b32.xlu1 %v1248_v36, %s1907_s0  ;;  %v1249_v41 = vmul.f32 %v1247_v40, %v2180_v62  ;;  %v1288_v42 = vmul.f32 %v1272_v38, %v1248_v36  ;;  %v1296_v43 = vmul.f32 %v1277_v39, %v1248_v36  ;;  %v1279_v62 = vstv %s1278_s21  ;;  %s1833_s21 = sld [smem:[#allocation2 + $0xba]] }
 0xa85   :  { %v1280_v49 = vmul.f32 %v1279_v62, %v1944_v7 }
 0xa86   :  { %1263 = vrot.lane.b32.xlu0 %v1249_v41, %s1907_s0  ;;  %v1289_v44 = vmul.f32 %v1277_v39, %v1249_v41  ;;  %v1295_v45 = vmul.f32 %v1272_v38, %v1249_v41  ;;  %s1324_s0 = ssub.f32 %s1829_s26, %s2474_s22  ;;  %v1340_v38 = vstv %s1339_s20  ;;  %v1338_v41 = vadd.f32 %v1337_v34, %v1336_v33 }
 0xa87   :  { %v1282_v60 = vadd.f32 %v1281_v52, %v1280_v49  ;;  %s1835_s22 = sld [smem:[#allocation2 + $0xbc]] }
 0xa88   :  { %v1290_v46 = vsub.f32 %v1288_v42, %v1289_v44  ;;  %v1297_v48 = vadd.f32 %v1296_v43, %v1295_v45  ;;  %v1325_v2 = vstv %s1324_s0  ;;  %v1341_v43 = vmul.f32 %v1340_v38, %v1959_v21  ;;  %s1836_s26 = sld [smem:[#allocation2 + $0xbd]] }
 0xa89   :  { %v1326_v12 = vmul.f32 %v1325_v2, %v1959_v21  ;;  %v1388_v2 = vstv %s2496_s13  ;;  %s2516_s0 = sld [smem:[#allocation2 + $0xc1]] }
 0xa8a   :  { %s1853_s20 = sld [smem:[#allocation2 + $0xce]] }
 0xa8b   :  { %v1328_v19 = vadd.f32 %v1327_v16, %v1326_v12 }
 0xa8d   :  { %s1390_s27 = ssub.f32 %s1835_s22, %s1833_s21 }
 0xa8e   :  { %s1395_s8 = ssub.f32 %s1836_s26, %s1834_s23 }
 0xa8f   :  { %s1851_s22 = sld [smem:[#allocation2 + $0xcc]] }
 0xa90   :  { %s1852_s26 = sld [smem:[#allocation2 + $0xcd]] }
 0xaf6   :  { %v1259_v57 = vpop.permute.xlu1 %1258 }
 0xaf7   :  { %v1260_v63 = vmul.f32 %v1259_v57, %v1944_v7  ;;  %v1261_v0 = vmul.f32 %v1259_v57, %v1963_v24 }
 0xaf8   :  { %v1264_v3 = vpop.permute.xlu0 %1263 }
 0xaf9   :  { %v1262_v6 = vadd.f32 %v1261_v0, %v1260_v63  ;;  %v1265_v8 = vmul.f32 %v1264_v3, %v1944_v7  ;;  %v1266_v9 = vmul.f32 %v1264_v3, %v1963_v24  ;;  %v1383_v63 = vstv %s2494_s12 }
 0xafb   :  { %v1291_v13 = vmul.f32 %v1282_v60, %v1262_v6  ;;  %v1267_v14 = vadd.f32 %v1266_v9, %v1265_v8  ;;  %v1300_v20 = vmul.f32 %v1287_v10, %v1262_v6 }
 0xafd   :  { %v1292_v55 = vadd.f32 %v1291_v13, %v1290_v46  ;;  %v1293_v58 = vmul.f32 %v1287_v10, %v1267_v14  ;;  %v1298_v18 = vmul.f32 %v1282_v60, %v1267_v14  ;;  %v1342_v46 = vstv %s1826_s9  ;;  %s1841_s9 = sld [smem:[#allocation2 + $0xc2]] }
 0xafe   :  { %v1343_v57 = vadd.f32 %v1342_v46, %v1341_v43 }
 0xaff   :  { %v1299_v22 = vadd.f32 %v1298_v18, %v1297_v48  ;;  %v1294_v59 = vsub.f32 %v1292_v55, %v1293_v58  ;;  %v1391_v58 = vstv %s1390_s27 }
 0xb00   :  { %v1392_v18 = vmul.f32 %v1391_v58, %v1995_v15 }
 0xb01   :  { %1312 = vrot.lane.b32.xlu0 %v1294_v59, %s1908_s29  ;;  %1310 = vrot.lane.b32.xlu1 %v1294_v59, %s1909_s30  ;;  %v1301_v7 = vadd.f32 %v1300_v20, %v1299_v22  ;;  %v1344_v27 = vmul.f32 %v1328_v19, %v1294_v59  ;;  %v1352_v29 = vmul.f32 %v1333_v26, %v1294_v59  ;;  %v1396_v22 = vstv %s1395_s8 }
 0xb03   :  { %v1345_v24 = vmul.f32 %v1333_v26, %v1301_v7  ;;  %v1351_v1 = vmul.f32 %v1328_v19, %v1301_v7  ;;  %v1393_v19 = vstv %s1833_s21  ;;  %s1849_s21 = sld [smem:[#allocation2 + $0xca]] }
 0xb05   :  { %1319 = vrot.lane.b32.xlu0 %v1301_v7, %s1908_s29  ;;  %1317 = vrot.lane.b32.xlu1 %v1301_v7, %s1909_s30  ;;  %v1346_v30 = vsub.f32 %v1344_v27, %v1345_v24  ;;  %v1353_v31 = vadd.f32 %v1352_v29, %v1351_v1  ;;  %s1380_s29 = ssub.f32 %s1837_s16, %s2494_s12  ;;  %v1394_v7 = vadd.f32 %v1393_v19, %v1392_v18 }
 0xb06   :  { %s1385_s30 = ssub.f32 %s1838_s19, %s2496_s13  ;;  %v1397_v27 = vmul.f32 %v1396_v22, %v1995_v15 }
 0xb07   :  { %v1381_v45 = vstv %s1380_s29  ;;  %s1844_s12 = sld [smem:[#allocation2 + $0xc5]] }
 0xb08   :  { %v1386_v49 = vstv %s1385_s30  ;;  %v1382_v56 = vmul.f32 %v1381_v45, %v1995_v15  ;;  %s1446_s13 = ssub.f32 %s1843_s10, %s1841_s9 }
 0xb09   :  { %v1387_v0 = vmul.f32 %v1386_v49, %v1995_v15  ;;  %s2534_s16 = sld [smem:[#allocation2 + $0xc8]] }
 0xb0a   :  { %v1384_v8 = vadd.f32 %v1383_v63, %v1382_v56  ;;  %s2536_s19 = sld [smem:[#allocation2 + $0xc9]] }
 0xb0b   :  { %v1389_v13 = vadd.f32 %v1388_v2, %v1387_v0  ;;  %s1854_s29 = sld [smem:[#allocation2 + $0xcf]]  ;;  %v1447_v2 = vstv %s1446_s13 }
 0xb0c   :  { %s1502_s27 = ssub.f32 %s1851_s22, %s1849_s21 }
 0xb0d   :  { %s1451_s30 = ssub.f32 %s1844_s12, %s1842_s11 }
 0xb0e   :  { %s1860_s10 = sld [smem:[#allocation2 + $0xd5]] }
 0xb0f   :  { %s2574_s12 = sld [smem:[#allocation2 + $0xd8]] }
 0xb10   :  { %s2576_s13 = sld [smem:[#allocation2 + $0xd9]] }
 0xb73   :  { %v1313_v36 = vpop.permute.xlu0 %1312  ;;  %v1311_v39 = vpop.permute.xlu1 %1310 }
 0xb74   :  { %v1315_v40 = vmul.f32 %v1313_v36, %v1988_v4  ;;  %v1314_v42 = vmul.f32 %v1311_v39, %v1959_v21 }
 0xb76   :  { %v1316_v44 = vadd.f32 %v1315_v40, %v1314_v42  ;;  %v1439_v42 = vstv %s2514_s3 }
 0xb77   :  { %v1320_v48 = vpop.permute.xlu0 %1319  ;;  %v1318_v62 = vpop.permute.xlu1 %1317 }
 0xb78   :  { %v1347_v50 = vmul.f32 %v1338_v41, %v1316_v44  ;;  %v1322_v52 = vmul.f32 %v1320_v48, %v1988_v4  ;;  %v1321_v53 = vmul.f32 %v1318_v62, %v1959_v21  ;;  %v1356_v9 = vmul.f32 %v1343_v57, %v1316_v44 }
 0xb79   :  { %v1444_v44 = vstv %s2516_s0 }
 0xb7a   :  { %v1323_v60 = vadd.f32 %v1322_v52, %v1321_v53  ;;  %v1348_v3 = vadd.f32 %v1347_v50, %v1346_v30  ;;  %v1398_v30 = vstv %s1834_s23  ;;  %s1850_s23 = sld [smem:[#allocation2 + $0xcb]] }
 0xb7b   :  { %v1399_v40 = vadd.f32 %v1398_v30, %v1397_v27 }
 0xb7c   :  { %v1349_v5 = vmul.f32 %v1343_v57, %v1323_v60  ;;  %v1354_v6 = vmul.f32 %v1338_v41, %v1323_v60 }
 0xb7e   :  { %v1350_v10 = vsub.f32 %v1348_v3, %v1349_v5  ;;  %v1355_v12 = vadd.f32 %v1354_v6, %v1353_v31  ;;  %v1448_v3 = vmul.f32 %v1447_v2, %v2025_v61  ;;  %v1449_v5 = vstv %s1841_s9  ;;  %s1858_s9 = sld [smem:[#allocation2 + $0xd3]] }
 0xb80   :  { %1368 = vrot.lane.b32.xlu0 %v1350_v10, %s1910_s14  ;;  %1366 = vrot.lane.b32.xlu1 %v1350_v10, %s1911_s15  ;;  %v1357_v21 = vadd.f32 %v1356_v9, %v1355_v12  ;;  %v1400_v14 = vmul.f32 %v1384_v8, %v1350_v10  ;;  %v1408_v17 = vmul.f32 %v1389_v13, %v1350_v10  ;;  %s1507_s8 = ssub.f32 %s1852_s26, %s1850_s23 }
 0xb81   :  { %v1450_v12 = vadd.f32 %v1449_v5, %v1448_v3 }
 0xb82   :  { %v1401_v4 = vmul.f32 %v1389_v13, %v1357_v21  ;;  %v1407_v16 = vmul.f32 %v1384_v8, %v1357_v21  ;;  %v1452_v8 = vstv %s1451_s30  ;;  %s1867_s30 = sld [smem:[#allocation2 + $0xdc]] }
 0xb84   :  { %1375 = vrot.lane.b32.xlu0 %v1357_v21, %s1910_s14  ;;  %1373 = vrot.lane.b32.xlu1 %v1357_v21, %s1911_s15  ;;  %v1402_v54 = vsub.f32 %v1400_v14, %v1401_v4  ;;  %v1409_v55 = vadd.f32 %v1408_v17, %v1407_v16  ;;  %s1436_s14 = ssub.f32 %s1845_s4, %s2514_s3  ;;  %v1453_v21 = vmul.f32 %v1452_v8, %v2025_v61  ;;  %v1454_v16 = vstv %s1842_s11 }
 0xb85   :  { %s1441_s15 = ssub.f32 %s1846_s5, %s2516_s0 }
 0xb86   :  { %v1437_v29 = vstv %s1436_s14  ;;  %v1455_v22 = vadd.f32 %v1454_v16, %v1453_v21  ;;  %s2554_s3 = sld [smem:[#allocation2 + $0xd0]] }
 0xb87   :  { %v1442_v33 = vstv %s1441_s15  ;;  %v1438_v39 = vmul.f32 %v1437_v29, %v2025_v61  ;;  %s2556_s0 = sld [smem:[#allocation2 + $0xd1]] }
 0xb88   :  { %v1443_v43 = vmul.f32 %v1442_v33, %v2025_v61  ;;  %s1861_s4 = sld [smem:[#allocation2 + $0xd6]] }
 0xb89   :  { %v1440_v62 = vadd.f32 %v1439_v42, %v1438_v39  ;;  %s1862_s5 = sld [smem:[#allocation2 + $0xd7]]  ;;  %v1503_v42 = vstv %s1502_s27 }
 0xb8a   :  { %v1445_v53 = vadd.f32 %v1444_v44, %v1443_v43  ;;  %v1504_v43 = vmul.f32 %v1503_v42, %v2055_v47  ;;  %v1505_v44 = vstv %s1849_s21  ;;  %s1857_s14 = sld [smem:[#allocation2 + $0xd2]] }
 0xb8b   :  { %s1859_s15 = sld [smem:[#allocation2 + $0xd4]] }
 0xb8c   :  { %v1551_v8 = vstv %s2554_s3 }
 0xb91   :  { %s1558_s11 = ssub.f32 %s1859_s15, %s1857_s14 }
 0xbf2   :  { %v1369_v20 = vpop.permute.xlu0 %1368  ;;  %v1367_v59 = vpop.permute.xlu1 %1366 }
 0xbf3   :  { %v1371_v26 = vmul.f32 %v1369_v20, %v2018_v51  ;;  %v1370_v24 = vmul.f32 %v1367_v59, %v1995_v15 }
 0xbf5   :  { %v1372_v1 = vadd.f32 %v1371_v26, %v1370_v24  ;;  %v1495_v26 = vstv %s2534_s16  ;;  %v1500_v24 = vstv %s2536_s19 }
 0xbf6   :  { %v1376_v31 = vpop.permute.xlu0 %1375  ;;  %v1374_v32 = vpop.permute.xlu1 %1373 }
 0xbf7   :  { %v1403_v34 = vmul.f32 %v1394_v7, %v1372_v1  ;;  %v1378_v36 = vmul.f32 %v1376_v31, %v2018_v51  ;;  %v1377_v38 = vmul.f32 %v1374_v32, %v1995_v15  ;;  %v1412_v49 = vmul.f32 %v1399_v40, %v1372_v1 }
 0xbf9   :  { %v1379_v41 = vadd.f32 %v1378_v36, %v1377_v38  ;;  %v1404_v45 = vadd.f32 %v1403_v34, %v1402_v54 }
 0xbfb   :  { %v1405_v46 = vmul.f32 %v1399_v40, %v1379_v41  ;;  %v1410_v48 = vmul.f32 %v1394_v7, %v1379_v41 }
 0xbfd   :  { %v1406_v50 = vsub.f32 %v1404_v45, %v1405_v46  ;;  %v1411_v52 = vadd.f32 %v1410_v48, %v1409_v55  ;;  %v1508_v46 = vstv %s1507_s8 }
 0xbff   :  { %1424 = vrot.lane.b32.xlu0 %v1406_v50, %s1912_s28  ;;  %1422 = vrot.lane.b32.xlu1 %v1406_v50, %s1913_s2  ;;  %v1413_v15 = vadd.f32 %v1412_v49, %v1411_v52  ;;  %v1456_v56 = vmul.f32 %v1440_v62, %v1406_v50  ;;  %v1464_v60 = vmul.f32 %v1445_v53, %v1406_v50 }
 0xc00   :  { %v1506_v49 = vadd.f32 %v1505_v44, %v1504_v43  ;;  %v1509_v52 = vmul.f32 %v1508_v46, %v2055_v47  ;;  %v1607_v44 = vstv %s2574_s12  ;;  %v1612_v46 = vstv %s2576_s13 }
 0xc01   :  { %v1457_v51 = vmul.f32 %v1445_v53, %v1413_v15  ;;  %v1463_v57 = vmul.f32 %v1440_v62, %v1413_v15 }
 0xc03   :  { %1431 = vrot.lane.b32.xlu0 %v1413_v15, %s1912_s28  ;;  %1429 = vrot.lane.b32.xlu1 %v1413_v15, %s1913_s2  ;;  %v1458_v63 = vsub.f32 %v1456_v56, %v1457_v51  ;;  %v1465_v0 = vadd.f32 %v1464_v60, %v1463_v57  ;;  %s1492_s28 = ssub.f32 %s1853_s20, %s2534_s16  ;;  %v1510_v51 = vstv %s1850_s23 }
 0xc04   :  { %s1497_s2 = ssub.f32 %s1854_s29, %s2536_s19  ;;  %v1511_v5 = vadd.f32 %v1510_v51, %v1509_v52 }
 0xc05   :  { %v1493_v14 = vstv %s1492_s28  ;;  %s1869_s16 = sld [smem:[#allocation2 + $0xde]] }
 0xc06   :  { %v1498_v55 = vstv %s1497_s2  ;;  %v1494_v20 = vmul.f32 %v1493_v14, %v2055_v47  ;;  %s1870_s19 = sld [smem:[#allocation2 + $0xdf]] }
 0xc07   :  { %v1499_v7 = vmul.f32 %v1498_v55, %v2055_v47  ;;  %s1563_s20 = ssub.f32 %s1860_s10, %s1858_s9 }
 0xc08   :  { %v1496_v30 = vadd.f32 %v1495_v26, %v1494_v20  ;;  %v1561_v26 = vstv %s1857_s14  ;;  %s1865_s29 = sld [smem:[#allocation2 + $0xda]] }
 0xc09   :  { %v1501_v34 = vadd.f32 %v1500_v24, %v1499_v7  ;;  %v1564_v24 = vstv %s1563_s20  ;;  %s1866_s28 = sld [smem:[#allocation2 + $0xdb]] }
 0xc0a   :  { %s1868_s2 = sld [smem:[#allocation2 + $0xdd]] }
 0xc0e   :  { %s1614_s21 = ssub.f32 %s1867_s30, %s1865_s29 }
 0xc10   :  { %s1619_s22 = ssub.f32 %s1868_s2, %s1866_s28 }
 0xc71   :  { %v1425_v6 = vpop.permute.xlu0 %1424  ;;  %v1423_v9 = vpop.permute.xlu1 %1422 }
 0xc72   :  { %v1427_v10 = vmul.f32 %v1425_v6, %v2048_v37  ;;  %v1426_v13 = vmul.f32 %v1423_v9, %v2025_v61 }
 0xc74   :  { %v1428_v4 = vadd.f32 %v1427_v10, %v1426_v13  ;;  %v1556_v10 = vstv %s2556_s0 }
 0xc75   :  { %v1432_v17 = vpop.permute.xlu0 %1431  ;;  %v1430_v54 = vpop.permute.xlu1 %1429 }
 0xc76   :  { %v1459_v58 = vmul.f32 %v1450_v12, %v1428_v4  ;;  %v1434_v18 = vmul.f32 %v1432_v17, %v2048_v37  ;;  %v1433_v19 = vmul.f32 %v1430_v54, %v2025_v61  ;;  %v1468_v31 = vmul.f32 %v1455_v22, %v1428_v4 }
 0xc78   :  { %v1435_v59 = vadd.f32 %v1434_v18, %v1433_v19  ;;  %v1460_v27 = vadd.f32 %v1459_v58, %v1458_v63 }
 0xc7a   :  { %v1461_v1 = vmul.f32 %v1455_v22, %v1435_v59  ;;  %v1466_v29 = vmul.f32 %v1450_v12, %v1435_v59  ;;  %v1559_v22 = vstv %s1558_s11 }
 0xc7b   :  { %v1560_v59 = vmul.f32 %v1559_v22, %v2085_v35 }
 0xc7c   :  { %v1462_v32 = vsub.f32 %v1460_v27, %v1461_v1  ;;  %v1467_v33 = vadd.f32 %v1466_v29, %v1465_v0 }
 0xc7d   :  { %v1562_v29 = vadd.f32 %v1561_v26, %v1560_v59 }
 0xc7e   :  { %1480 = vrot.lane.b32.xlu0 %v1462_v32, %s1914_s17  ;;  %1478 = vrot.lane.b32.xlu1 %v1462_v32, %s1915_s18  ;;  %v1469_v61 = vadd.f32 %v1468_v31, %v1467_v33  ;;  %v1512_v36 = vmul.f32 %v1496_v30, %v1462_v32  ;;  %v1520_v39 = vmul.f32 %v1501_v34, %v1462_v32 }
 0xc7f   :  { %v1565_v31 = vmul.f32 %v1564_v24, %v2085_v35 }
 0xc80   :  { %v1513_v37 = vmul.f32 %v1501_v34, %v1469_v61  ;;  %v1519_v38 = vmul.f32 %v1496_v30, %v1469_v61  ;;  %v1566_v34 = vstv %s1858_s9 }
 0xc81   :  { %v1567_v42 = vadd.f32 %v1566_v34, %v1565_v31 }
 0xc82   :  { %1487 = vrot.lane.b32.xlu0 %v1469_v61, %s1914_s17  ;;  %1485 = vrot.lane.b32.xlu1 %v1469_v61, %s1915_s18  ;;  %v1514_v40 = vsub.f32 %v1512_v36, %v1513_v37  ;;  %v1521_v41 = vadd.f32 %v1520_v39, %v1519_v38  ;;  %s1548_s17 = ssub.f32 %s1861_s4, %s2554_s3 }
 0xc83   :  { %s1553_s18 = ssub.f32 %s1862_s5, %s2556_s0 }
 0xc84   :  { %v1549_v15 = vstv %s1548_s17 }
 0xc85   :  { %v1554_v60 = vstv %s1553_s18  ;;  %v1550_v3 = vmul.f32 %v1549_v15, %v2085_v35 }
 0xc86   :  { %v1555_v9 = vmul.f32 %v1554_v60, %v2085_v35 }
 0xc87   :  { %v1552_v4 = vadd.f32 %v1551_v8, %v1550_v3  ;;  %v1620_v8 = vstv %s1619_s22 }
 0xc88   :  { %v1557_v54 = vadd.f32 %v1556_v10, %v1555_v9 }
 0xcf0   :  { %v1481_v45 = vpop.permute.xlu0 %1480  ;;  %v1479_v48 = vpop.permute.xlu1 %1478 }
 0xcf1   :  { %v1483_v62 = vmul.f32 %v1481_v45, %v2078_v25  ;;  %v1482_v50 = vmul.f32 %v1479_v48, %v2055_v47 }
 0xcf3   :  { %v1484_v53 = vadd.f32 %v1483_v62, %v1482_v50 }
 0xcf4   :  { %v1488_v56 = vpop.permute.xlu0 %1487  ;;  %v1486_v57 = vpop.permute.xlu1 %1485 }
 0xcf5   :  { %v1515_v63 = vmul.f32 %v1506_v49, %v1484_v53  ;;  %v1490_v0 = vmul.f32 %v1488_v56, %v2078_v25  ;;  %v1489_v2 = vmul.f32 %v1486_v57, %v2055_v47  ;;  %v1524_v14 = vmul.f32 %v1511_v5, %v1484_v53 }
 0xcf7   :  { %v1491_v6 = vadd.f32 %v1490_v0, %v1489_v2  ;;  %v1516_v12 = vadd.f32 %v1515_v63, %v1514_v40  ;;  %v1615_v2 = vstv %s1614_s21 }
 0xcf8   :  { %v1616_v3 = vmul.f32 %v1615_v2, %v2115_v23 }
 0xcf9   :  { %v1517_v13 = vmul.f32 %v1511_v5, %v1491_v6  ;;  %v1522_v21 = vmul.f32 %v1506_v49, %v1491_v6  ;;  %v1617_v5 = vstv %s1865_s29 }
 0xcfb   :  { %v1518_v16 = vsub.f32 %v1516_v12, %v1517_v13  ;;  %v1523_v17 = vadd.f32 %v1522_v21, %v1521_v41  ;;  %v1618_v12 = vadd.f32 %v1617_v5, %v1616_v3  ;;  %v1621_v21 = vmul.f32 %v1620_v8, %v2115_v23 }
 0xcfd   :  { %1536 = vrot.lane.b32.xlu0 %v1518_v16, %s1916_s6  ;;  %1534 = vrot.lane.b32.xlu1 %v1518_v16, %s1917_s7  ;;  %v1525_v47 = vadd.f32 %v1524_v14, %v1523_v17  ;;  %v1568_v55 = vmul.f32 %v1552_v4, %v1518_v16  ;;  %v1576_v18 = vmul.f32 %v1557_v54, %v1518_v16  ;;  %v1622_v14 = vstv %s1866_s28 }
 0xcff   :  { %v1569_v25 = vmul.f32 %v1557_v54, %v1525_v47  ;;  %v1575_v58 = vmul.f32 %v1552_v4, %v1525_v47 }
 0xd01   :  { %1543 = vrot.lane.b32.xlu0 %v1525_v47, %s1916_s6  ;;  %1541 = vrot.lane.b32.xlu1 %v1525_v47, %s1917_s7  ;;  %v1570_v19 = vsub.f32 %v1568_v55, %v1569_v25  ;;  %v1577_v20 = vadd.f32 %v1576_v18, %v1575_v58  ;;  %s1604_s6 = ssub.f32 %s1869_s16, %s2574_s12  ;;  %v1623_v55 = vadd.f32 %v1622_v14, %v1621_v21 }
 0xd02   :  { %s1609_s7 = ssub.f32 %s1870_s19, %s2576_s13 }
 0xd03   :  { %v1605_v33 = vstv %s1604_s6 }
 0xd04   :  { %v1610_v36 = vstv %s1609_s7  ;;  %v1606_v41 = vmul.f32 %v1605_v33, %v2115_v23 }
 0xd05   :  { %v1611_v45 = vmul.f32 %v1610_v36, %v2115_v23 }
 0xd06   :  { %v1608_v50 = vadd.f32 %v1607_v44, %v1606_v41 }
 0xd07   :  { %v1613_v51 = vadd.f32 %v1612_v46, %v1611_v45 }
 0xd6f   :  { %v1537_v7 = vpop.permute.xlu0 %1536  ;;  %v1535_v27 = vpop.permute.xlu1 %1534 }
 0xd70   :  { %v1539_v1 = vmul.f32 %v1537_v7, %v2107_v11  ;;  %v1538_v30 = vmul.f32 %v1535_v27, %v2085_v35 }
 0xd72   :  { %v1540_v32 = vadd.f32 %v1539_v1, %v1538_v30 }
 0xd73   :  { %v1544_v61 = vpop.permute.xlu0 %1543  ;;  %v1542_v37 = vpop.permute.xlu1 %1541 }
 0xd74   :  { %v1571_v38 = vmul.f32 %v1562_v29, %v1540_v32  ;;  %v1546_v39 = vmul.f32 %v1544_v61, %v2107_v11  ;;  %v1545_v40 = vmul.f32 %v1542_v37, %v2085_v35  ;;  %v1580_v52 = vmul.f32 %v1567_v42, %v1540_v32 }
 0xd76   :  { %v1547_v43 = vadd.f32 %v1546_v39, %v1545_v40  ;;  %v1572_v48 = vadd.f32 %v1571_v38, %v1570_v19 }
 0xd78   :  { %v1573_v62 = vmul.f32 %v1567_v42, %v1547_v43  ;;  %v1578_v49 = vmul.f32 %v1562_v29, %v1547_v43 }
 0xd7a   :  { %v1574_v53 = vsub.f32 %v1572_v48, %v1573_v62  ;;  %v1579_v15 = vadd.f32 %v1578_v49, %v1577_v20 }
 0xd7c   :  { %1592 = vrot.lane.b32.xlu0 %v1574_v53, %s1918_s24  ;;  %1590 = vrot.lane.b32.xlu1 %v1574_v53, %s1919_s25  ;;  %v1581_v35 = vadd.f32 %v1580_v52, %v1579_v15  ;;  %v1624_v56 = vmul.f32 %v1608_v50, %v1574_v53  ;;  %v1632_v60 = vmul.f32 %v1613_v51, %v1574_v53 }
 0xd7e   :  { %v1625_v11 = vmul.f32 %v1613_v51, %v1581_v35  ;;  %v1631_v57 = vmul.f32 %v1608_v50, %v1581_v35 }
 0xd80   :  { %1599 = vrot.lane.b32.xlu0 %v1581_v35, %s1918_s24  ;;  %1597 = vrot.lane.b32.xlu1 %v1581_v35, %s1919_s25  ;;  %v1626_v63 = vsub.f32 %v1624_v56, %v1625_v11  ;;  %v1633_v0 = vadd.f32 %v1632_v60, %v1631_v57 }
 0xdee   :  { %v1593_v6 = vpop.permute.xlu0 %1592  ;;  %v1591_v9 = vpop.permute.xlu1 %1590 }
 0xdef   :  { %v1595_v10 = vmul.f32 %v1593_v6, %v2165_v28  ;;  %v1594_v13 = vmul.f32 %v1591_v9, %v2115_v23 }
 0xdf1   :  { %v1596_v4 = vadd.f32 %v1595_v10, %v1594_v13 }
 0xdf2   :  { %v1600_v16 = vpop.permute.xlu0 %1599  ;;  %v1598_v17 = vpop.permute.xlu1 %1597 }
 0xdf3   :  { %v1627_v54 = vmul.f32 %v1618_v12, %v1596_v4  ;;  %v1602_v47 = vmul.f32 %v1600_v16, %v2165_v28  ;;  %v1601_v25 = vmul.f32 %v1598_v17, %v2115_v23  ;;  %v1636_v22 = vmul.f32 %v1623_v55, %v1596_v4 }
 0xdf5   :  { %v1603_v58 = vadd.f32 %v1602_v47, %v1601_v25  ;;  %v1628_v18 = vadd.f32 %v1627_v54, %v1626_v63 }
 0xdf7   :  { %v1629_v19 = vmul.f32 %v1623_v55, %v1603_v58  ;;  %v1634_v20 = vmul.f32 %v1618_v12, %v1603_v58 }
 0xdf9   :  { %v1630_v59 = vsub.f32 %v1628_v18, %v1629_v19  ;;  %v1635_v26 = vadd.f32 %v1634_v20, %v1633_v0 }
 0xdfb   :  { %v1637_v7 = vadd.f32 %v1636_v22, %v1635_v26  ;;  %v1638_v24 = vmul.f32 %v1630_v59, %v1630_v59 }
 0xdfd   :  { %v1639_v27 = vmul.f32 %v1637_v7, %v1637_v7 }
 0xdff   :  { %v1640_v1 = vadd.f32 %v1639_v27, %v1638_v24 }
 0xe01   :  { %1641 = vst [vmem:[%s2604_s1] sm:$0xff] %v1640_v1 }
 0xe02   :  { %1646 = vsyncpa [#allocation3], 1 }

</bundles_post_ra>
